<compile_context>
chip_gen: v5e
topology: v5e:2x2
jax: 0.10.0
libtpu: 0.0.40
codegen_flags: <defaults>
</compile_context>

<pallas_src>
import numpy as np
import jax
import jax.numpy as jnp
from jax.experimental import pallas as pl
from jax.experimental.pallas import tpu as pltpu

LEAKY_SLOPE = 0.01            # nn.LeakyReLU default negative_slope
BN_EPS = 1e-5                 # nn.BatchNorm2d default eps
LANE = 128                    # TPU vreg lane width: channel dims padded to this
MATMUL_DTYPE = jnp.bfloat16   # MXU-native operand dtype (accumulation is f32)
KSIZE, STRIDE, PAD = 3, 2, 1


def _conv_out(n):
    return (n + 2 * PAD - KSIZE) // STRIDE + 1


def _build_gather_matrix(batch, h, w):
    """Constant 0/1 tensor S (9, M, N*H*W): S[t, m, r] = 1 iff output pixel m,
    conv tap t=(ki,kj), reads input pixel r.  Zero rows encode zero padding."""
    ho, wo = _conv_out(h), _conv_out(w)
    m, r = batch * ho * wo, batch * h * w
    sel = np.zeros((KSIZE * KSIZE, m, r), dtype=np.float32)
    for ki in range(KSIZE):
        for kj in range(KSIZE):
            t = ki * KSIZE + kj
            for n in range(batch):
                for i in range(ho):
                    hh = STRIDE * i + ki - PAD
                    if not 0 <= hh < h:
                        continue
                    for j in range(wo):
                        ww = STRIDE * j + kj - PAD
                        if not 0 <= ww < w:
                            continue
                        sel[t, (n * ho + i) * wo + j, (n * h + hh) * w + ww] = 1.0
    return sel, ho, wo


# ----------------------------------------------------------------------------
# Fused Pallas kernel: conv -> BN -> LeakyReLU (x n_layers) -> fc_mu / fc_var
# ----------------------------------------------------------------------------
def _make_encoder_kernel(n_layers):
    def kernel(*refs):
        x_ref = refs[0]
        conv_refs = refs[1:1 + 5 * n_layers]
        wh_ref = refs[1 + 5 * n_layers]
        bh_ref = refs[2 + 5 * n_layers]
        mu_ref = refs[3 + 5 * n_layers]
        lv_ref = refs[4 + 5 * n_layers]

        x = x_ref[...]                                   # (N*H*W, 128) bf16
        for l in range(n_layers):
            s_ref, w_ref, b_ref, g_ref, beta_ref = conv_refs[5 * l:5 * l + 5]
            # im2col done on the MXU: nine exact 0/1-selection matmuls build a
            # lane-dense (M, 9*128) patch block entirely in VMEM (no HBM
            # im2col, zero padding folded into the selection constants).
            taps = [
                jnp.dot(s_ref[t], x, preferred_element_type=jnp.float32
                        ).astype(MATMUL_DTYPE)
                for t in range(KSIZE * KSIZE)
            ]
            patches = jnp.concatenate(taps, axis=1)      # (M, 9*128) bf16
            # Conv2d(k=3, s=2, p=1) == one matmul against packed weights.
            y = jnp.dot(patches, w_ref[...],
                        preferred_element_type=jnp.float32) + b_ref[...]
            # BatchNorm2d, training-mode biased batch statistics: rows of y are
            # exactly the (N, Ho, Wo) positions.  Two-pass variance keeps the
            # f32 statistics numerically safe.
            mean = jnp.mean(y, axis=0, keepdims=True)
            cen = y - mean
            var = jnp.mean(cen * cen, axis=0, keepdims=True)
            y = cen * jax.lax.rsqrt(var + BN_EPS) * g_ref[...] + beta_ref[...]
            # LeakyReLU(0.01); keep inter-layer activations bf16 for the MXU.
            x = jnp.where(y >= 0.0, y, LEAKY_SLOPE * y).astype(MATMUL_DTYPE)

        # Final spatial is 1x1 -> x is (N, 128) == flatten(start_dim=1), padded.
        # fc_mu / fc_var fused into one (128, 256) matmul; each output slab is a
        # full 128-lane vreg wide -> unmasked, lane-dense stores.
        out = jnp.dot(x, wh_ref[...], preferred_element_type=jnp.float32) + bh_ref[...]
        mu_ref[...] = out[:, :LANE]
        lv_ref[...] = out[:, LANE:]

    return kernel


# ----------------------------------------------------------------------------
# Wrapper: builds the fused pallas_call for fixed (static) shapes
# ----------------------------------------------------------------------------
def make_encoder_forward(batch, in_channels, spatial, hidden_dims, latent_dim):
    # Static per-layer gather constants (shift + stride + zero padding).
    sels, layer_rows = [], []
    h = w = spatial
    for _ in hidden_dims:
        sel, ho, wo = _build_gather_matrix(batch, h, w)
        sels.append(jnp.asarray(sel, dtype=MATMUL_DTYPE))
        layer_rows.append((batch * ho * wo, batch * h * w))
        h, w = ho, wo
    assert h == 1 and w == 1, (
        "Encoder assumes the final feature map is 1x1 "
        "(the PyTorch module hardcodes flatten_dim = hidden_dims[-1] * 1 * 1)")

    kernel = _make_encoder_kernel(len(hidden_dims))
    num_inputs = 1 + 5 * len(hidden_dims) + 2

    # Advisory cost estimate for the XLA scheduler.
    flops = 0
    for m_out, r_in in layer_rows:
        flops += 2 * 9 * m_out * r_in * LANE          # selection (gather) matmuls
        flops += 2 * m_out * 9 * LANE * LANE          # conv matmul
    flops += 2 * batch * LANE * 2 * LANE              # fused heads matmul
    bytes_accessed = 2 * batch * spatial * spatial * LANE      # bf16 input
    bytes_accessed += sum(2 * int(np.prod(s.shape)) for s in sels)
    bytes_accessed += len(hidden_dims) * (2 * 9 * LANE * LANE + 3 * 4 * LANE)
    bytes_accessed += 2 * LANE * 2 * LANE + 4 * 2 * LANE
    bytes_accessed += 2 * batch * LANE * 4                     # f32 outputs
    cost = pl.CostEstimate(flops=int(flops),
                           transcendentals=int(len(hidden_dims) * LANE),
                           bytes_accessed=int(bytes_accessed))

    vmem_spec = pl.BlockSpec(memory_space=pltpu.MemorySpace.VMEM)
    encoder_call = pl.pallas_call(
        kernel,
        out_shape=(jax.ShapeDtypeStruct((batch, LANE), jnp.float32),
                   jax.ShapeDtypeStruct((batch, LANE), jnp.float32)),
        in_specs=[vmem_spec] * num_inputs,
        out_specs=(vmem_spec, vmem_spec),
        cost_estimate=cost,
        compiler_params=pltpu.CompilerParams(vmem_limit_bytes=32 * 1024 * 1024),
    )

    @jax.jit
    def forward(x_nchw, conv_params, head_params):
        n, c, hh, ww = x_nchw.shape
        # Boundary layout plumbing only: NCHW -> (N*H*W, C) padded to 128 lanes.
        x = jnp.transpose(x_nchw, (0, 2, 3, 1)).reshape(n * hh * ww, c)
        x = jnp.pad(x, ((0, 0), (0, LANE - c))).astype(MATMUL_DTYPE)
        operands = [x]
        for sel, p in zip(sels, conv_params):
            operands += [sel, p["w"], p["b"], p["gamma"], p["beta"]]
        operands += [head_params["w"], head_params["b"]]
        mu_pad, lv_pad = encoder_call(*operands)
        return mu_pad[:, :latent_dim], lv_pad[:, :latent_dim]

    return forward


# ----------------------------------------------------------------------------
# Parameter init (PyTorch-default) and lane-dense packing for the kernel
# ----------------------------------------------------------------------------
def init_raw_params(key, hidden_dims, latent_dim, in_channels):
    """PyTorch-default init, kept in PyTorch layouts (also used by reference)."""
    convs = []
    c_in = in_channels
    for h_dim in hidden_dims:
        key, kw, kb = jax.random.split(key, 3)
        bound = 1.0 / np.sqrt(c_in * KSIZE * KSIZE)
        convs.append(dict(
            w=jax.random.uniform(kw, (h_dim, c_in, KSIZE, KSIZE), jnp.float32, -bound, bound),
            b=jax.random.uniform(kb, (h_dim,), jnp.float32, -bound, bound),
            gamma=jnp.ones((h_dim,), jnp.float32),
            beta=jnp.zeros((h_dim,), jnp.float32),
        ))
        c_in = h_dim
    flat = hidden_dims[-1]
    key, k1, k2, k3, k4 = jax.random.split(key, 5)
    bound = 1.0 / np.sqrt(flat)
    heads = dict(
        w_mu=jax.random.uniform(k1, (latent_dim, flat), jnp.float32, -bound, bound),
        b_mu=jax.random.uniform(k2, (latent_dim,), jnp.float32, -bound, bound),
        w_var=jax.random.uniform(k3, (latent_dim, flat), jnp.float32, -bound, bound),
        b_var=jax.random.uniform(k4, (latent_dim,), jnp.float32, -bound, bound),
    )
    return dict(convs=convs, heads=heads)


def pack_params(raw, latent_dim):
    """Zero-pad / repack raw params into the lane-dense layouts the kernel uses."""
    conv_params = []
    for layer in raw["convs"]:
        w = layer["w"]                                     # (C_out, C_in, 3, 3)
        c_out, c_in = w.shape[0], w.shape[1]
        wt = jnp.transpose(w, (2, 3, 1, 0)).reshape(KSIZE * KSIZE, c_in, c_out)
        w_pad = jnp.zeros((KSIZE * KSIZE, LANE, LANE), jnp.float32)
        w_pad = w_pad.at[:, :c_in, :c_out].set(wt).reshape(KSIZE * KSIZE * LANE, LANE)
        conv_params.append(dict(
            w=w_pad.astype(MATMUL_DTYPE),
            b=jnp.zeros((1, LANE), jnp.float32).at[0, :c_out].set(layer["b"]),
            gamma=jnp.zeros((1, LANE), jnp.float32).at[0, :c_out].set(layer["gamma"]),
            beta=jnp.zeros((1, LANE), jnp.float32).at[0, :c_out].set(layer["beta"]),
        ))
    hd = raw["heads"]
    flat = hd["w_mu"].shape[1]
    w_heads = jnp.zeros((LANE, 2 * LANE), jnp.float32)
    w_heads = w_heads.at[:flat, :latent_dim].set(hd["w_mu"].T)
    w_heads = w_heads.at[:flat, LANE:LANE + latent_dim].set(hd["w_var"].T)
    b_heads = jnp.zeros((1, 2 * LANE), jnp.float32)
    b_heads = b_heads.at[0, :latent_dim].set(hd["b_mu"])
    b_heads = b_heads.at[0, LANE:LANE + latent_dim].set(hd["b_var"])
    return conv_params, dict(w=w_heads.astype(MATMUL_DTYPE), b=b_heads)


# ----------------------------------------------------------------------------
# Pure-JAX reference (same bf16-operand / f32-accumulation rounding)
# ----------------------------------------------------------------------------
def encoder_reference(x_nchw, raw):
    x = x_nchw.astype(jnp.float32)
    for layer in raw["convs"]:
        y = jax.lax.conv_general_dilated(
            x.astype(MATMUL_DTYPE), layer["w"].astype(MATMUL_DTYPE),
            window_strides=(STRIDE, STRIDE), padding=((PAD, PAD), (PAD, PAD)),
            dimension_numbers=("NCHW", "OIHW", "NCHW"),
            preferred_element_type=jnp.float32)
        y = y + layer["b"][None, :, None, None]
        mean = jnp.mean(y, axis=(0, 2, 3), keepdims=True)
        var = jnp.mean(jnp.square(y - mean), axis=(0, 2, 3), keepdims=True)
        y = (y - mean) * jax.lax.rsqrt(var + BN_EPS)
        y = y * layer["gamma"][None, :, None, None] + layer["beta"][None, :, None, None]
        y = jnp.where(y >= 0.0, y, LEAKY_SLOPE * y)
        x = y.astype(MATMUL_DTYPE).astype(jnp.float32)
    hd = raw["heads"]
    flat = x.reshape(x.shape[0], -1).astype(MATMUL_DTYPE)
    mu = jnp.dot(flat, hd["w_mu"].T.astype(MATMUL_DTYPE),
                 preferred_element_type=jnp.float32) + hd["b_mu"]
    log_var = jnp.dot(flat, hd["w_var"].T.astype(MATMUL_DTYPE),
                      preferred_element_type=jnp.float32) + hd["b_var"]
    return mu, log_var


if __name__ == "__main__":
    hidden_dims = [8, 16, 32]
    latent_dim = 16
    in_channels = 3
    batch = 4
    spatial = 2 ** len(hidden_dims)   # 8: three stride-2 convs -> 1x1 feature map

    key = jax.random.PRNGKey(0)
    kx, kp = jax.random.split(key)
    x = jax.random.normal(kx, (batch, in_channels, spatial, spatial), jnp.float32)

    raw = init_raw_params(kp, hidden_dims, latent_dim, in_channels)
    conv_params, head_params = pack_params(raw, latent_dim)
    encoder_forward = make_encoder_forward(batch, in_channels, spatial,
                                           hidden_dims, latent_dim)

    mu, log_var = encoder_forward(x, conv_params, head_params)
    jax.block_until_ready((mu, log_var))

    assert mu.shape == (batch, latent_dim) and log_var.shape == (batch, latent_dim)
    assert bool(jnp.all(jnp.isfinite(mu))) and bool(jnp.all(jnp.isfinite(log_var)))

    # Structural correctness check against a plain-JAX forward with matching
    # bf16-operand / f32-accumulation rounding (differences ~1e-5, tol 1e-2).
    mu_ref, lv_ref = encoder_reference(x, raw)
    np.testing.assert_allclose(np.asarray(mu), np.asarray(mu_ref), rtol=1e-2, atol=1e-2)
    np.testing.assert_allclose(np.asarray(log_var), np.asarray(lv_ref), rtol=1e-2, atol=1e-2)

    print("KERNEL_OK")
</pallas_src>

<mosaic_0001>
module attributes {stable_mosaic.version = 11 : i64} {
  func.func @kernel(%arg0: memref<256x128xbf16, #tpu.memory_space<vmem>>, %arg1: memref<9x64x256xbf16, #tpu.memory_space<vmem>>, %arg2: memref<1152x128xbf16, #tpu.memory_space<vmem>>, %arg3: memref<1x128xf32, #tpu.memory_space<vmem>>, %arg4: memref<1x128xf32, #tpu.memory_space<vmem>>, %arg5: memref<1x128xf32, #tpu.memory_space<vmem>>, %arg6: memref<9x16x64xbf16, #tpu.memory_space<vmem>>, %arg7: memref<1152x128xbf16, #tpu.memory_space<vmem>>, %arg8: memref<1x128xf32, #tpu.memory_space<vmem>>, %arg9: memref<1x128xf32, #tpu.memory_space<vmem>>, %arg10: memref<1x128xf32, #tpu.memory_space<vmem>>, %arg11: memref<9x4x16xbf16, #tpu.memory_space<vmem>>, %arg12: memref<1152x128xbf16, #tpu.memory_space<vmem>>, %arg13: memref<1x128xf32, #tpu.memory_space<vmem>>, %arg14: memref<1x128xf32, #tpu.memory_space<vmem>>, %arg15: memref<1x128xf32, #tpu.memory_space<vmem>>, %arg16: memref<128x256xbf16, #tpu.memory_space<vmem>>, %arg17: memref<1x256xf32, #tpu.memory_space<vmem>>, %arg18: memref<4x128xf32, #tpu.memory_space<vmem>>, %arg19: memref<4x128xf32, #tpu.memory_space<vmem>>) attributes {dimension_semantics = [], scalar_prefetch = 0 : i64, scratch_operands = 0 : i64, tpu.core_type = #tpu.core_type<tc>} {
    %c0 = arith.constant 0 : index
    %c0_0 = arith.constant 0 : index
    %0 = vector.load %arg0[%c0, %c0_0] : memref<256x128xbf16, #tpu.memory_space<vmem>>, vector<256x128xbf16>
    %c0_1 = arith.constant 0 : index
    %c0_2 = arith.constant 0 : index
    %c0_3 = arith.constant 0 : index
    %1 = vector.load %arg1[%c0_1, %c0_2, %c0_3] : memref<9x64x256xbf16, #tpu.memory_space<vmem>>, vector<1x64x256xbf16>
    %2 = vector.shape_cast %1 : vector<1x64x256xbf16> to vector<64x256xbf16>
    %cst = arith.constant dense<0.000000e+00> : vector<64x128xf32>
    %3 = tpu.matmul %2, %0, %cst {dimension_numbers = #tpu.dot_dimension_numbers<[1], [0], [0], [1], [0, 0, 1, 1], [], []>} : vector<64x256xbf16>, vector<256x128xbf16>, vector<64x128xf32> -> vector<64x128xf32>
    %4 = arith.truncf %3 : vector<64x128xf32> to vector<64x128xbf16>
    %c1 = arith.constant 1 : index
    %c0_4 = arith.constant 0 : index
    %c0_5 = arith.constant 0 : index
    %5 = vector.load %arg1[%c1, %c0_4, %c0_5] : memref<9x64x256xbf16, #tpu.memory_space<vmem>>, vector<1x64x256xbf16>
    %6 = vector.shape_cast %5 : vector<1x64x256xbf16> to vector<64x256xbf16>
    %cst_6 = arith.constant dense<0.000000e+00> : vector<64x128xf32>
    %7 = tpu.matmul %6, %0, %cst_6 {dimension_numbers = #tpu.dot_dimension_numbers<[1], [0], [0], [1], [0, 0, 1, 1], [], []>} : vector<64x256xbf16>, vector<256x128xbf16>, vector<64x128xf32> -> vector<64x128xf32>
    %8 = arith.truncf %7 : vector<64x128xf32> to vector<64x128xbf16>
    %c2 = arith.constant 2 : index
    %c0_7 = arith.constant 0 : index
    %c0_8 = arith.constant 0 : index
    %9 = vector.load %arg1[%c2, %c0_7, %c0_8] : memref<9x64x256xbf16, #tpu.memory_space<vmem>>, vector<1x64x256xbf16>
    %10 = vector.shape_cast %9 : vector<1x64x256xbf16> to vector<64x256xbf16>
    %cst_9 = arith.constant dense<0.000000e+00> : vector<64x128xf32>
    %11 = tpu.matmul %10, %0, %cst_9 {dimension_numbers = #tpu.dot_dimension_numbers<[1], [0], [0], [1], [0, 0, 1, 1], [], []>} : vector<64x256xbf16>, vector<256x128xbf16>, vector<64x128xf32> -> vector<64x128xf32>
    %12 = arith.truncf %11 : vector<64x128xf32> to vector<64x128xbf16>
    %c3 = arith.constant 3 : index
    %c0_10 = arith.constant 0 : index
    %c0_11 = arith.constant 0 : index
    %13 = vector.load %arg1[%c3, %c0_10, %c0_11] : memref<9x64x256xbf16, #tpu.memory_space<vmem>>, vector<1x64x256xbf16>
    %14 = vector.shape_cast %13 : vector<1x64x256xbf16> to vector<64x256xbf16>
    %cst_12 = arith.constant dense<0.000000e+00> : vector<64x128xf32>
    %15 = tpu.matmul %14, %0, %cst_12 {dimension_numbers = #tpu.dot_dimension_numbers<[1], [0], [0], [1], [0, 0, 1, 1], [], []>} : vector<64x256xbf16>, vector<256x128xbf16>, vector<64x128xf32> -> vector<64x128xf32>
    %16 = arith.truncf %15 : vector<64x128xf32> to vector<64x128xbf16>
    %c4 = arith.constant 4 : index
    %c0_13 = arith.constant 0 : index
    %c0_14 = arith.constant 0 : index
    %17 = vector.load %arg1[%c4, %c0_13, %c0_14] : memref<9x64x256xbf16, #tpu.memory_space<vmem>>, vector<1x64x256xbf16>
    %18 = vector.shape_cast %17 : vector<1x64x256xbf16> to vector<64x256xbf16>
    %cst_15 = arith.constant dense<0.000000e+00> : vector<64x128xf32>
    %19 = tpu.matmul %18, %0, %cst_15 {dimension_numbers = #tpu.dot_dimension_numbers<[1], [0], [0], [1], [0, 0, 1, 1], [], []>} : vector<64x256xbf16>, vector<256x128xbf16>, vector<64x128xf32> -> vector<64x128xf32>
    %20 = arith.truncf %19 : vector<64x128xf32> to vector<64x128xbf16>
    %c5 = arith.constant 5 : index
    %c0_16 = arith.constant 0 : index
    %c0_17 = arith.constant 0 : index
    %21 = vector.load %arg1[%c5, %c0_16, %c0_17] : memref<9x64x256xbf16, #tpu.memory_space<vmem>>, vector<1x64x256xbf16>
    %22 = vector.shape_cast %21 : vector<1x64x256xbf16> to vector<64x256xbf16>
    %cst_18 = arith.constant dense<0.000000e+00> : vector<64x128xf32>
    %23 = tpu.matmul %22, %0, %cst_18 {dimension_numbers = #tpu.dot_dimension_numbers<[1], [0], [0], [1], [0, 0, 1, 1], [], []>} : vector<64x256xbf16>, vector<256x128xbf16>, vector<64x128xf32> -> vector<64x128xf32>
    %24 = arith.truncf %23 : vector<64x128xf32> to vector<64x128xbf16>
    %c6 = arith.constant 6 : index
    %c0_19 = arith.constant 0 : index
    %c0_20 = arith.constant 0 : index
    %25 = vector.load %arg1[%c6, %c0_19, %c0_20] : memref<9x64x256xbf16, #tpu.memory_space<vmem>>, vector<1x64x256xbf16>
    %26 = vector.shape_cast %25 : vector<1x64x256xbf16> to vector<64x256xbf16>
    %cst_21 = arith.constant dense<0.000000e+00> : vector<64x128xf32>
    %27 = tpu.matmul %26, %0, %cst_21 {dimension_numbers = #tpu.dot_dimension_numbers<[1], [0], [0], [1], [0, 0, 1, 1], [], []>} : vector<64x256xbf16>, vector<256x128xbf16>, vector<64x128xf32> -> vector<64x128xf32>
    %28 = arith.truncf %27 : vector<64x128xf32> to vector<64x128xbf16>
    %c7 = arith.constant 7 : index
    %c0_22 = arith.constant 0 : index
    %c0_23 = arith.constant 0 : index
    %29 = vector.load %arg1[%c7, %c0_22, %c0_23] : memref<9x64x256xbf16, #tpu.memory_space<vmem>>, vector<1x64x256xbf16>
    %30 = vector.shape_cast %29 : vector<1x64x256xbf16> to vector<64x256xbf16>
    %cst_24 = arith.constant dense<0.000000e+00> : vector<64x128xf32>
    %31 = tpu.matmul %30, %0, %cst_24 {dimension_numbers = #tpu.dot_dimension_numbers<[1], [0], [0], [1], [0, 0, 1, 1], [], []>} : vector<64x256xbf16>, vector<256x128xbf16>, vector<64x128xf32> -> vector<64x128xf32>
    %32 = arith.truncf %31 : vector<64x128xf32> to vector<64x128xbf16>
    %c8 = arith.constant 8 : index
    %c0_25 = arith.constant 0 : index
    %c0_26 = arith.constant 0 : index
    %33 = vector.load %arg1[%c8, %c0_25, %c0_26] : memref<9x64x256xbf16, #tpu.memory_space<vmem>>, vector<1x64x256xbf16>
    %34 = vector.shape_cast %33 : vector<1x64x256xbf16> to vector<64x256xbf16>
    %cst_27 = arith.constant dense<0.000000e+00> : vector<64x128xf32>
    %35 = tpu.matmul %34, %0, %cst_27 {dimension_numbers = #tpu.dot_dimension_numbers<[1], [0], [0], [1], [0, 0, 1, 1], [], []>} : vector<64x256xbf16>, vector<256x128xbf16>, vector<64x128xf32> -> vector<64x128xf32>
    %36 = arith.truncf %35 : vector<64x128xf32> to vector<64x128xbf16>
    %37 = tpu.concatenate %4, %8, %12, %16, %20, %24, %28, %32, %36 in 1 : vector<64x128xbf16>, vector<64x128xbf16>, vector<64x128xbf16>, vector<64x128xbf16>, vector<64x128xbf16>, vector<64x128xbf16>, vector<64x128xbf16>, vector<64x128xbf16>, vector<64x128xbf16> -> vector<64x1152xbf16>
    %c0_28 = arith.constant 0 : index
    %c0_29 = arith.constant 0 : index
    %38 = vector.load %arg2[%c0_28, %c0_29] : memref<1152x128xbf16, #tpu.memory_space<vmem>>, vector<1152x128xbf16>
    %cst_30 = arith.constant dense<0.000000e+00> : vector<64x128xf32>
    %39 = tpu.matmul %37, %38, %cst_30 {dimension_numbers = #tpu.dot_dimension_numbers<[1], [0], [0], [1], [0, 0, 1, 1], [], []>} : vector<64x1152xbf16>, vector<1152x128xbf16>, vector<64x128xf32> -> vector<64x128xf32>
    %c0_31 = arith.constant 0 : index
    %c0_32 = arith.constant 0 : index
    %40 = vector.load %arg3[%c0_31, %c0_32] : memref<1x128xf32, #tpu.memory_space<vmem>>, vector<1x128xf32>
    %41 = vector.broadcast %40 : vector<1x128xf32> to vector<64x128xf32>
    %42 = arith.addf %39, %41 : vector<64x128xf32>
    %cst_33 = arith.constant dense<0.000000e+00> : vector<128xf32>
    %43 = vector.multi_reduction <add>, %42, %cst_33 [0] : vector<64x128xf32> to vector<128xf32>
    %44 = vector.shape_cast %43 : vector<128xf32> to vector<1x128xf32>
    %cst_34 = arith.constant 6.400000e+01 : f32
    %45 = vector.broadcast %cst_34 : f32 to vector<1x128xf32>
    %46 = arith.divf %44, %45 : vector<1x128xf32>
    %47 = vector.broadcast %46 : vector<1x128xf32> to vector<64x128xf32>
    %48 = arith.subf %42, %47 : vector<64x128xf32>
    %49 = arith.mulf %48, %48 : vector<64x128xf32>
    %cst_35 = arith.constant dense<0.000000e+00> : vector<128xf32>
    %50 = vector.multi_reduction <add>, %49, %cst_35 [0] : vector<64x128xf32> to vector<128xf32>
    %51 = vector.shape_cast %50 : vector<128xf32> to vector<1x128xf32>
    %cst_36 = arith.constant 6.400000e+01 : f32
    %52 = vector.broadcast %cst_36 : f32 to vector<1x128xf32>
    %53 = arith.divf %51, %52 : vector<1x128xf32>
    %cst_37 = arith.constant 9.99999974E-6 : f32
    %54 = vector.broadcast %cst_37 : f32 to vector<1x128xf32>
    %55 = arith.addf %53, %54 : vector<1x128xf32>
    %56 = math.rsqrt %55 : vector<1x128xf32>
    %57 = vector.broadcast %56 : vector<1x128xf32> to vector<64x128xf32>
    %58 = arith.mulf %48, %57 : vector<64x128xf32>
    %c0_38 = arith.constant 0 : index
    %c0_39 = arith.constant 0 : index
    %59 = vector.load %arg4[%c0_38, %c0_39] : memref<1x128xf32, #tpu.memory_space<vmem>>, vector<1x128xf32>
    %60 = vector.broadcast %59 : vector<1x128xf32> to vector<64x128xf32>
    %61 = arith.mulf %58, %60 : vector<64x128xf32>
    %c0_40 = arith.constant 0 : index
    %c0_41 = arith.constant 0 : index
    %62 = vector.load %arg5[%c0_40, %c0_41] : memref<1x128xf32, #tpu.memory_space<vmem>>, vector<1x128xf32>
    %63 = vector.broadcast %62 : vector<1x128xf32> to vector<64x128xf32>
    %64 = arith.addf %61, %63 : vector<64x128xf32>
    %cst_42 = arith.constant 0.000000e+00 : f32
    %65 = vector.broadcast %cst_42 : f32 to vector<64x128xf32>
    %66 = arith.cmpf oge, %64, %65 : vector<64x128xf32>
    %cst_43 = arith.constant 0.00999999977 : f32
    %67 = vector.broadcast %cst_43 : f32 to vector<64x128xf32>
    %68 = arith.mulf %67, %64 : vector<64x128xf32>
    %69 = arith.select %66, %64, %68 : vector<64x128xi1>, vector<64x128xf32>
    %70 = arith.truncf %69 : vector<64x128xf32> to vector<64x128xbf16>
    %c0_44 = arith.constant 0 : index
    %c0_45 = arith.constant 0 : index
    %c0_46 = arith.constant 0 : index
    %71 = vector.load %arg6[%c0_44, %c0_45, %c0_46] : memref<9x16x64xbf16, #tpu.memory_space<vmem>>, vector<1x16x64xbf16>
    %72 = vector.shape_cast %71 : vector<1x16x64xbf16> to vector<16x64xbf16>
    %cst_47 = arith.constant dense<0.000000e+00> : vector<16x128xf32>
    %73 = tpu.matmul %72, %70, %cst_47 {dimension_numbers = #tpu.dot_dimension_numbers<[1], [0], [0], [1], [0, 0, 1, 1], [], []>} : vector<16x64xbf16>, vector<64x128xbf16>, vector<16x128xf32> -> vector<16x128xf32>
    %74 = arith.truncf %73 : vector<16x128xf32> to vector<16x128xbf16>
    %c1_48 = arith.constant 1 : index
    %c0_49 = arith.constant 0 : index
    %c0_50 = arith.constant 0 : index
    %75 = vector.load %arg6[%c1_48, %c0_49, %c0_50] : memref<9x16x64xbf16, #tpu.memory_space<vmem>>, vector<1x16x64xbf16>
    %76 = vector.shape_cast %75 : vector<1x16x64xbf16> to vector<16x64xbf16>
    %cst_51 = arith.constant dense<0.000000e+00> : vector<16x128xf32>
    %77 = tpu.matmul %76, %70, %cst_51 {dimension_numbers = #tpu.dot_dimension_numbers<[1], [0], [0], [1], [0, 0, 1, 1], [], []>} : vector<16x64xbf16>, vector<64x128xbf16>, vector<16x128xf32> -> vector<16x128xf32>
    %78 = arith.truncf %77 : vector<16x128xf32> to vector<16x128xbf16>
    %c2_52 = arith.constant 2 : index
    %c0_53 = arith.constant 0 : index
    %c0_54 = arith.constant 0 : index
    %79 = vector.load %arg6[%c2_52, %c0_53, %c0_54] : memref<9x16x64xbf16, #tpu.memory_space<vmem>>, vector<1x16x64xbf16>
    %80 = vector.shape_cast %79 : vector<1x16x64xbf16> to vector<16x64xbf16>
    %cst_55 = arith.constant dense<0.000000e+00> : vector<16x128xf32>
    %81 = tpu.matmul %80, %70, %cst_55 {dimension_numbers = #tpu.dot_dimension_numbers<[1], [0], [0], [1], [0, 0, 1, 1], [], []>} : vector<16x64xbf16>, vector<64x128xbf16>, vector<16x128xf32> -> vector<16x128xf32>
    %82 = arith.truncf %81 : vector<16x128xf32> to vector<16x128xbf16>
    %c3_56 = arith.constant 3 : index
    %c0_57 = arith.constant 0 : index
    %c0_58 = arith.constant 0 : index
    %83 = vector.load %arg6[%c3_56, %c0_57, %c0_58] : memref<9x16x64xbf16, #tpu.memory_space<vmem>>, vector<1x16x64xbf16>
    %84 = vector.shape_cast %83 : vector<1x16x64xbf16> to vector<16x64xbf16>
    %cst_59 = arith.constant dense<0.000000e+00> : vector<16x128xf32>
    %85 = tpu.matmul %84, %70, %cst_59 {dimension_numbers = #tpu.dot_dimension_numbers<[1], [0], [0], [1], [0, 0, 1, 1], [], []>} : vector<16x64xbf16>, vector<64x128xbf16>, vector<16x128xf32> -> vector<16x128xf32>
    %86 = arith.truncf %85 : vector<16x128xf32> to vector<16x128xbf16>
    %c4_60 = arith.constant 4 : index
    %c0_61 = arith.constant 0 : index
    %c0_62 = arith.constant 0 : index
    %87 = vector.load %arg6[%c4_60, %c0_61, %c0_62] : memref<9x16x64xbf16, #tpu.memory_space<vmem>>, vector<1x16x64xbf16>
    %88 = vector.shape_cast %87 : vector<1x16x64xbf16> to vector<16x64xbf16>
    %cst_63 = arith.constant dense<0.000000e+00> : vector<16x128xf32>
    %89 = tpu.matmul %88, %70, %cst_63 {dimension_numbers = #tpu.dot_dimension_numbers<[1], [0], [0], [1], [0, 0, 1, 1], [], []>} : vector<16x64xbf16>, vector<64x128xbf16>, vector<16x128xf32> -> vector<16x128xf32>
    %90 = arith.truncf %89 : vector<16x128xf32> to vector<16x128xbf16>
    %c5_64 = arith.constant 5 : index
    %c0_65 = arith.constant 0 : index
    %c0_66 = arith.constant 0 : index
    %91 = vector.load %arg6[%c5_64, %c0_65, %c0_66] : memref<9x16x64xbf16, #tpu.memory_space<vmem>>, vector<1x16x64xbf16>
    %92 = vector.shape_cast %91 : vector<1x16x64xbf16> to vector<16x64xbf16>
    %cst_67 = arith.constant dense<0.000000e+00> : vector<16x128xf32>
    %93 = tpu.matmul %92, %70, %cst_67 {dimension_numbers = #tpu.dot_dimension_numbers<[1], [0], [0], [1], [0, 0, 1, 1], [], []>} : vector<16x64xbf16>, vector<64x128xbf16>, vector<16x128xf32> -> vector<16x128xf32>
    %94 = arith.truncf %93 : vector<16x128xf32> to vector<16x128xbf16>
    %c6_68 = arith.constant 6 : index
    %c0_69 = arith.constant 0 : index
    %c0_70 = arith.constant 0 : index
    %95 = vector.load %arg6[%c6_68, %c0_69, %c0_70] : memref<9x16x64xbf16, #tpu.memory_space<vmem>>, vector<1x16x64xbf16>
    %96 = vector.shape_cast %95 : vector<1x16x64xbf16> to vector<16x64xbf16>
    %cst_71 = arith.constant dense<0.000000e+00> : vector<16x128xf32>
    %97 = tpu.matmul %96, %70, %cst_71 {dimension_numbers = #tpu.dot_dimension_numbers<[1], [0], [0], [1], [0, 0, 1, 1], [], []>} : vector<16x64xbf16>, vector<64x128xbf16>, vector<16x128xf32> -> vector<16x128xf32>
    %98 = arith.truncf %97 : vector<16x128xf32> to vector<16x128xbf16>
    %c7_72 = arith.constant 7 : index
    %c0_73 = arith.constant 0 : index
    %c0_74 = arith.constant 0 : index
    %99 = vector.load %arg6[%c7_72, %c0_73, %c0_74] : memref<9x16x64xbf16, #tpu.memory_space<vmem>>, vector<1x16x64xbf16>
    %100 = vector.shape_cast %99 : vector<1x16x64xbf16> to vector<16x64xbf16>
    %cst_75 = arith.constant dense<0.000000e+00> : vector<16x128xf32>
    %101 = tpu.matmul %100, %70, %cst_75 {dimension_numbers = #tpu.dot_dimension_numbers<[1], [0], [0], [1], [0, 0, 1, 1], [], []>} : vector<16x64xbf16>, vector<64x128xbf16>, vector<16x128xf32> -> vector<16x128xf32>
    %102 = arith.truncf %101 : vector<16x128xf32> to vector<16x128xbf16>
    %c8_76 = arith.constant 8 : index
    %c0_77 = arith.constant 0 : index
    %c0_78 = arith.constant 0 : index
    %103 = vector.load %arg6[%c8_76, %c0_77, %c0_78] : memref<9x16x64xbf16, #tpu.memory_space<vmem>>, vector<1x16x64xbf16>
    %104 = vector.shape_cast %103 : vector<1x16x64xbf16> to vector<16x64xbf16>
    %cst_79 = arith.constant dense<0.000000e+00> : vector<16x128xf32>
    %105 = tpu.matmul %104, %70, %cst_79 {dimension_numbers = #tpu.dot_dimension_numbers<[1], [0], [0], [1], [0, 0, 1, 1], [], []>} : vector<16x64xbf16>, vector<64x128xbf16>, vector<16x128xf32> -> vector<16x128xf32>
    %106 = arith.truncf %105 : vector<16x128xf32> to vector<16x128xbf16>
    %107 = tpu.concatenate %74, %78, %82, %86, %90, %94, %98, %102, %106 in 1 : vector<16x128xbf16>, vector<16x128xbf16>, vector<16x128xbf16>, vector<16x128xbf16>, vector<16x128xbf16>, vector<16x128xbf16>, vector<16x128xbf16>, vector<16x128xbf16>, vector<16x128xbf16> -> vector<16x1152xbf16>
    %c0_80 = arith.constant 0 : index
    %c0_81 = arith.constant 0 : index
    %108 = vector.load %arg7[%c0_80, %c0_81] : memref<1152x128xbf16, #tpu.memory_space<vmem>>, vector<1152x128xbf16>
    %cst_82 = arith.constant dense<0.000000e+00> : vector<16x128xf32>
    %109 = tpu.matmul %107, %108, %cst_82 {dimension_numbers = #tpu.dot_dimension_numbers<[1], [0], [0], [1], [0, 0, 1, 1], [], []>} : vector<16x1152xbf16>, vector<1152x128xbf16>, vector<16x128xf32> -> vector<16x128xf32>
    %c0_83 = arith.constant 0 : index
    %c0_84 = arith.constant 0 : index
    %110 = vector.load %arg8[%c0_83, %c0_84] : memref<1x128xf32, #tpu.memory_space<vmem>>, vector<1x128xf32>
    %111 = vector.broadcast %110 : vector<1x128xf32> to vector<16x128xf32>
    %112 = arith.addf %109, %111 : vector<16x128xf32>
    %cst_85 = arith.constant dense<0.000000e+00> : vector<128xf32>
    %113 = vector.multi_reduction <add>, %112, %cst_85 [0] : vector<16x128xf32> to vector<128xf32>
    %114 = vector.shape_cast %113 : vector<128xf32> to vector<1x128xf32>
    %cst_86 = arith.constant 1.600000e+01 : f32
    %115 = vector.broadcast %cst_86 : f32 to vector<1x128xf32>
    %116 = arith.divf %114, %115 : vector<1x128xf32>
    %117 = vector.broadcast %116 : vector<1x128xf32> to vector<16x128xf32>
    %118 = arith.subf %112, %117 : vector<16x128xf32>
    %119 = arith.mulf %118, %118 : vector<16x128xf32>
    %cst_87 = arith.constant dense<0.000000e+00> : vector<128xf32>
    %120 = vector.multi_reduction <add>, %119, %cst_87 [0] : vector<16x128xf32> to vector<128xf32>
    %121 = vector.shape_cast %120 : vector<128xf32> to vector<1x128xf32>
    %cst_88 = arith.constant 1.600000e+01 : f32
    %122 = vector.broadcast %cst_88 : f32 to vector<1x128xf32>
    %123 = arith.divf %121, %122 : vector<1x128xf32>
    %cst_89 = arith.constant 9.99999974E-6 : f32
    %124 = vector.broadcast %cst_89 : f32 to vector<1x128xf32>
    %125 = arith.addf %123, %124 : vector<1x128xf32>
    %126 = math.rsqrt %125 : vector<1x128xf32>
    %127 = vector.broadcast %126 : vector<1x128xf32> to vector<16x128xf32>
    %128 = arith.mulf %118, %127 : vector<16x128xf32>
    %c0_90 = arith.constant 0 : index
    %c0_91 = arith.constant 0 : index
    %129 = vector.load %arg9[%c0_90, %c0_91] : memref<1x128xf32, #tpu.memory_space<vmem>>, vector<1x128xf32>
    %130 = vector.broadcast %129 : vector<1x128xf32> to vector<16x128xf32>
    %131 = arith.mulf %128, %130 : vector<16x128xf32>
    %c0_92 = arith.constant 0 : index
    %c0_93 = arith.constant 0 : index
    %132 = vector.load %arg10[%c0_92, %c0_93] : memref<1x128xf32, #tpu.memory_space<vmem>>, vector<1x128xf32>
    %133 = vector.broadcast %132 : vector<1x128xf32> to vector<16x128xf32>
    %134 = arith.addf %131, %133 : vector<16x128xf32>
    %cst_94 = arith.constant 0.000000e+00 : f32
    %135 = vector.broadcast %cst_94 : f32 to vector<16x128xf32>
    %136 = arith.cmpf oge, %134, %135 : vector<16x128xf32>
    %cst_95 = arith.constant 0.00999999977 : f32
    %137 = vector.broadcast %cst_95 : f32 to vector<16x128xf32>
    %138 = arith.mulf %137, %134 : vector<16x128xf32>
    %139 = arith.select %136, %134, %138 : vector<16x128xi1>, vector<16x128xf32>
    %140 = arith.truncf %139 : vector<16x128xf32> to vector<16x128xbf16>
    %c0_96 = arith.constant 0 : index
    %c0_97 = arith.constant 0 : index
    %c0_98 = arith.constant 0 : index
    %141 = vector.load %arg11[%c0_96, %c0_97, %c0_98] : memref<9x4x16xbf16, #tpu.memory_space<vmem>>, vector<1x4x16xbf16>
    %142 = vector.shape_cast %141 : vector<1x4x16xbf16> to vector<4x16xbf16>
    %cst_99 = arith.constant dense<0.000000e+00> : vector<4x128xf32>
    %143 = tpu.matmul %142, %140, %cst_99 {dimension_numbers = #tpu.dot_dimension_numbers<[1], [0], [0], [1], [0, 0, 1, 1], [], []>} : vector<4x16xbf16>, vector<16x128xbf16>, vector<4x128xf32> -> vector<4x128xf32>
    %144 = arith.truncf %143 : vector<4x128xf32> to vector<4x128xbf16>
    %c1_100 = arith.constant 1 : index
    %c0_101 = arith.constant 0 : index
    %c0_102 = arith.constant 0 : index
    %145 = vector.load %arg11[%c1_100, %c0_101, %c0_102] : memref<9x4x16xbf16, #tpu.memory_space<vmem>>, vector<1x4x16xbf16>
    %146 = vector.shape_cast %145 : vector<1x4x16xbf16> to vector<4x16xbf16>
    %cst_103 = arith.constant dense<0.000000e+00> : vector<4x128xf32>
    %147 = tpu.matmul %146, %140, %cst_103 {dimension_numbers = #tpu.dot_dimension_numbers<[1], [0], [0], [1], [0, 0, 1, 1], [], []>} : vector<4x16xbf16>, vector<16x128xbf16>, vector<4x128xf32> -> vector<4x128xf32>
    %148 = arith.truncf %147 : vector<4x128xf32> to vector<4x128xbf16>
    %c2_104 = arith.constant 2 : index
    %c0_105 = arith.constant 0 : index
    %c0_106 = arith.constant 0 : index
    %149 = vector.load %arg11[%c2_104, %c0_105, %c0_106] : memref<9x4x16xbf16, #tpu.memory_space<vmem>>, vector<1x4x16xbf16>
    %150 = vector.shape_cast %149 : vector<1x4x16xbf16> to vector<4x16xbf16>
    %cst_107 = arith.constant dense<0.000000e+00> : vector<4x128xf32>
    %151 = tpu.matmul %150, %140, %cst_107 {dimension_numbers = #tpu.dot_dimension_numbers<[1], [0], [0], [1], [0, 0, 1, 1], [], []>} : vector<4x16xbf16>, vector<16x128xbf16>, vector<4x128xf32> -> vector<4x128xf32>
    %152 = arith.truncf %151 : vector<4x128xf32> to vector<4x128xbf16>
    %c3_108 = arith.constant 3 : index
    %c0_109 = arith.constant 0 : index
    %c0_110 = arith.constant 0 : index
    %153 = vector.load %arg11[%c3_108, %c0_109, %c0_110] : memref<9x4x16xbf16, #tpu.memory_space<vmem>>, vector<1x4x16xbf16>
    %154 = vector.shape_cast %153 : vector<1x4x16xbf16> to vector<4x16xbf16>
    %cst_111 = arith.constant dense<0.000000e+00> : vector<4x128xf32>
    %155 = tpu.matmul %154, %140, %cst_111 {dimension_numbers = #tpu.dot_dimension_numbers<[1], [0], [0], [1], [0, 0, 1, 1], [], []>} : vector<4x16xbf16>, vector<16x128xbf16>, vector<4x128xf32> -> vector<4x128xf32>
    %156 = arith.truncf %155 : vector<4x128xf32> to vector<4x128xbf16>
    %c4_112 = arith.constant 4 : index
    %c0_113 = arith.constant 0 : index
    %c0_114 = arith.constant 0 : index
    %157 = vector.load %arg11[%c4_112, %c0_113, %c0_114] : memref<9x4x16xbf16, #tpu.memory_space<vmem>>, vector<1x4x16xbf16>
    %158 = vector.shape_cast %157 : vector<1x4x16xbf16> to vector<4x16xbf16>
    %cst_115 = arith.constant dense<0.000000e+00> : vector<4x128xf32>
    %159 = tpu.matmul %158, %140, %cst_115 {dimension_numbers = #tpu.dot_dimension_numbers<[1], [0], [0], [1], [0, 0, 1, 1], [], []>} : vector<4x16xbf16>, vector<16x128xbf16>, vector<4x128xf32> -> vector<4x128xf32>
    %160 = arith.truncf %159 : vector<4x128xf32> to vector<4x128xbf16>
    %c5_116 = arith.constant 5 : index
    %c0_117 = arith.constant 0 : index
    %c0_118 = arith.constant 0 : index
    %161 = vector.load %arg11[%c5_116, %c0_117, %c0_118] : memref<9x4x16xbf16, #tpu.memory_space<vmem>>, vector<1x4x16xbf16>
    %162 = vector.shape_cast %161 : vector<1x4x16xbf16> to vector<4x16xbf16>
    %cst_119 = arith.constant dense<0.000000e+00> : vector<4x128xf32>
    %163 = tpu.matmul %162, %140, %cst_119 {dimension_numbers = #tpu.dot_dimension_numbers<[1], [0], [0], [1], [0, 0, 1, 1], [], []>} : vector<4x16xbf16>, vector<16x128xbf16>, vector<4x128xf32> -> vector<4x128xf32>
    %164 = arith.truncf %163 : vector<4x128xf32> to vector<4x128xbf16>
    %c6_120 = arith.constant 6 : index
    %c0_121 = arith.constant 0 : index
    %c0_122 = arith.constant 0 : index
    %165 = vector.load %arg11[%c6_120, %c0_121, %c0_122] : memref<9x4x16xbf16, #tpu.memory_space<vmem>>, vector<1x4x16xbf16>
    %166 = vector.shape_cast %165 : vector<1x4x16xbf16> to vector<4x16xbf16>
    %cst_123 = arith.constant dense<0.000000e+00> : vector<4x128xf32>
    %167 = tpu.matmul %166, %140, %cst_123 {dimension_numbers = #tpu.dot_dimension_numbers<[1], [0], [0], [1], [0, 0, 1, 1], [], []>} : vector<4x16xbf16>, vector<16x128xbf16>, vector<4x128xf32> -> vector<4x128xf32>
    %168 = arith.truncf %167 : vector<4x128xf32> to vector<4x128xbf16>
    %c7_124 = arith.constant 7 : index
    %c0_125 = arith.constant 0 : index
    %c0_126 = arith.constant 0 : index
    %169 = vector.load %arg11[%c7_124, %c0_125, %c0_126] : memref<9x4x16xbf16, #tpu.memory_space<vmem>>, vector<1x4x16xbf16>
    %170 = vector.shape_cast %169 : vector<1x4x16xbf16> to vector<4x16xbf16>
    %cst_127 = arith.constant dense<0.000000e+00> : vector<4x128xf32>
    %171 = tpu.matmul %170, %140, %cst_127 {dimension_numbers = #tpu.dot_dimension_numbers<[1], [0], [0], [1], [0, 0, 1, 1], [], []>} : vector<4x16xbf16>, vector<16x128xbf16>, vector<4x128xf32> -> vector<4x128xf32>
    %172 = arith.truncf %171 : vector<4x128xf32> to vector<4x128xbf16>
    %c8_128 = arith.constant 8 : index
    %c0_129 = arith.constant 0 : index
    %c0_130 = arith.constant 0 : index
    %173 = vector.load %arg11[%c8_128, %c0_129, %c0_130] : memref<9x4x16xbf16, #tpu.memory_space<vmem>>, vector<1x4x16xbf16>
    %174 = vector.shape_cast %173 : vector<1x4x16xbf16> to vector<4x16xbf16>
    %cst_131 = arith.constant dense<0.000000e+00> : vector<4x128xf32>
    %175 = tpu.matmul %174, %140, %cst_131 {dimension_numbers = #tpu.dot_dimension_numbers<[1], [0], [0], [1], [0, 0, 1, 1], [], []>} : vector<4x16xbf16>, vector<16x128xbf16>, vector<4x128xf32> -> vector<4x128xf32>
    %176 = arith.truncf %175 : vector<4x128xf32> to vector<4x128xbf16>
    %177 = tpu.concatenate %144, %148, %152, %156, %160, %164, %168, %172, %176 in 1 : vector<4x128xbf16>, vector<4x128xbf16>, vector<4x128xbf16>, vector<4x128xbf16>, vector<4x128xbf16>, vector<4x128xbf16>, vector<4x128xbf16>, vector<4x128xbf16>, vector<4x128xbf16> -> vector<4x1152xbf16>
    %c0_132 = arith.constant 0 : index
    %c0_133 = arith.constant 0 : index
    %178 = vector.load %arg12[%c0_132, %c0_133] : memref<1152x128xbf16, #tpu.memory_space<vmem>>, vector<1152x128xbf16>
    %cst_134 = arith.constant dense<0.000000e+00> : vector<4x128xf32>
    %179 = tpu.matmul %177, %178, %cst_134 {dimension_numbers = #tpu.dot_dimension_numbers<[1], [0], [0], [1], [0, 0, 1, 1], [], []>} : vector<4x1152xbf16>, vector<1152x128xbf16>, vector<4x128xf32> -> vector<4x128xf32>
    %c0_135 = arith.constant 0 : index
    %c0_136 = arith.constant 0 : index
    %180 = vector.load %arg13[%c0_135, %c0_136] : memref<1x128xf32, #tpu.memory_space<vmem>>, vector<1x128xf32>
    %181 = vector.broadcast %180 : vector<1x128xf32> to vector<4x128xf32>
    %182 = arith.addf %179, %181 : vector<4x128xf32>
    %cst_137 = arith.constant dense<0.000000e+00> : vector<128xf32>
    %183 = vector.multi_reduction <add>, %182, %cst_137 [0] : vector<4x128xf32> to vector<128xf32>
    %184 = vector.shape_cast %183 : vector<128xf32> to vector<1x128xf32>
    %cst_138 = arith.constant 4.000000e+00 : f32
    %185 = vector.broadcast %cst_138 : f32 to vector<1x128xf32>
    %186 = arith.divf %184, %185 : vector<1x128xf32>
    %187 = vector.broadcast %186 : vector<1x128xf32> to vector<4x128xf32>
    %188 = arith.subf %182, %187 : vector<4x128xf32>
    %189 = arith.mulf %188, %188 : vector<4x128xf32>
    %cst_139 = arith.constant dense<0.000000e+00> : vector<128xf32>
    %190 = vector.multi_reduction <add>, %189, %cst_139 [0] : vector<4x128xf32> to vector<128xf32>
    %191 = vector.shape_cast %190 : vector<128xf32> to vector<1x128xf32>
    %cst_140 = arith.constant 4.000000e+00 : f32
    %192 = vector.broadcast %cst_140 : f32 to vector<1x128xf32>
    %193 = arith.divf %191, %192 : vector<1x128xf32>
    %cst_141 = arith.constant 9.99999974E-6 : f32
    %194 = vector.broadcast %cst_141 : f32 to vector<1x128xf32>
    %195 = arith.addf %193, %194 : vector<1x128xf32>
    %196 = math.rsqrt %195 : vector<1x128xf32>
    %197 = vector.broadcast %196 : vector<1x128xf32> to vector<4x128xf32>
    %198 = arith.mulf %188, %197 : vector<4x128xf32>
    %c0_142 = arith.constant 0 : index
    %c0_143 = arith.constant 0 : index
    %199 = vector.load %arg14[%c0_142, %c0_143] : memref<1x128xf32, #tpu.memory_space<vmem>>, vector<1x128xf32>
    %200 = vector.broadcast %199 : vector<1x128xf32> to vector<4x128xf32>
    %201 = arith.mulf %198, %200 : vector<4x128xf32>
    %c0_144 = arith.constant 0 : index
    %c0_145 = arith.constant 0 : index
    %202 = vector.load %arg15[%c0_144, %c0_145] : memref<1x128xf32, #tpu.memory_space<vmem>>, vector<1x128xf32>
    %203 = vector.broadcast %202 : vector<1x128xf32> to vector<4x128xf32>
    %204 = arith.addf %201, %203 : vector<4x128xf32>
    %cst_146 = arith.constant 0.000000e+00 : f32
    %205 = vector.broadcast %cst_146 : f32 to vector<4x128xf32>
    %206 = arith.cmpf oge, %204, %205 : vector<4x128xf32>
    %cst_147 = arith.constant 0.00999999977 : f32
    %207 = vector.broadcast %cst_147 : f32 to vector<4x128xf32>
    %208 = arith.mulf %207, %204 : vector<4x128xf32>
    %209 = arith.select %206, %204, %208 : vector<4x128xi1>, vector<4x128xf32>
    %210 = arith.truncf %209 : vector<4x128xf32> to vector<4x128xbf16>
    %c0_148 = arith.constant 0 : index
    %c0_149 = arith.constant 0 : index
    %211 = vector.load %arg16[%c0_148, %c0_149] : memref<128x256xbf16, #tpu.memory_space<vmem>>, vector<128x256xbf16>
    %cst_150 = arith.constant dense<0.000000e+00> : vector<4x256xf32>
    %212 = tpu.matmul %210, %211, %cst_150 {dimension_numbers = #tpu.dot_dimension_numbers<[1], [0], [0], [1], [0, 0, 1, 1], [], []>} : vector<4x128xbf16>, vector<128x256xbf16>, vector<4x256xf32> -> vector<4x256xf32>
    %c0_151 = arith.constant 0 : index
    %c0_152 = arith.constant 0 : index
    %213 = vector.load %arg17[%c0_151, %c0_152] : memref<1x256xf32, #tpu.memory_space<vmem>>, vector<1x256xf32>
    %214 = vector.broadcast %213 : vector<1x256xf32> to vector<4x256xf32>
    %215 = arith.addf %212, %214 : vector<4x256xf32>
    %216 = vector.extract_strided_slice %215 {offsets = [0, 0], sizes = [4, 128], strides = [1, 1]} : vector<4x256xf32> to vector<4x128xf32>
    %c0_153 = arith.constant 0 : index
    %c0_154 = arith.constant 0 : index
    %217 = vector.load %arg18[%c0_153, %c0_154] : memref<4x128xf32, #tpu.memory_space<vmem>>, vector<4x128xf32>
    tpu.vector_store %arg18[%c0_153, %c0_154], %216 {strides = array<i32>} : memref<4x128xf32, #tpu.memory_space<vmem>>, vector<4x128xf32>,
    %218 = vector.extract_strided_slice %215 {offsets = [0, 128], sizes = [4, 128], strides = [1, 1]} : vector<4x256xf32> to vector<4x128xf32>
    %c0_155 = arith.constant 0 : index
    %c0_156 = arith.constant 0 : index
    %219 = vector.load %arg19[%c0_155, %c0_156] : memref<4x128xf32, #tpu.memory_space<vmem>>, vector<4x128xf32>
    tpu.vector_store %arg19[%c0_155, %c0_156], %218 {strides = array<i32>} : memref<4x128xf32, #tpu.memory_space<vmem>>, vector<4x128xf32>,
    return
  }
}

</mosaic_0001>

<bundles_post_ra>
// kernel: forward.1
= control target key start
LH: loop header
LB: loop body
LE: loop exit
PB: predicated region body
PF: predicated region fallthrough
CT: control target
= control target key end

     0   :  { %s7739_s0 = inlined_call_operand.vmem [shape: bf16[256,128], index: 0, kind: input, shape index: {}]   ;;  %s7740_s1 = inlined_call_operand.hbm [shape: bf16[9,64,256], index: 1, kind: input, shape index: {}]   ;;  %s7741_s2 = inlined_call_operand.vmem [shape: bf16[1152,128], index: 2, kind: input, shape index: {}]   ;;  %s7742_s3 = inlined_call_operand.vmem [shape: f32[1,128], index: 3, kind: input, shape index: {}]   ;;  %s7743_s4 = inlined_call_operand.vmem [shape: f32[1,128], index: 4, kind: input, shape index: {}]   ;;  %s7744_s5 = inlined_call_operand.vmem [shape: f32[1,128], index: 5, kind: input, shape index: {}]   ;;  %s7745_s6 = inlined_call_operand.hbm [shape: bf16[9,16,64], index: 6, kind: input, shape index: {}]   ;;  %s7746_s7 = inlined_call_operand.hbm [shape: bf16[1152,128], index: 7, kind: input, shape index: {}]   ;;  %s7747_s8 = inlined_call_operand.hbm [shape: f32[1,128], index: 8, kind: input, shape index: {}]   ;;  %s7748_s9 = inlined_call_operand.vmem [shape: f32[1,128], index: 9, kind: input, shape index: {}]   ;;  %s7749_s10 = inlined_call_operand.hbm [shape: f32[1,128], index: 10, kind: input, shape index: {}]   ;;  %s7750_s11 = inlined_call_operand.hbm [shape: bf16[9,4,16], index: 11, kind: input, shape index: {}]   ;;  %s7751_s12 = inlined_call_operand.hbm [shape: bf16[1152,128], index: 12, kind: input, shape index: {}]   ;;  %s7752_s13 = inlined_call_operand.vmem [shape: f32[1,128], index: 13, kind: input, shape index: {}]   ;;  %s7753_s14 = inlined_call_operand.vmem [shape: f32[1,128], index: 14, kind: input, shape index: {}]   ;;  %s7754_s15 = inlined_call_operand.hbm [shape: f32[1,128], index: 15, kind: input, shape index: {}]   ;;  %s7755_s16 = inlined_call_operand.hbm [shape: bf16[128,256], index: 16, kind: input, shape index: {}]   ;;  %s7756_s17 = inlined_call_operand.vmem [shape: f32[1,256], index: 17, kind: input, shape index: {}]   ;;  %s7757_s18 = inlined_call_operand.hbm [shape: f32[4,128], index: 18, kind: output, shape index: {0}]   ;;  %s7758_s19 = inlined_call_operand.hbm [shape: f32[4,128], index: 19, kind: output, shape index: {1}]  }
   0x1   :  { %7763 = sst [smem:[#allocation27_spill]] %s7739_s0 }
   0x2   :  { %7764 = sst [smem:[#allocation28_spill]] %s7740_s1 }
   0x3   :  { %7765 = sst [smem:[#allocation29_spill]] %s7741_s2 }
   0x4   :  { %7766 = sst [smem:[#allocation30_spill]] %s7742_s3 }
   0x5   :  { %25 = vsyncpa [#allocation3], 0 }
   0x6   :  { %26 = vsyncpa [#allocation6], 0 }
   0x7   :  { %27 = vsyncpa [#allocation9], 0 }
   0x8   :  { %28 = vsyncpa [#allocation12], 0 }
   0x9   :  { %29 = vsyncpa [#allocation15], 0 }
   0xa   :  { %30 = vsyncpa [#allocation4], 0  ;;  %s59_s20 = sshll.u32 %s7745_s6, 4  ;;  %s60_s20 = int_to_ptr.hbm [resolvable:$true] %s59_s20 }
   0xb   :  { %31 = vsyncpa [#allocation19], 0  ;;  %s6670_s21 = smov [#allocation5]   ;;  %s86_s23 = sshll.u32 %s7747_s8, 4  ;;  %s87_s23 = int_to_ptr.hbm [resolvable:$true] %s86_s23 }
   0xc   :  { %s61_s1 = sshll.u32 %s6670_s21, 4  ;;  %s7761_s24 = smov 64   ;;  %s62_s1 = int_to_ptr.vmem [resolvable:$true] %s61_s1 }
   0xd   :  { %s6672_s25 = smov 4   ;;  %s6673_s3 = smov [#allocation8]  }
   0xe   :  { %67 = dma.hbm_to_vmem [thread:$0]  %s60_s20, 1152, %s62_s1, [#allocation6], %s7761_s24, %s7761_s24, %s6672_s25  }
   0xf   :  { %s88_s26 = sshll.u32 %s6673_s3, 4  ;;  %s109_s28 = sshll.u32 %s7750_s11, 4  ;;  %s89_s26 = int_to_ptr.vmem [resolvable:$true] %s88_s26  ;;  %s110_s28 = int_to_ptr.hbm [resolvable:$true] %s109_s28 }
  0x10   :  { %91 = dma.hbm_to_vmem [thread:$0]  %s87_s23, 16, %s89_s26, [#allocation9]  }
  0x11   :  { %s6674_s29 = smov [#allocation11]   ;;  %s140_s21 = sshll.u32 %s7754_s15, 4  ;;  %s141_s21 = int_to_ptr.hbm [resolvable:$true] %s140_s21 }
  0x12   :  { %s111_s0 = sshll.u32 %s6674_s29, 4  ;;  %s6675_s22 = smov 32   ;;  %s112_s0 = int_to_ptr.vmem [resolvable:$true] %s111_s0 }
  0x13   :  { %s6676_s2 = smov 2   ;;  %s6677_s20 = smov [#allocation14]  }
  0x14   :  { %117 = dma.hbm_to_vmem [thread:$0]  %s110_s28, 288, %s112_s0, [#allocation12], %s6675_s22, %s6675_s22, %s6676_s2  }
  0x15   :  { %s142_s1 = sshll.u32 %s6677_s20, 4  ;;  %s7767_s27 = sld [smem:[#allocation28_spill]]  ;;  %s143_s1 = int_to_ptr.vmem [resolvable:$true] %s142_s1 }
  0x16   :  { %145 = dma.hbm_to_vmem [thread:$0]  %s141_s21, 16, %s143_s1, [#allocation15]  }
  0x17   :  { %s6678_s23 = smov [#allocation2]   ;;  %s72_s15 = sshll.u32 %s7746_s7, 4  ;;  %s73_s15 = int_to_ptr.hbm [resolvable:$true] %s72_s15 }
  0x18   :  { %s40_s26 = sshll.u32 %s6678_s23, 4  ;;  %s6679_s8 = smov 128   ;;  %s41_s26 = int_to_ptr.vmem [resolvable:$true] %s40_s26 }
  0x19   :  { %s6680_s30 = smov 8   ;;  %s6681_s28 = smov [#allocation7]  }
  0x1a   :  { %s74_s0 = sshll.u32 %s6681_s28, 4  ;;  %s99_s24 = sshll.u32 %s7749_s10, 4  ;;  %s75_s0 = int_to_ptr.vmem [resolvable:$true] %s74_s0  ;;  %s100_s24 = int_to_ptr.hbm [resolvable:$true] %s99_s24 }
  0x1b   :  { %s38_s11 = sshll.u32 %s7767_s27, 4  ;;  %s7768_s21 = smov 64   ;;  %s39_s11 = int_to_ptr.hbm [resolvable:$true] %s38_s11 }
  0x1c   :  { %46 = dma.hbm_to_vmem [thread:$0]  %s39_s11, 9216, %s41_s26, [#allocation3], %s6679_s8, %s6679_s8, %s6680_s30  }
  0x1d   :  { %80 = dma.hbm_to_vmem [thread:$0]  %s73_s15, 9216, %s75_s0, [#allocation6], %s7768_s21, %s7768_s21, %s6672_s25  }
  0x1e   :  { %s122_s7 = sshll.u32 %s7751_s12, 4  ;;  %s6682_s3 = smov [#allocation10]   ;;  %s123_s7 = int_to_ptr.hbm [resolvable:$true] %s122_s7 }
  0x1f   :  { %s101_s27 = sshll.u32 %s6682_s3, 4  ;;  %s6683_s11 = smov [#allocation13]   ;;  %s102_s27 = int_to_ptr.vmem [resolvable:$true] %s101_s27 }
  0x20   :  { %104 = dma.hbm_to_vmem [thread:$0]  %s100_s24, 16, %s102_s27, [#allocation9]  }
  0x21   :  { %s124_s23 = sshll.u32 %s6683_s11, 4  ;;  %s150_s10 = sshll.u32 %s7755_s16, 4  ;;  %s125_s23 = int_to_ptr.vmem [resolvable:$true] %s124_s23  ;;  %s151_s10 = int_to_ptr.hbm [resolvable:$true] %s150_s10 }
  0x22   :  { %130 = dma.hbm_to_vmem [thread:$0]  %s123_s7, 9216, %s125_s23, [#allocation12], %s7768_s21, %s7768_s21, %s6672_s25  }
  0x23   :  { %s6684_s29 = smov [#allocation16]  }
  0x24   :  { %s152_s15 = sshll.u32 %s6684_s29, 4  ;;  %s153_s15 = int_to_ptr.vmem [resolvable:$true] %s152_s15 }
  0x25   :  { %158 = dma.hbm_to_vmem [thread:$0]  %s151_s10, 2048, %s153_s15, [#allocation15], %s6679_s8, %s6679_s8, %s6680_s30  }
  0x26   :  { %6656 = dma.done.wait [#allocation3], 9216  }
  0x27   :  { %6657 = vsyncadd [#allocation3], 4294958080 }
  0x28   :  { %6658 = dma.done.wait [#allocation6], 10368  }
  0x29   :  { %6659 = vsyncadd [#allocation6], 4294956928 }
  0x2a   :  { %6660 = dma.done.wait [#allocation9], 32  }
  0x2b   :  { %6661 = vsyncadd [#allocation9], 4294967264 }
  0x2c   :  { %6662 = dma.done.wait [#allocation12], 9504  }
  0x2d   :  { %6663 = vsyncadd [#allocation12], 4294957792 }
  0x2e   :  { %6664 = dma.done.wait [#allocation15], 2064  }
  0x2f   :  { %6665 = vsyncadd [#allocation15], 4294965232  ;;  %s7769_s28 = sld [smem:[#allocation27_spill]]  ;;  %v4690_v16 = vld [vmem:[#allocation2] sm:$0xf]  ;;  %vm2546_vm12 = vcmask 523264  }
  0x30   :  { %v6039_v17 = vld [vmem:[#allocation2 + $0x4] sm:$0xf0]  ;;  %v6038_v18 = vld [vmem:[#allocation2 + $0x4] sm:$0xf]  ;;  %v4692_v19 = vld [vmem:[#allocation2 + $0x8] sm:$0xf0] }
  0x31   :  { %v4786_v20 = vld [vmem:[#allocation2 + $0x40] sm:$0xf]  ;;  %v6047_v21 = vld [vmem:[#allocation2 + $0x44] sm:$0xf0]  ;;  %v6046_v22 = vld [vmem:[#allocation2 + $0x44] sm:$0xf]  ;;  %v4691_v24 = vor.u32 %v6039_v17, %v4690_v16  ;;  %v4695_v25 = vor.u32 %v6038_v18, %v4692_v19 }
  0x32   :  { %v4788_v23 = vld [vmem:[#allocation2 + $0x48] sm:$0xf0]  ;;  %v4787_v26 = vor.u32 %v6047_v21, %v4786_v20  ;;  %v4698_v28 = vld [vmem:[#allocation2 + $0x10] sm:$0xf]  ;;  %v6041_v29 = vld [vmem:[#allocation2 + $0x14] sm:$0xf0] }
  0x33   :  { %v4791_v27 = vor.u32 %v6046_v22, %v4788_v23  ;;  %v6040_v30 = vld [vmem:[#allocation2 + $0x14] sm:$0xf]  ;;  %v4700_v31 = vld [vmem:[#allocation2 + $0x18] sm:$0xf0]  ;;  %v4794_v32 = vld [vmem:[#allocation2 + $0x50] sm:$0xf]  ;;  %v4699_v36 = vor.u32 %v6041_v29, %v4698_v28 }
  0x34   :  { %v6049_v33 = vld [vmem:[#allocation2 + $0x54] sm:$0xf0]  ;;  %v6048_v34 = vld [vmem:[#allocation2 + $0x54] sm:$0xf]  ;;  %v4796_v35 = vld [vmem:[#allocation2 + $0x58] sm:$0xf0]  ;;  %v4703_v37 = vor.u32 %v6040_v30, %v4700_v31 }
  0x35   :  { %v6829_v0 = vld [vmem:[%s7769_s28 + $0x38] sm:$0xff]  ;;  %v6841_v2 = vld [vmem:[%s7769_s28 + $0x30] sm:$0xff]  ;;  %v6855_v4 = vld [vmem:[%s7769_s28 + $0x28] sm:$0xff]  ;;  %v4795_v38 = vor.u32 %v6049_v33, %v4794_v32  ;;  %v4799_v39 = vor.u32 %v6048_v34, %v4796_v35  ;;  %s7770_s1 = sld [smem:[#allocation29_spill]]  ;;  %s4658_s3 = sshll.u32 %s7757_s18, 4  ;;  %s4659_s3 = int_to_ptr.hbm [resolvable:$true] %s4658_s3 }
  0x36   :  { %v6834_v1 = vld [vmem:[%s7769_s28 + $0x78] sm:$0xff]  ;;  %374 = vmatpush.bf16.msra.mxu0 %v6829_v0  ;;  %v6846_v3 = vld [vmem:[%s7769_s28 + $0x70] sm:$0xff]  ;;  %489 = vmatpush.bf16.msra.mxu2 %v6829_v0  ;;  %v6860_v5 = vld [vmem:[%s7769_s28 + $0x68] sm:$0xff]  ;;  %s7771_s16 = sld [smem:[#allocation30_spill]]  ;;  %s6689_s27 = smov [#allocation18]  }
  0x37   :  { %403 = vmatpush.bf16.msra.mxu1 %v6834_v1  ;;  %518 = vmatpush.bf16.msra.mxu3 %v6834_v1  ;;  %v6867_v6 = vld [vmem:[%s7769_s28 + $0x20] sm:$0xff]  ;;  %v6883_v8 = vld [vmem:[%s7769_s28 + $0x18] sm:$0xff]  ;;  %v6897_v10 = vld [vmem:[%s7769_s28 + $0x10] sm:$0xff]  ;;  %s4667_s11 = sshll.u32 %s6689_s27, 4  ;;  %s4669_s6 = sshll.u32 %s7758_s19, 4  ;;  %s4668_s11 = int_to_ptr.vmem [resolvable:$true] %s4667_s11  ;;  %s4670_s6 = int_to_ptr.hbm [resolvable:$true] %s4669_s6 }
  0x38   :  { %v6872_v7 = vld [vmem:[%s7769_s28 + $0x60] sm:$0xff]  ;;  %v6888_v9 = vld [vmem:[%s7769_s28 + $0x58] sm:$0xff]  ;;  %v6902_v11 = vld [vmem:[%s7769_s28 + $0x50] sm:$0xff] }
  0x39   :  { %v6911_v12 = vld [vmem:[%s7769_s28 + $0x8] sm:$0xff]  ;;  %v6923_v14 = vld [vmem:[%s7769_s28] sm:$0xff]  ;;  %v4714_v52 = vld [vmem:[#allocation2 + $0x30] sm:$0xf] }
  0x3a   :  { %375 = vmatpush.bf16.msra.mxu0 %v6841_v2  ;;  %490 = vmatpush.bf16.msra.mxu2 %v6841_v2  ;;  %v6916_v13 = vld [vmem:[%s7769_s28 + $0x48] sm:$0xff]  ;;  %v6928_v15 = vld [vmem:[%s7769_s28 + $0x40] sm:$0xff]  ;;  %v6045_v53 = vld [vmem:[#allocation2 + $0x34] sm:$0xf0]  ;;  %s6688_s28 = smov [#allocation17]  }
  0x3b   :  { %404 = vmatpush.bf16.msra.mxu1 %v6846_v3  ;;  %519 = vmatpush.bf16.msra.mxu3 %v6846_v3  ;;  %v4706_v40 = vld [vmem:[#allocation2 + $0x20] sm:$0xf]  ;;  %v6043_v41 = vld [vmem:[#allocation2 + $0x24] sm:$0xf0]  ;;  %v6042_v42 = vld [vmem:[#allocation2 + $0x24] sm:$0xf]  ;;  %v4715_v60 = vor.u32 %v6045_v53, %v4714_v52 }
  0x3c   :  { %v4708_v43 = vld [vmem:[#allocation2 + $0x28] sm:$0xf0]  ;;  %v4802_v44 = vld [vmem:[#allocation2 + $0x60] sm:$0xf]  ;;  %v6051_v45 = vld [vmem:[#allocation2 + $0x64] sm:$0xf0]  ;;  %v4707_v48 = vor.u32 %v6043_v41, %v4706_v40 }
  0x3d   :  { %v6050_v46 = vld [vmem:[#allocation2 + $0x64] sm:$0xf]  ;;  %v4804_v47 = vld [vmem:[#allocation2 + $0x68] sm:$0xf0]  ;;  %v4711_v49 = vor.u32 %v6042_v42, %v4708_v43  ;;  %v4803_v50 = vor.u32 %v6051_v45, %v4802_v44  ;;  %v6044_v54 = vld [vmem:[#allocation2 + $0x34] sm:$0xf] }
  0x3e   :  { %376 = vmatpush.bf16.msra.mxu0 %v6855_v4  ;;  %491 = vmatpush.bf16.msra.mxu2 %v6855_v4  ;;  %v4807_v51 = vor.u32 %v6050_v46, %v4804_v47  ;;  %v4716_v55 = vld [vmem:[#allocation2 + $0x38] sm:$0xf0]  ;;  %v4810_v56 = vld [vmem:[#allocation2 + $0x70] sm:$0xf]  ;;  %v6053_v57 = vld [vmem:[#allocation2 + $0x74] sm:$0xf0] }
  0x3f   :  { %405 = vmatpush.bf16.msra.mxu1 %v6860_v5  ;;  %520 = vmatpush.bf16.msra.mxu3 %v6860_v5  ;;  %v6052_v58 = vld [vmem:[#allocation2 + $0x74] sm:$0xf]  ;;  %v4812_v59 = vld [vmem:[#allocation2 + $0x78] sm:$0xf0]  ;;  %v4719_v61 = vor.u32 %v6044_v54, %v4716_v55  ;;  %v4811_v62 = vor.u32 %v6053_v57, %v4810_v56  ;;  %v4818_v16 = vld [vmem:[#allocation2 + $0x80] sm:$0xf] }
  0x40   :  { %v4815_v63 = vor.u32 %v6052_v58, %v4812_v59  ;;  %v6055_v17 = vld [vmem:[#allocation2 + $0x84] sm:$0xf0]  ;;  %v6054_v18 = vld [vmem:[#allocation2 + $0x84] sm:$0xf]  ;;  %v4820_v19 = vld [vmem:[#allocation2 + $0x88] sm:$0xf0] }
  0x41   :  { %v4850_v20 = vld [vmem:[#allocation2 + $0xc0] sm:$0xf]  ;;  %v6063_v21 = vld [vmem:[#allocation2 + $0xc4] sm:$0xf0]  ;;  %v6062_v22 = vld [vmem:[#allocation2 + $0xc4] sm:$0xf] }
  0x42   :  { %377 = vmatpush.bf16.msra.mxu0 %v6867_v6  ;;  %492 = vmatpush.bf16.msra.mxu2 %v6867_v6  ;;  %v4852_v23 = vld [vmem:[#allocation2 + $0xc8] sm:$0xf0]  ;;  %v4826_v28 = vld [vmem:[#allocation2 + $0x90] sm:$0xf]  ;;  %v6057_v29 = vld [vmem:[#allocation2 + $0x94] sm:$0xf0] }
  0x43   :  { %406 = vmatpush.bf16.msra.mxu1 %v6872_v7  ;;  %521 = vmatpush.bf16.msra.mxu3 %v6872_v7  ;;  %v6056_v30 = vld [vmem:[#allocation2 + $0x94] sm:$0xf]  ;;  %v4828_v31 = vld [vmem:[#allocation2 + $0x98] sm:$0xf0]  ;;  %v4858_v32 = vld [vmem:[#allocation2 + $0xd0] sm:$0xf] }
  0x44   :  { %v6065_v33 = vld [vmem:[#allocation2 + $0xd4] sm:$0xf0]  ;;  %v6064_v34 = vld [vmem:[#allocation2 + $0xd4] sm:$0xf]  ;;  %v4860_v35 = vld [vmem:[#allocation2 + $0xd8] sm:$0xf0] }
  0x45   :  { %v4834_v40 = vld [vmem:[#allocation2 + $0xa0] sm:$0xf]  ;;  %v6059_v41 = vld [vmem:[#allocation2 + $0xa4] sm:$0xf0]  ;;  %v6058_v42 = vld [vmem:[#allocation2 + $0xa4] sm:$0xf] }
  0x46   :  { %378 = vmatpush.bf16.msra.mxu0 %v6883_v8  ;;  %493 = vmatpush.bf16.msra.mxu2 %v6883_v8  ;;  %v4836_v43 = vld [vmem:[#allocation2 + $0xa8] sm:$0xf0]  ;;  %v4866_v44 = vld [vmem:[#allocation2 + $0xe0] sm:$0xf]  ;;  %v6067_v45 = vld [vmem:[#allocation2 + $0xe4] sm:$0xf0] }
  0x47   :  { %407 = vmatpush.bf16.msra.mxu1 %v6888_v9  ;;  %522 = vmatpush.bf16.msra.mxu3 %v6888_v9  ;;  %v6066_v46 = vld [vmem:[#allocation2 + $0xe4] sm:$0xf]  ;;  %v4868_v47 = vld [vmem:[#allocation2 + $0xe8] sm:$0xf0]  ;;  %v4842_v52 = vld [vmem:[#allocation2 + $0xb0] sm:$0xf] }
  0x48   :  { %v6061_v53 = vld [vmem:[#allocation2 + $0xb4] sm:$0xf0]  ;;  %v6060_v54 = vld [vmem:[#allocation2 + $0xb4] sm:$0xf]  ;;  %v4844_v55 = vld [vmem:[#allocation2 + $0xb8] sm:$0xf0] }
  0x49   :  { %v4874_v56 = vld [vmem:[#allocation2 + $0xf0] sm:$0xf]  ;;  %v6069_v57 = vld [vmem:[#allocation2 + $0xf4] sm:$0xf0]  ;;  %v6068_v58 = vld [vmem:[#allocation2 + $0xf4] sm:$0xf] }
  0x4a   :  { %379 = vmatpush.bf16.msra.mxu0 %v6897_v10  ;;  %494 = vmatpush.bf16.msra.mxu2 %v6897_v10  ;;  %v4876_v59 = vld [vmem:[#allocation2 + $0xf8] sm:$0xf0]  ;;  %s4656_s20 = sshll.u32 %s6688_s28, 4  ;;  %s4657_s20 = int_to_ptr.vmem [resolvable:$true] %s4656_s20 }
  0x4b   :  { %408 = vmatpush.bf16.msra.mxu1 %v6902_v11  ;;  %523 = vmatpush.bf16.msra.mxu3 %v6902_v11 }
  0x4e   :  { %380 = vmatpush.bf16.msra.mxu0 %v6911_v12  ;;  %495 = vmatpush.bf16.msra.mxu2 %v6911_v12 }
  0x4f   :  { %409 = vmatpush.bf16.msra.mxu1 %v6916_v13  ;;  %524 = vmatpush.bf16.msra.mxu3 %v6916_v13 }
  0x52   :  { %381 = vmatpush.bf16.msra.mxu0 %v6923_v14  ;;  %496 = vmatpush.bf16.msra.mxu2 %v6923_v14 }
  0x53   :  { %410 = vmatpush.bf16.msra.mxu1 %v6928_v15  ;;  %525 = vmatpush.bf16.msra.mxu3 %v6928_v15 }
  0x55   :  { %382 = vmatmul.bf16.vlgmr.msra.gmra.mxu0 %v4691_v24  ;;  %497 = vmatmul.bf16.vlgmr.msra.gmra.mxu2 %v4787_v26  ;;  %v4819_v24 = vor.u32 %v6055_v17, %v4818_v16  ;;  %v4851_v26 = vor.u32 %v6063_v21, %v4850_v20  ;;  %v4882_v16 = vld [vmem:[#allocation2 + $0x100] sm:$0xf]  ;;  %v6071_v17 = vld [vmem:[#allocation2 + $0x104] sm:$0xf0] }
  0x56   :  { %604 = vmatpush.bf16.msrb.mxu0 %v6829_v0  ;;  %411 = vmatmul.bf16.vlgmr.msra.gmra.mxu1 %v4695_v25  ;;  %v4823_v25 = vor.u32 %v6054_v18, %v4820_v19  ;;  %v6070_v18 = vld [vmem:[#allocation2 + $0x104] sm:$0xf]  ;;  %v4884_v19 = vld [vmem:[#allocation2 + $0x108] sm:$0xf0]  ;;  %v4914_v20 = vld [vmem:[#allocation2 + $0x140] sm:$0xf] }
  0x57   :  { %633 = vmatpush.bf16.msrb.mxu1 %v6834_v1  ;;  %526 = vmatmul.bf16.vlgmr.msra.gmra.mxu3 %v4791_v27  ;;  %v4855_v27 = vor.u32 %v6062_v22, %v4852_v23  ;;  %v6079_v21 = vld [vmem:[#allocation2 + $0x144] sm:$0xf0]  ;;  %v6078_v22 = vld [vmem:[#allocation2 + $0x144] sm:$0xf]  ;;  %v4916_v23 = vld [vmem:[#allocation2 + $0x148] sm:$0xf0] }
  0x58   :  { %719 = vmatpush.bf16.msrb.mxu2 %v6829_v0  ;;  %748 = vmatpush.bf16.msrb.mxu3 %v6834_v1 }
  0x5a   :  { %605 = vmatpush.bf16.msrb.mxu0 %v6841_v2 }
  0x5b   :  { %634 = vmatpush.bf16.msrb.mxu1 %v6846_v3 }
  0x5c   :  { %720 = vmatpush.bf16.msrb.mxu2 %v6841_v2  ;;  %749 = vmatpush.bf16.msrb.mxu3 %v6846_v3 }
  0x5e   :  { %606 = vmatpush.bf16.msrb.mxu0 %v6855_v4 }
  0x5f   :  { %635 = vmatpush.bf16.msrb.mxu1 %v6860_v5 }
  0x60   :  { %721 = vmatpush.bf16.msrb.mxu2 %v6855_v4  ;;  %750 = vmatpush.bf16.msrb.mxu3 %v6860_v5 }
  0x62   :  { %607 = vmatpush.bf16.msrb.mxu0 %v6867_v6 }
  0x63   :  { %636 = vmatpush.bf16.msrb.mxu1 %v6872_v7 }
  0x64   :  { %722 = vmatpush.bf16.msrb.mxu2 %v6867_v6  ;;  %751 = vmatpush.bf16.msrb.mxu3 %v6872_v7 }
  0x65   :  { %387 = vmatmul.bf16.gmra.mxu0 %v4699_v36  ;;  %502 = vmatmul.bf16.gmra.mxu2 %v4795_v38  ;;  %v4827_v36 = vor.u32 %v6057_v29, %v4826_v28  ;;  %v4859_v38 = vor.u32 %v6065_v33, %v4858_v32  ;;  %v4915_v28 = vor.u32 %v6079_v21, %v4914_v20 }
  0x66   :  { %608 = vmatpush.bf16.msrb.mxu0 %v6883_v8  ;;  %416 = vmatmul.bf16.gmra.mxu1 %v4703_v37  ;;  %v4831_v37 = vor.u32 %v6056_v30, %v4828_v31  ;;  %v4919_v29 = vor.u32 %v6078_v22, %v4916_v23  ;;  %v6083_v22 = vld [vmem:[#allocation2 + $0x164] sm:$0xf0]  ;;  %v6082_v23 = vld [vmem:[#allocation2 + $0x164] sm:$0xf] }
  0x67   :  { %637 = vmatpush.bf16.msrb.mxu1 %v6888_v9  ;;  %531 = vmatmul.bf16.gmra.mxu3 %v4799_v39  ;;  %v4863_v39 = vor.u32 %v6064_v34, %v4860_v35 }
  0x68   :  { %723 = vmatpush.bf16.msrb.mxu2 %v6883_v8  ;;  %752 = vmatpush.bf16.msrb.mxu3 %v6888_v9 }
  0x6a   :  { %609 = vmatpush.bf16.msrb.mxu0 %v6897_v10 }
  0x6b   :  { %638 = vmatpush.bf16.msrb.mxu1 %v6902_v11 }
  0x6c   :  { %724 = vmatpush.bf16.msrb.mxu2 %v6897_v10  ;;  %753 = vmatpush.bf16.msrb.mxu3 %v6902_v11 }
  0x6e   :  { %610 = vmatpush.bf16.msrb.mxu0 %v6911_v12 }
  0x6f   :  { %639 = vmatpush.bf16.msrb.mxu1 %v6916_v13 }
  0x70   :  { %725 = vmatpush.bf16.msrb.mxu2 %v6911_v12  ;;  %754 = vmatpush.bf16.msrb.mxu3 %v6916_v13 }
  0x72   :  { %611 = vmatpush.bf16.msrb.mxu0 %v6923_v14 }
  0x73   :  { %640 = vmatpush.bf16.msrb.mxu1 %v6928_v15 }
  0x74   :  { %726 = vmatpush.bf16.msrb.mxu2 %v6923_v14  ;;  %755 = vmatpush.bf16.msrb.mxu3 %v6928_v15 }
  0x75   :  { %392 = vmatmul.bf16.gmra.mxu0 %v4707_v48  ;;  %507 = vmatmul.bf16.gmra.mxu2 %v4803_v50  ;;  %v4835_v48 = vor.u32 %v6059_v41, %v4834_v40  ;;  %v4867_v50 = vor.u32 %v6067_v45, %v4866_v44  ;;  %v6073_v40 = vld [vmem:[#allocation2 + $0x114] sm:$0xf0]  ;;  %v6072_v41 = vld [vmem:[#allocation2 + $0x114] sm:$0xf] }
  0x76   :  { %834 = vmatpush.bf16.msra.mxu0 %v6829_v0  ;;  %421 = vmatmul.bf16.gmra.mxu1 %v4711_v49  ;;  %v4839_v49 = vor.u32 %v6058_v42, %v4836_v43  ;;  %v4892_v42 = vld [vmem:[#allocation2 + $0x118] sm:$0xf0]  ;;  %v4922_v43 = vld [vmem:[#allocation2 + $0x150] sm:$0xf]  ;;  %v6081_v44 = vld [vmem:[#allocation2 + $0x154] sm:$0xf0] }
  0x77   :  { %863 = vmatpush.bf16.msra.mxu1 %v6834_v1  ;;  %536 = vmatmul.bf16.gmra.mxu3 %v4807_v51  ;;  %v4871_v51 = vor.u32 %v6066_v46, %v4868_v47  ;;  %v6080_v45 = vld [vmem:[#allocation2 + $0x154] sm:$0xf]  ;;  %v4924_v46 = vld [vmem:[#allocation2 + $0x158] sm:$0xf0] }
  0x78   :  { %949 = vmatpush.bf16.msra.mxu2 %v6829_v0  ;;  %978 = vmatpush.bf16.msra.mxu3 %v6834_v1 }
  0x7a   :  { %835 = vmatpush.bf16.msra.mxu0 %v6841_v2 }
  0x7b   :  { %864 = vmatpush.bf16.msra.mxu1 %v6846_v3 }
  0x7c   :  { %950 = vmatpush.bf16.msra.mxu2 %v6841_v2  ;;  %979 = vmatpush.bf16.msra.mxu3 %v6846_v3 }
  0x7e   :  { %836 = vmatpush.bf16.msra.mxu0 %v6855_v4 }
  0x7f   :  { %865 = vmatpush.bf16.msra.mxu1 %v6860_v5 }
  0x80   :  { %951 = vmatpush.bf16.msra.mxu2 %v6855_v4  ;;  %980 = vmatpush.bf16.msra.mxu3 %v6860_v5 }
  0x82   :  { %837 = vmatpush.bf16.msra.mxu0 %v6867_v6 }
  0x83   :  { %866 = vmatpush.bf16.msra.mxu1 %v6872_v7 }
  0x84   :  { %952 = vmatpush.bf16.msra.mxu2 %v6867_v6  ;;  %981 = vmatpush.bf16.msra.mxu3 %v6872_v7 }
  0x85   :  { %397 = vmatmul.bf16.gmra.mxu0 %v4715_v60  ;;  %512 = vmatmul.bf16.gmra.mxu2 %v4811_v62  ;;  %v4843_v60 = vor.u32 %v6061_v53, %v4842_v52  ;;  %v4875_v62 = vor.u32 %v6069_v57, %v4874_v56 }
  0x86   :  { %838 = vmatpush.bf16.msra.mxu0 %v6883_v8  ;;  %426 = vmatmul.bf16.gmra.mxu1 %v4719_v61  ;;  %v4847_v61 = vor.u32 %v6060_v54, %v4844_v55  ;;  %v4923_v54 = vor.u32 %v6081_v44, %v4922_v43  ;;  %v4927_v55 = vor.u32 %v6080_v45, %v4924_v46  ;;  %v4906_v43 = vld [vmem:[#allocation2 + $0x130] sm:$0xf]  ;;  %v6077_v44 = vld [vmem:[#allocation2 + $0x134] sm:$0xf0]  ;;  %v6076_v45 = vld [vmem:[#allocation2 + $0x134] sm:$0xf] }
  0x87   :  { %867 = vmatpush.bf16.msra.mxu1 %v6888_v9  ;;  %541 = vmatmul.bf16.gmra.mxu3 %v4815_v63  ;;  %v4879_v63 = vor.u32 %v6068_v58, %v4876_v59  ;;  %v4908_v46 = vld [vmem:[#allocation2 + $0x138] sm:$0xf0] }
  0x88   :  { %953 = vmatpush.bf16.msra.mxu2 %v6883_v8  ;;  %982 = vmatpush.bf16.msra.mxu3 %v6888_v9 }
  0x8a   :  { %839 = vmatpush.bf16.msra.mxu0 %v6897_v10 }
  0x8b   :  { %868 = vmatpush.bf16.msra.mxu1 %v6902_v11 }
  0x8c   :  { %954 = vmatpush.bf16.msra.mxu2 %v6897_v10  ;;  %983 = vmatpush.bf16.msra.mxu3 %v6902_v11 }
  0x8e   :  { %840 = vmatpush.bf16.msra.mxu0 %v6911_v12 }
  0x8f   :  { %869 = vmatpush.bf16.msra.mxu1 %v6916_v13 }
  0x90   :  { %955 = vmatpush.bf16.msra.mxu2 %v6911_v12  ;;  %984 = vmatpush.bf16.msra.mxu3 %v6916_v13 }
  0x92   :  { %841 = vmatpush.bf16.msra.mxu0 %v6923_v14 }
  0x93   :  { %870 = vmatpush.bf16.msra.mxu1 %v6928_v15 }
  0x94   :  { %956 = vmatpush.bf16.msra.mxu2 %v6923_v14  ;;  %985 = vmatpush.bf16.msra.mxu3 %v6928_v15 }
  0x95   :  { %612 = vmatmul.bf16.vlgmr.msrb.gmra.mxu0 %v4819_v24  ;;  %727 = vmatmul.bf16.vlgmr.msrb.gmra.mxu2 %v4851_v26  ;;  %v4883_v24 = vor.u32 %v6071_v17, %v4882_v16  ;;  %v4898_v17 = vld [vmem:[#allocation2 + $0x120] sm:$0xf] }
  0x96   :  { %641 = vmatmul.bf16.vlgmr.msrb.gmra.mxu1 %v4823_v25  ;;  %1064 = vmatpush.bf16.msrb.mxu0 %v6829_v0  ;;  %v4887_v25 = vor.u32 %v6070_v18, %v4884_v19  ;;  %v6075_v18 = vld [vmem:[#allocation2 + $0x124] sm:$0xf0]  ;;  %v4900_v19 = vld [vmem:[#allocation2 + $0x128] sm:$0xf0] }
  0x97   :  { %756 = vmatmul.bf16.vlgmr.msrb.gmra.mxu3 %v4855_v27  ;;  %1093 = vmatpush.bf16.msrb.mxu1 %v6834_v1 }
  0x98   :  { %1179 = vmatpush.bf16.msrb.mxu2 %v6829_v0  ;;  %1208 = vmatpush.bf16.msrb.mxu3 %v6834_v1 }
  0x9a   :  { %1065 = vmatpush.bf16.msrb.mxu0 %v6841_v2 }
  0x9b   :  { %1094 = vmatpush.bf16.msrb.mxu1 %v6846_v3 }
  0x9c   :  { %1180 = vmatpush.bf16.msrb.mxu2 %v6841_v2  ;;  %1209 = vmatpush.bf16.msrb.mxu3 %v6846_v3 }
  0x9e   :  { %1066 = vmatpush.bf16.msrb.mxu0 %v6855_v4 }
  0x9f   :  { %1095 = vmatpush.bf16.msrb.mxu1 %v6860_v5 }
  0xa0   :  { %1181 = vmatpush.bf16.msrb.mxu2 %v6855_v4  ;;  %1210 = vmatpush.bf16.msrb.mxu3 %v6860_v5 }
  0xa2   :  { %1067 = vmatpush.bf16.msrb.mxu0 %v6867_v6 }
  0xa3   :  { %1096 = vmatpush.bf16.msrb.mxu1 %v6872_v7 }
  0xa4   :  { %1182 = vmatpush.bf16.msrb.mxu2 %v6867_v6  ;;  %1211 = vmatpush.bf16.msrb.mxu3 %v6872_v7 }
  0xa5   :  { %617 = vmatmul.bf16.gmra.mxu0 %v4827_v36  ;;  %732 = vmatmul.bf16.gmra.mxu2 %v4859_v38 }
  0xa6   :  { %646 = vmatmul.bf16.gmra.mxu1 %v4831_v37  ;;  %1068 = vmatpush.bf16.msrb.mxu0 %v6883_v8 }
  0xa7   :  { %761 = vmatmul.bf16.gmra.mxu3 %v4863_v39  ;;  %1097 = vmatpush.bf16.msrb.mxu1 %v6888_v9  ;;  %v4890_v39 = vld [vmem:[#allocation2 + $0x110] sm:$0xf] }
  0xa8   :  { %1183 = vmatpush.bf16.msrb.mxu2 %v6883_v8  ;;  %1212 = vmatpush.bf16.msrb.mxu3 %v6888_v9 }
  0xaa   :  { %1069 = vmatpush.bf16.msrb.mxu0 %v6897_v10 }
  0xab   :  { %1098 = vmatpush.bf16.msrb.mxu1 %v6902_v11 }
  0xac   :  { %1184 = vmatpush.bf16.msrb.mxu2 %v6897_v10  ;;  %1213 = vmatpush.bf16.msrb.mxu3 %v6902_v11 }
  0xae   :  { %1070 = vmatpush.bf16.msrb.mxu0 %v6911_v12 }
  0xaf   :  { %1099 = vmatpush.bf16.msrb.mxu1 %v6916_v13 }
  0xb0   :  { %1185 = vmatpush.bf16.msrb.mxu2 %v6911_v12  ;;  %1214 = vmatpush.bf16.msrb.mxu3 %v6916_v13 }
  0xb2   :  { %1071 = vmatpush.bf16.msrb.mxu0 %v6923_v14 }
  0xb3   :  { %1100 = vmatpush.bf16.msrb.mxu1 %v6928_v15 }
  0xb4   :  { %1186 = vmatpush.bf16.msrb.mxu2 %v6923_v14  ;;  %1215 = vmatpush.bf16.msrb.mxu3 %v6928_v15 }
  0xb5   :  { %622 = vmatmul.bf16.gmra.mxu0 %v4835_v48  ;;  %737 = vmatmul.bf16.gmra.mxu2 %v4867_v50  ;;  %v4895_v50 = vor.u32 %v6072_v41, %v4892_v42 }
  0xb6   :  { %651 = vmatmul.bf16.gmra.mxu1 %v4839_v49  ;;  %v4891_v49 = vor.u32 %v6073_v40, %v4890_v39 }
  0xb7   :  { %766 = vmatmul.bf16.gmra.mxu3 %v4871_v51 }
  0xc5   :  { %627 = vmatmul.bf16.gmra.mxu0 %v4843_v60  ;;  %742 = vmatmul.bf16.gmra.mxu2 %v4875_v62 }
  0xc6   :  { %656 = vmatmul.bf16.gmra.mxu1 %v4847_v61 }
  0xc7   :  { %771 = vmatmul.bf16.gmra.mxu3 %v4879_v63 }
  0xd2   :  { %v383_v26 = vpop.f32.mrf.mxu0 }
  0xd3   :  { %v412_v27 = vpop.f32.mrf.mxu1 }
  0xd4   :  { %v413_v30 = vadd.f32 %v412_v27, %v383_v26  ;;  %v4899_v26 = vor.u32 %v6075_v18, %v4898_v17 }
  0xd5   :  { %842 = vmatmul.bf16.vlgmr.msra.gmra.mxu0 %v4883_v24  ;;  %957 = vmatmul.bf16.vlgmr.msra.gmra.mxu2 %v4915_v28  ;;  %v4932_v24 = vld [vmem:[#allocation2 + $0x168] sm:$0xf0] }
  0xd6   :  { %871 = vmatmul.bf16.vlgmr.msra.gmra.mxu1 %v4887_v25  ;;  %1294 = vmatpush.bf16.msra.mxu0 %v6829_v0  ;;  %v432_v36 = vpack.c.bf16 %v413_v30, %v413_v30 }
  0xd7   :  { %986 = vmatmul.bf16.vlgmr.msra.gmra.mxu3 %v4919_v29  ;;  %1323 = vmatpush.bf16.msra.mxu1 %v6834_v1 }
  0xd8   :  { %v498_v31 = vpop.f32.mrf.mxu2  ;;  %v7038_v0 = vunpack.c.l.b16 %v432_v36 }
  0xda   :  { %v527_v32 = vpop.f32.mrf.mxu3  ;;  %v385_v34 = vpop.f32.mrf.mxu0  ;;  %1295 = vmatpush.bf16.msra.mxu0 %v6841_v2 }
  0xdb   :  { %v528_v33 = vadd.f32 %v527_v32, %v498_v31  ;;  %v414_v35 = vpop.f32.mrf.mxu1  ;;  %1324 = vmatpush.bf16.msra.mxu1 %v6846_v3 }
  0xdc   :  { %v415_v37 = vadd.f32 %v414_v35, %v385_v34 }
  0xdd   :  { %v547_v2 = vpack.c.bf16 %v528_v33, %v528_v33  ;;  %v4935_v33 = vor.u32 %v6082_v23, %v4932_v24 }
  0xde   :  { %v433_v38 = vpack.c.bf16 %v415_v37, %v415_v37  ;;  %1296 = vmatpush.bf16.msra.mxu0 %v6855_v4 }
  0xdf   :  { %1325 = vmatpush.bf16.msra.mxu1 %v6860_v5  ;;  %v7048_v4 = vunpack.c.l.b16 %v547_v2  ;;  %v4938_v2 = vld [vmem:[#allocation2 + $0x170] sm:$0xf] }
  0xe0   :  { %v7040_v1 = vunpack.c.l.b16 %v433_v38  ;;  %v500_v47 = vpop.f32.mrf.mxu2 }
  0xe2   :  { %v1376_v3 = vpack.c.b16 %v7040_v1, %v7038_v0  ;;  %v529_v48 = vpop.f32.mrf.mxu3  ;;  %v388_v52 = vpop.f32.mrf.mxu0  ;;  %1297 = vmatpush.bf16.msra.mxu0 %v6867_v6  ;;  %v6132_v0 = vld [vmem:[%s7770_s1 + $0xb0] sm:$0xff] }
  0xe3   :  { %v530_v51 = vadd.f32 %v529_v48, %v500_v47  ;;  %v417_v53 = vpop.f32.mrf.mxu1  ;;  %1326 = vmatpush.bf16.msra.mxu1 %v6872_v7  ;;  %v6140_v1 = vld [vmem:[%s7770_s1 + $0xf0] sm:$0xff] }
  0xe4   :  { %v418_v56 = vadd.f32 %v417_v53, %v388_v52 }
  0xe5   :  { %v548_v5 = vpack.c.bf16 %v530_v51, %v530_v51  ;;  %847 = vmatmul.bf16.gmra.mxu0 %v4891_v49  ;;  %962 = vmatmul.bf16.gmra.mxu2 %v4923_v54  ;;  %v6085_v49 = vld [vmem:[#allocation2 + $0x174] sm:$0xf0]  ;;  %v4940_v51 = vld [vmem:[#allocation2 + $0x178] sm:$0xf0] }
  0xe6   :  { %876 = vmatmul.bf16.gmra.mxu1 %v4895_v50  ;;  %1298 = vmatpush.bf16.msra.mxu0 %v6883_v8  ;;  %v434_v62 = vpack.c.bf16 %v418_v56, %v418_v56  ;;  %v6074_v8 = vld [vmem:[#allocation2 + $0x124] sm:$0xf]  ;;  %v6084_v50 = vld [vmem:[#allocation2 + $0x174] sm:$0xf]  ;;  %v4911_v56 = vor.u32 %v6076_v45, %v4908_v46 }
  0xe7   :  { %v7050_v57 = vunpack.c.l.b16 %v548_v5  ;;  %991 = vmatmul.bf16.gmra.mxu3 %v4927_v55  ;;  %1327 = vmatpush.bf16.msra.mxu1 %v6888_v9  ;;  %v4930_v9 = vld [vmem:[#allocation2 + $0x160] sm:$0xf]  ;;  %v4903_v27 = vor.u32 %v6074_v8, %v4900_v19  ;;  %v4907_v55 = vor.u32 %v6077_v44, %v4906_v43 }
  0xe8   :  { %v503_v59 = vpop.f32.mrf.mxu2  ;;  %v7058_v20 = vunpack.c.l.b16 %v434_v62  ;;  %v4931_v32 = vor.u32 %v6083_v22, %v4930_v9 }
  0xe9   :  { %v1400_v58 = vpack.c.b16 %v7050_v57, %v7048_v4 }
  0xea   :  { %v532_v6 = vpop.f32.mrf.mxu3  ;;  %v390_v7 = vpop.f32.mrf.mxu0  ;;  %1299 = vmatpush.bf16.msra.mxu0 %v6897_v10 }
  0xeb   :  { %v533_v60 = vadd.f32 %v532_v6, %v503_v59  ;;  %v419_v61 = vpop.f32.mrf.mxu1  ;;  %1328 = vmatpush.bf16.msra.mxu1 %v6902_v11 }
  0xec   :  { %v420_v63 = vadd.f32 %v419_v61, %v390_v7  ;;  %v4939_v7 = vor.u32 %v6085_v49, %v4938_v2  ;;  %v4943_v61 = vor.u32 %v6084_v50, %v4940_v51  ;;  %v6117_v50 = vld [vmem:[%s7770_s1 + $0x38] sm:$0xff] }
  0xed   :  { %v549_v10 = vpack.c.bf16 %v533_v60, %v533_v60  ;;  %2156 = vmatpush.bf16.msra.mxu2 %v6117_v50  ;;  %v6113_v50 = vld [vmem:[%s7770_s1 + $0x18] sm:$0xff] }
  0xee   :  { %v435_v16 = vpack.c.bf16 %v420_v63, %v420_v63  ;;  %1300 = vmatpush.bf16.msra.mxu0 %v6911_v12 }
  0xef   :  { %1329 = vmatpush.bf16.msra.mxu1 %v6916_v13  ;;  %v7068_v12 = vunpack.c.l.b16 %v549_v10 }
  0xf0   :  { %v7060_v21 = vunpack.c.l.b16 %v435_v16  ;;  %v505_v25 = vpop.f32.mrf.mxu2 }
  0xf2   :  { %v534_v11 = vpop.f32.mrf.mxu3  ;;  %v1377_v28 = vpack.c.b16 %v7060_v21, %v7058_v20  ;;  %v393_v30 = vpop.f32.mrf.mxu0  ;;  %1301 = vmatpush.bf16.msra.mxu0 %v6923_v14  ;;  %v6128_v20 = vld [vmem:[%s7770_s1 + $0x90] sm:$0xff] }
  0xf3   :  { %v535_v29 = vadd.f32 %v534_v11, %v505_v25  ;;  %v422_v31 = vpop.f32.mrf.mxu1  ;;  %1330 = vmatpush.bf16.msra.mxu1 %v6928_v15  ;;  %v4946_v11 = vld [vmem:[#allocation2 + $0x180] sm:$0xf]  ;;  %v6136_v21 = vld [vmem:[%s7770_s1 + $0xd0] sm:$0xff] }
  0xf4   :  { %v423_v34 = vadd.f32 %v422_v31, %v393_v30  ;;  %v4978_v30 = vld [vmem:[#allocation2 + $0x1c0] sm:$0xf] }
  0xf5   :  { %v550_v13 = vpack.c.bf16 %v535_v29, %v535_v29  ;;  %852 = vmatmul.bf16.gmra.mxu0 %v4899_v26  ;;  %967 = vmatmul.bf16.gmra.mxu2 %v4931_v32  ;;  %v6087_v26 = vld [vmem:[#allocation2 + $0x184] sm:$0xf0]  ;;  %v4948_v29 = vld [vmem:[#allocation2 + $0x188] sm:$0xf0] }
  0xf6   :  { %881 = vmatmul.bf16.gmra.mxu1 %v4903_v27  ;;  %v436_v14 = vpack.c.bf16 %v423_v34, %v423_v34  ;;  %v6086_v27 = vld [vmem:[#allocation2 + $0x184] sm:$0xf] }
  0xf7   :  { %v7070_v35 = vunpack.c.l.b16 %v550_v13  ;;  %996 = vmatmul.bf16.gmra.mxu3 %v4935_v33  ;;  %v6095_v33 = vld [vmem:[#allocation2 + $0x1c4] sm:$0xf0]  ;;  %v6094_v34 = vld [vmem:[#allocation2 + $0x1c4] sm:$0xf]  ;;  %v4980_v13 = vld [vmem:[#allocation2 + $0x1c8] sm:$0xf0] }
  0xf8   :  { %v508_v37 = vpop.f32.mrf.mxu2  ;;  %v7074_v47 = vunpack.c.l.b16 %v436_v14  ;;  %v4979_v44 = vor.u32 %v6095_v33, %v4978_v30  ;;  %v4983_v45 = vor.u32 %v6094_v34, %v4980_v13 }
  0xf9   :  { %v1401_v36 = vpack.c.b16 %v7070_v35, %v7068_v12 }
  0xfa   :  { %v537_v38 = vpop.f32.mrf.mxu3  ;;  %v395_v40 = vpop.f32.mrf.mxu0 }
  0xfb   :  { %v538_v39 = vadd.f32 %v537_v38, %v508_v37  ;;  %v424_v41 = vpop.f32.mrf.mxu1 }
  0xfc   :  { %v425_v42 = vadd.f32 %v424_v41, %v395_v40  ;;  %v4947_v40 = vor.u32 %v6087_v26, %v4946_v11  ;;  %v4951_v41 = vor.u32 %v6086_v27, %v4948_v29  ;;  %v6097_v26 = vld [vmem:[#allocation2 + $0x1d4] sm:$0xf0]  ;;  %v6096_v27 = vld [vmem:[#allocation2 + $0x1d4] sm:$0xf]  ;;  %v4988_v29 = vld [vmem:[#allocation2 + $0x1d8] sm:$0xf0] }
  0xfd   :  { %v551_v52 = vpack.c.bf16 %v538_v39, %v538_v39 }
  0xfe   :  { %v437_v15 = vpack.c.bf16 %v425_v42, %v425_v42 }
  0xff   :  { %v7080_v63 = vunpack.c.l.b16 %v551_v52  ;;  %v6125_v52 = vld [vmem:[%s7770_s1 + $0x78] sm:$0xff] }
 0x100   :  { %v7076_v48 = vunpack.c.l.b16 %v437_v15  ;;  %v510_v53 = vpop.f32.mrf.mxu2  ;;  %2185 = vmatpush.bf16.msra.mxu3 %v6125_v52 }
 0x102   :  { %v539_v54 = vpop.f32.mrf.mxu3  ;;  %v1378_v5 = vpack.c.b16 %v7076_v48, %v7074_v47  ;;  %v398_v6 = vpop.f32.mrf.mxu0 }
 0x103   :  { %v540_v59 = vadd.f32 %v539_v54, %v510_v53  ;;  %v427_v60 = vpop.f32.mrf.mxu1 }
 0x104   :  { %v428_v62 = vadd.f32 %v427_v60, %v398_v6 }
 0x105   :  { %v552_v16 = vpack.c.bf16 %v540_v59, %v540_v59  ;;  %857 = vmatmul.bf16.gmra.mxu0 %v4907_v55  ;;  %972 = vmatmul.bf16.gmra.mxu2 %v4939_v7  ;;  %v6124_v59 = vld [vmem:[%s7770_s1 + $0x70] sm:$0xff] }
 0x106   :  { %886 = vmatmul.bf16.gmra.mxu1 %v4911_v56  ;;  %v438_v24 = vpack.c.bf16 %v428_v62, %v428_v62  ;;  %v6116_v56 = vld [vmem:[%s7770_s1 + $0x30] sm:$0xff]  ;;  %2186 = vmatpush.bf16.msra.mxu3 %v6124_v59 }
 0x107   :  { %v7082_v17 = vunpack.c.l.b16 %v552_v16  ;;  %1001 = vmatmul.bf16.gmra.mxu3 %v4943_v61  ;;  %2157 = vmatpush.bf16.msra.mxu2 %v6116_v56  ;;  %v4954_v16 = vld [vmem:[#allocation2 + $0x190] sm:$0xf] }
 0x108   :  { %v513_v8 = vpop.f32.mrf.mxu2  ;;  %v7086_v31 = vunpack.c.l.b16 %v438_v24  ;;  %v4956_v24 = vld [vmem:[#allocation2 + $0x198] sm:$0xf0] }
 0x109   :  { %v1402_v18 = vpack.c.b16 %v7082_v17, %v7080_v63 }
 0x10a   :  { %v542_v19 = vpop.f32.mrf.mxu3  ;;  %v400_v22 = vpop.f32.mrf.mxu0 }
 0x10b   :  { %v543_v9 = vadd.f32 %v542_v19, %v513_v8  ;;  %v429_v23 = vpop.f32.mrf.mxu1  ;;  %v6089_v19 = vld [vmem:[#allocation2 + $0x194] sm:$0xf0] }
 0x10c   :  { %v430_v10 = vadd.f32 %v429_v23, %v400_v22  ;;  %v6123_v22 = vld [vmem:[%s7770_s1 + $0x68] sm:$0xff]  ;;  %v6088_v23 = vld [vmem:[#allocation2 + $0x194] sm:$0xf] }
 0x10d   :  { %v553_v37 = vpack.c.bf16 %v543_v9, %v543_v9  ;;  %v6115_v9 = vld [vmem:[%s7770_s1 + $0x28] sm:$0xff]  ;;  %2187 = vmatpush.bf16.msra.mxu3 %v6123_v22 }
 0x10e   :  { %v439_v25 = vpack.c.bf16 %v430_v10, %v430_v10  ;;  %v4986_v10 = vld [vmem:[#allocation2 + $0x1d0] sm:$0xf]  ;;  %2158 = vmatpush.bf16.msra.mxu2 %v6115_v9  ;;  %v6091_v22 = vld [vmem:[#allocation2 + $0x1a4] sm:$0xf0] }
 0x10f   :  { %v7092_v2 = vunpack.c.l.b16 %v553_v37  ;;  %v4955_v37 = vor.u32 %v6089_v19, %v4954_v16  ;;  %v4962_v19 = vld [vmem:[#allocation2 + $0x1a0] sm:$0xf] }
 0x110   :  { %v7088_v32 = vunpack.c.l.b16 %v439_v25  ;;  %v515_v38 = vpop.f32.mrf.mxu2 }
 0x112   :  { %v544_v39 = vpop.f32.mrf.mxu3  ;;  %v1379_v14 = vpack.c.b16 %v7088_v32, %v7086_v31  ;;  %v613_v15 = vpop.f32.mrf.mxu0 }
 0x113   :  { %v545_v42 = vadd.f32 %v544_v39, %v515_v38  ;;  %v642_v43 = vpop.f32.mrf.mxu1  ;;  %v4959_v38 = vor.u32 %v6088_v23, %v4956_v24  ;;  %v6114_v39 = vld [vmem:[%s7770_s1 + $0x20] sm:$0xff]  ;;  %v6111_v23 = vld [vmem:[%s7770_s1 + $0x8] sm:$0xff] }
 0x114   :  { %v643_v46 = vadd.f32 %v642_v43, %v613_v15  ;;  %v4987_v43 = vor.u32 %v6097_v26, %v4986_v10  ;;  %2159 = vmatpush.bf16.msra.mxu2 %v6114_v39  ;;  %v6119_v24 = vld [vmem:[%s7770_s1 + $0x48] sm:$0xff]  ;;  %v6090_v10 = vld [vmem:[#allocation2 + $0x1a4] sm:$0xf] }
 0x115   :  { %v554_v49 = vpack.c.bf16 %v545_v42, %v545_v42  ;;  %1072 = vmatmul.bf16.vlgmr.msrb.gmra.mxu0 %v4947_v40  ;;  %1187 = vmatmul.bf16.vlgmr.msrb.gmra.mxu2 %v4979_v44  ;;  %v6122_v40 = vld [vmem:[%s7770_s1 + $0x60] sm:$0xff]  ;;  %v4991_v44 = vor.u32 %v6096_v27, %v4988_v29  ;;  %v4964_v26 = vld [vmem:[#allocation2 + $0x1a8] sm:$0xf0] }
 0x116   :  { %1101 = vmatmul.bf16.vlgmr.msrb.gmra.mxu1 %v4951_v41  ;;  %v662_v61 = vpack.c.bf16 %v643_v46, %v643_v46  ;;  %2188 = vmatpush.bf16.msra.mxu3 %v6122_v40  ;;  %v4994_v27 = vld [vmem:[#allocation2 + $0x1e0] sm:$0xf] }
 0x117   :  { %v7097_v51 = vunpack.c.l.b16 %v554_v49  ;;  %1216 = vmatmul.bf16.vlgmr.msrb.gmra.mxu3 %v4983_v45 }
 0x118   :  { %v728_v54 = vpop.f32.mrf.mxu2  ;;  %v7116_v25 = vunpack.c.l.b16 %v662_v61  ;;  %2160 = vmatpush.bf16.msra.mxu2 %v6113_v50 }
 0x119   :  { %v1403_v53 = vpack.c.b16 %v7097_v51, %v7092_v2 }
 0x11a   :  { %v757_v55 = vpop.f32.mrf.mxu3  ;;  %v615_v60 = vpop.f32.mrf.mxu0 }
 0x11b   :  { %v758_v6 = vadd.f32 %v757_v55, %v728_v54  ;;  %v644_v7 = vpop.f32.mrf.mxu1  ;;  %v6121_v54 = vld [vmem:[%s7770_s1 + $0x58] sm:$0xff] }
 0x11c   :  { %v645_v62 = vadd.f32 %v644_v7, %v615_v60  ;;  %2189 = vmatpush.bf16.msra.mxu3 %v6121_v54  ;;  %v6120_v60 = vld [vmem:[%s7770_s1 + $0x50] sm:$0xff] }
 0x11d   :  { %v777_v30 = vpack.c.bf16 %v758_v6, %v758_v6  ;;  %v6112_v6 = vld [vmem:[%s7770_s1 + $0x10] sm:$0xff] }
 0x11e   :  { %v663_v8 = vpack.c.bf16 %v645_v62, %v645_v62  ;;  %2161 = vmatpush.bf16.msra.mxu2 %v6112_v6 }
 0x11f   :  { %v7128_v46 = vunpack.c.l.b16 %v777_v30 }
 0x120   :  { %v7118_v11 = vunpack.c.l.b16 %v663_v8  ;;  %v730_v34 = vpop.f32.mrf.mxu2  ;;  %2190 = vmatpush.bf16.msra.mxu3 %v6120_v60 }
 0x122   :  { %v1424_v33 = vpack.c.b16 %v7118_v11, %v7116_v25  ;;  %v759_v13 = vpop.f32.mrf.mxu3  ;;  %v618_v42 = vpop.f32.mrf.mxu0  ;;  %2162 = vmatpush.bf16.msra.mxu2 %v6111_v23 }
 0x123   :  { %v760_v41 = vadd.f32 %v759_v13, %v730_v34  ;;  %v647_v15 = vpop.f32.mrf.mxu1  ;;  %v6099_v34 = vld [vmem:[#allocation2 + $0x1e4] sm:$0xf0]  ;;  %v6098_v13 = vld [vmem:[#allocation2 + $0x1e4] sm:$0xf] }
 0x124   :  { %v648_v45 = vadd.f32 %v647_v15, %v618_v42  ;;  %2191 = vmatpush.bf16.msra.mxu3 %v6119_v24  ;;  %v4967_v42 = vor.u32 %v6090_v10, %v4964_v26  ;;  %v6110_v15 = vld [vmem:[%s7770_s1] sm:$0xff]  ;;  %v4995_v54 = vor.u32 %v6099_v34, %v4994_v27  ;;  %v4970_v10 = vld [vmem:[#allocation2 + $0x1b0] sm:$0xf]  ;;  %v6093_v26 = vld [vmem:[#allocation2 + $0x1b4] sm:$0xf0] }
 0x125   :  { %v778_v49 = vpack.c.bf16 %v760_v41, %v760_v41  ;;  %1077 = vmatmul.bf16.gmra.mxu0 %v4955_v37  ;;  %1192 = vmatmul.bf16.gmra.mxu2 %v4987_v43  ;;  %v4996_v37 = vld [vmem:[#allocation2 + $0x1e8] sm:$0xf0]  ;;  %v4963_v41 = vor.u32 %v6091_v22, %v4962_v19  ;;  %v6118_v43 = vld [vmem:[%s7770_s1 + $0x40] sm:$0xff]  ;;  %v6092_v27 = vld [vmem:[#allocation2 + $0x1b4] sm:$0xf] }
 0x126   :  { %1106 = vmatmul.bf16.gmra.mxu1 %v4959_v38  ;;  %v664_v16 = vpack.c.bf16 %v648_v45, %v648_v45  ;;  %2163 = vmatpush.bf16.msra.mxu2 %v6110_v15  ;;  %v4972_v34 = vld [vmem:[#allocation2 + $0x1b8] sm:$0xf0] }
 0x127   :  { %v7133_v52 = vunpack.c.l.b16 %v778_v49  ;;  %1221 = vmatmul.bf16.gmra.mxu3 %v4991_v44 }
 0x128   :  { %v733_v56 = vpop.f32.mrf.mxu2  ;;  %v7152_v29 = vunpack.c.l.b16 %v664_v16  ;;  %2192 = vmatpush.bf16.msra.mxu3 %v6118_v43 }
 0x129   :  { %v1448_v55 = vpack.c.b16 %v7133_v52, %v7128_v46 }
 0x12a   :  { %v762_v59 = vpop.f32.mrf.mxu3  ;;  %v620_v61 = vpop.f32.mrf.mxu0 }
 0x12b   :  { %v763_v7 = vadd.f32 %v762_v59, %v733_v56  ;;  %v649_v62 = vpop.f32.mrf.mxu1  ;;  %v4999_v56 = vor.u32 %v6098_v13, %v4996_v37  ;;  %v5002_v13 = vld [vmem:[#allocation2 + $0x1f0] sm:$0xf] }
 0x12c   :  { %v650_v8 = vadd.f32 %v649_v62, %v620_v61 }
 0x12d   :  { %v779_v38 = vpack.c.bf16 %v763_v7, %v763_v7 }
 0x12e   :  { %v665_v9 = vpack.c.bf16 %v650_v8, %v650_v8 }
 0x12f   :  { %v7164_v6 = vunpack.c.l.b16 %v779_v38 }
 0x130   :  { %v7154_v30 = vunpack.c.l.b16 %v665_v9  ;;  %v735_v39 = vpop.f32.mrf.mxu2 }
 0x132   :  { %v764_v40 = vpop.f32.mrf.mxu3  ;;  %v1425_v44 = vpack.c.b16 %v7154_v30, %v7152_v29  ;;  %v623_v49 = vpop.f32.mrf.mxu0  ;;  %v6180_v29 = vld [vmem:[%s7770_s1 + $0x230] sm:$0xff] }
 0x133   :  { %v765_v45 = vadd.f32 %v764_v40, %v735_v39  ;;  %v652_v50 = vpop.f32.mrf.mxu1  ;;  %v6101_v39 = vld [vmem:[#allocation2 + $0x1f4] sm:$0xf0]  ;;  %v6100_v40 = vld [vmem:[#allocation2 + $0x1f4] sm:$0xf] }
 0x134   :  { %v653_v59 = vadd.f32 %v652_v50, %v623_v49  ;;  %v4975_v49 = vor.u32 %v6092_v27, %v4972_v34 }
 0x135   :  { %v780_v60 = vpack.c.bf16 %v765_v45, %v765_v45  ;;  %1082 = vmatmul.bf16.gmra.mxu0 %v4963_v41  ;;  %1197 = vmatmul.bf16.gmra.mxu2 %v4995_v54  ;;  %v5004_v41 = vld [vmem:[#allocation2 + $0x1f8] sm:$0xf0]  ;;  %v4971_v45 = vor.u32 %v6093_v26, %v4970_v10 }
 0x136   :  { %1111 = vmatmul.bf16.gmra.mxu1 %v4967_v42  ;;  %v666_v22 = vpack.c.bf16 %v653_v59, %v653_v59 }
 0x137   :  { %v7166_v7 = vunpack.c.l.b16 %v780_v60  ;;  %1226 = vmatmul.bf16.gmra.mxu3 %v4999_v56  ;;  %v5003_v60 = vor.u32 %v6101_v39, %v5002_v13 }
 0x138   :  { %v738_v62 = vpop.f32.mrf.mxu2  ;;  %v7170_v37 = vunpack.c.l.b16 %v666_v22 }
 0x139   :  { %v1449_v61 = vpack.c.b16 %v7166_v7, %v7164_v6 }
 0x13a   :  { %v767_v16 = vpop.f32.mrf.mxu3  ;;  %v625_v19 = vpop.f32.mrf.mxu0 }
 0x13b   :  { %v768_v8 = vadd.f32 %v767_v16, %v738_v62  ;;  %v654_v9 = vpop.f32.mrf.mxu1  ;;  %v5007_v62 = vor.u32 %v6100_v40, %v5004_v41  ;;  %v5010_v40 = vld [vmem:[#allocation2 + $0x200] sm:$0xf]  ;;  %v6103_v41 = vld [vmem:[#allocation2 + $0x204] sm:$0xf0] }
 0x13c   :  { %v655_v23 = vadd.f32 %v654_v9, %v625_v19 }
 0x13d   :  { %v781_v42 = vpack.c.bf16 %v768_v8, %v768_v8 }
 0x13e   :  { %v667_v24 = vpack.c.bf16 %v655_v23, %v655_v23 }
 0x13f   :  { %v7176_v19 = vunpack.c.l.b16 %v781_v42  ;;  %v6102_v42 = vld [vmem:[#allocation2 + $0x204] sm:$0xf] }
 0x140   :  { %v7172_v38 = vunpack.c.l.b16 %v667_v24  ;;  %v740_v15 = vpop.f32.mrf.mxu2 }
 0x142   :  { %v769_v43 = vpop.f32.mrf.mxu3  ;;  %v1426_v50 = vpack.c.b16 %v7172_v38, %v7170_v37  ;;  %v628_v56 = vpop.f32.mrf.mxu0 }
 0x143   :  { %v770_v54 = vadd.f32 %v769_v43, %v740_v15  ;;  %v657_v59 = vpop.f32.mrf.mxu1  ;;  %v5012_v15 = vld [vmem:[#allocation2 + $0x208] sm:$0xf0] }
 0x144   :  { %v658_v16 = vadd.f32 %v657_v59, %v628_v56  ;;  %v5011_v59 = vor.u32 %v6103_v41, %v5010_v40 }
 0x145   :  { %v782_v9 = vpack.c.bf16 %v770_v54, %v770_v54  ;;  %1087 = vmatmul.bf16.gmra.mxu0 %v4971_v45  ;;  %1202 = vmatmul.bf16.gmra.mxu2 %v5003_v60  ;;  %v5015_v60 = vor.u32 %v6102_v42, %v5012_v15  ;;  %v5018_v15 = vld [vmem:[#allocation2 + $0x210] sm:$0xf] }
 0x146   :  { %1116 = vmatmul.bf16.gmra.mxu1 %v4975_v49  ;;  %v668_v34 = vpack.c.bf16 %v658_v16, %v658_v16 }
 0x147   :  { %v7178_v22 = vunpack.c.l.b16 %v782_v9  ;;  %1231 = vmatmul.bf16.gmra.mxu3 %v5007_v62 }
 0x148   :  { %v743_v23 = vpop.f32.mrf.mxu2  ;;  %v7182_v43 = vunpack.c.l.b16 %v668_v34  ;;  %v6149_v34 = vld [vmem:[%s7770_s1 + $0x138] sm:$0xff] }
 0x149   :  { %v1450_v8 = vpack.c.b16 %v7178_v22, %v7176_v19  ;;  %2272 = vmatpush.bf16.msrb.mxu2 %v6149_v34 }
 0x14a   :  { %v772_v24 = vpop.f32.mrf.mxu3  ;;  %v630_v26 = vpop.f32.mrf.mxu0 }
 0x14b   :  { %v773_v10 = vadd.f32 %v772_v24, %v743_v23  ;;  %v659_v27 = vpop.f32.mrf.mxu1 }
 0x14c   :  { %v660_v13 = vadd.f32 %v659_v27, %v630_v26  ;;  %v6141_v27 = vld [vmem:[%s7770_s1 + $0xf8] sm:$0xff] }
 0x14d   :  { %v783_v49 = vpack.c.bf16 %v773_v10, %v773_v10  ;;  %v6133_v10 = vld [vmem:[%s7770_s1 + $0xb8] sm:$0xff]  ;;  %2243 = vmatpush.bf16.msrb.mxu1 %v6141_v27 }
 0x14e   :  { %v669_v39 = vpack.c.bf16 %v660_v13, %v660_v13  ;;  %2214 = vmatpush.bf16.msrb.mxu0 %v6133_v10 }
 0x14f   :  { %v7192_v24 = vunpack.c.l.b16 %v783_v49  ;;  %v6105_v49 = vld [vmem:[#allocation2 + $0x214] sm:$0xf0] }
 0x150   :  { %v7184_v45 = vunpack.c.l.b16 %v669_v39  ;;  %v745_v54 = vpop.f32.mrf.mxu2  ;;  %v6157_v39 = vld [vmem:[%s7770_s1 + $0x178] sm:$0xff]  ;;  %v5019_v34 = vor.u32 %v6105_v49, %v5018_v15  ;;  %v6154_v15 = vld [vmem:[%s7770_s1 + $0x160] sm:$0xff] }
 0x151   :  { %2301 = vmatpush.bf16.msrb.mxu3 %v6157_v39  ;;  %2244 = vmatpush.bf16.msrb.mxu1 %v6140_v1  ;;  %v6138_v1 = vld [vmem:[%s7770_s1 + $0xe0] sm:$0xff]  ;;  %v6129_v49 = vld [vmem:[%s7770_s1 + $0x98] sm:$0xff] }
 0x152   :  { %v774_v56 = vpop.f32.mrf.mxu3  ;;  %v1427_v62 = vpack.c.b16 %v7184_v45, %v7182_v43  ;;  %v7188_v16 = vpop.f32.mrf.mxu0  ;;  %2215 = vmatpush.bf16.msrb.mxu0 %v6132_v0  ;;  %v6130_v0 = vld [vmem:[%s7770_s1 + $0xa0] sm:$0xff] }
 0x153   :  { %v775_v9 = vadd.f32 %v774_v56, %v745_v54  ;;  %v7190_v23 = vpop.f32.mrf.mxu1  ;;  %v6131_v54 = vld [vmem:[%s7770_s1 + $0xa8] sm:$0xff] }
 0x154   :  { %v6139_v56 = vld [vmem:[%s7770_s1 + $0xe8] sm:$0xff]  ;;  %v873_v31 = vadd.f32 %v7190_v23, %v7188_v16 }
 0x155   :  { %v784_v26 = vpack.c.bf16 %v775_v9, %v775_v9  ;;  %1302 = vmatmul.bf16.vlgmr.msra.gmra.mxu0 %v5011_v59  ;;  %2164 = vmatmul.bf16.vlgmr.msra.gmra.mxu2 %v1376_v3  ;;  %v6148_v3 = vld [vmem:[%s7770_s1 + $0x130] sm:$0xff]  ;;  %v6147_v59 = vld [vmem:[%s7770_s1 + $0x128] sm:$0xff]  ;;  %v5020_v9 = vld [vmem:[#allocation2 + $0x218] sm:$0xf0] }
 0x156   :  { %1331 = vmatmul.bf16.vlgmr.msra.gmra.mxu1 %v5015_v60  ;;  %2273 = vmatpush.bf16.msrb.mxu2 %v6148_v3  ;;  %v6104_v60 = vld [vmem:[#allocation2 + $0x214] sm:$0xf]  ;;  %v6146_v3 = vld [vmem:[%s7770_s1 + $0x120] sm:$0xff] }
 0x157   :  { %v7203_v13 = vunpack.c.l.b16 %v784_v26  ;;  %2193 = vmatmul.bf16.vlgmr.msra.gmra.mxu3 %v1400_v58  ;;  %v6156_v58 = vld [vmem:[%s7770_s1 + $0x170] sm:$0xff]  ;;  %v6155_v26 = vld [vmem:[%s7770_s1 + $0x168] sm:$0xff]  ;;  %2216 = vmatpush.bf16.msrb.mxu0 %v6131_v54  ;;  %v5023_v39 = vor.u32 %v6104_v60, %v5020_v9  ;;  %v6153_v60 = vld [vmem:[%s7770_s1 + $0x158] sm:$0xff] }
 0x158   :  { %v7216_v41 = vpop.f32.mrf.mxu2  ;;  %2302 = vmatpush.bf16.msrb.mxu3 %v6156_v58  ;;  %2245 = vmatpush.bf16.msrb.mxu1 %v6139_v56  ;;  %v6137_v56 = vld [vmem:[%s7770_s1 + $0xd8] sm:$0xff] }
 0x159   :  { %v1451_v40 = vpack.c.b16 %v7203_v13, %v7192_v24 }
 0x15a   :  { %v7218_v42 = vpop.f32.mrf.mxu3  ;;  %v7229_v4 = vpop.f32.mrf.mxu0  ;;  %2274 = vmatpush.bf16.msrb.mxu2 %v6147_v59  ;;  %v6145_v59 = vld [vmem:[%s7770_s1 + $0x118] sm:$0xff] }
 0x15b   :  { %v7231_v57 = vpop.f32.mrf.mxu1  ;;  %2217 = vmatpush.bf16.msrb.mxu0 %v6130_v0  ;;  %v6127_v0 = vld [vmem:[%s7770_s1 + $0x88] sm:$0xff] }
 0x15c   :  { %2303 = vmatpush.bf16.msrb.mxu3 %v6155_v26  ;;  %2246 = vmatpush.bf16.msrb.mxu1 %v6138_v1  ;;  %v6135_v1 = vld [vmem:[%s7770_s1 + $0xc8] sm:$0xff] }
 0x15e   :  { %2275 = vmatpush.bf16.msrb.mxu2 %v6146_v3  ;;  %v6143_v3 = vld [vmem:[%s7770_s1 + $0x108] sm:$0xff] }
 0x15f   :  { %2218 = vmatpush.bf16.msrb.mxu0 %v6129_v49  ;;  %v5028_v49 = vld [vmem:[#allocation2 + $0x228] sm:$0xf0] }
 0x160   :  { %v7248_v10 = vpop.f32.mrf.mxu2  ;;  %2304 = vmatpush.bf16.msrb.mxu3 %v6154_v15  ;;  %2247 = vmatpush.bf16.msrb.mxu1 %v6137_v56  ;;  %v6106_v15 = vld [vmem:[#allocation2 + $0x224] sm:$0xf]  ;;  %v6151_v56 = vld [vmem:[%s7770_s1 + $0x148] sm:$0xff] }
 0x162   :  { %v7250_v27 = vpop.f32.mrf.mxu3  ;;  %v7261_v58 = vpop.f32.mrf.mxu0  ;;  %2276 = vmatpush.bf16.msrb.mxu2 %v6145_v59 }
 0x163   :  { %v7263_v54 = vpop.f32.mrf.mxu1  ;;  %2219 = vmatpush.bf16.msrb.mxu0 %v6128_v20 }
 0x164   :  { %2305 = vmatpush.bf16.msrb.mxu3 %v6153_v60  ;;  %2248 = vmatpush.bf16.msrb.mxu1 %v6136_v21  ;;  %v5031_v21 = vor.u32 %v6106_v15, %v5028_v49 }
 0x165   :  { %1307 = vmatmul.bf16.gmra.mxu0 %v5019_v34  ;;  %2169 = vmatmul.bf16.gmra.mxu2 %v1377_v28  ;;  %v6144_v28 = vld [vmem:[%s7770_s1 + $0x110] sm:$0xff]  ;;  %v5026_v34 = vld [vmem:[#allocation2 + $0x220] sm:$0xf] }
 0x166   :  { %1336 = vmatmul.bf16.gmra.mxu1 %v5023_v39  ;;  %v6107_v39 = vld [vmem:[#allocation2 + $0x224] sm:$0xf0]  ;;  %2277 = vmatpush.bf16.msrb.mxu2 %v6144_v28  ;;  %v6126_v28 = vld [vmem:[%s7770_s1 + $0x80] sm:$0xff] }
 0x167   :  { %2198 = vmatmul.bf16.gmra.mxu3 %v1401_v36  ;;  %v6152_v36 = vld [vmem:[%s7770_s1 + $0x150] sm:$0xff]  ;;  %2220 = vmatpush.bf16.msrb.mxu0 %v6127_v0  ;;  %v5027_v20 = vor.u32 %v6107_v39, %v5026_v34  ;;  %v6142_v0 = vld [vmem:[%s7770_s1 + $0x100] sm:$0xff] }
 0x168   :  { %v7286_v9 = vpop.f32.mrf.mxu2  ;;  %2306 = vmatpush.bf16.msrb.mxu3 %v6152_v36  ;;  %2249 = vmatpush.bf16.msrb.mxu1 %v6135_v1  ;;  %v6134_v36 = vld [vmem:[%s7770_s1 + $0xc0] sm:$0xff] }
 0x169   :  { %v6150_v34 = vld [vmem:[%s7770_s1 + $0x140] sm:$0xff] }
 0x16a   :  { %v7288_v26 = vpop.f32.mrf.mxu3  ;;  %v7299_v12 = vpop.f32.mrf.mxu0  ;;  %2278 = vmatpush.bf16.msrb.mxu2 %v6143_v3 }
 0x16b   :  { %v7301_v35 = vpop.f32.mrf.mxu1  ;;  %2221 = vmatpush.bf16.msrb.mxu0 %v6126_v28  ;;  %v5034_v28 = vld [vmem:[#allocation2 + $0x230] sm:$0xf]  ;;  %v993_v25 = vadd.f32 %v7288_v26, %v7286_v9  ;;  %v878_v9 = vadd.f32 %v7263_v54, %v7261_v58 }
 0x16c   :  { %2307 = vmatpush.bf16.msrb.mxu3 %v6151_v56  ;;  %2250 = vmatpush.bf16.msrb.mxu1 %v6134_v36  ;;  %v6109_v36 = vld [vmem:[#allocation2 + $0x234] sm:$0xf0]  ;;  %v880_v11 = vadd.f32 %v7301_v35, %v7299_v12 }
 0x16d   :  { %v5035_v48 = vor.u32 %v6109_v36, %v5034_v28  ;;  %v990_v28 = vadd.f32 %v7250_v27, %v7248_v10  ;;  %v1009_v35 = vpack.c.bf16 %v993_v25, %v993_v25 }
 0x16e   :  { %2279 = vmatpush.bf16.msrb.mxu2 %v6142_v0 }
 0x16f   :  { %v1490_v58 = vunpack.c.l.b16 %v1009_v35  ;;  %v6159_v35 = vld [vmem:[%s7770_s1 + $0x188] sm:$0xff] }
 0x170   :  { %v7318_v59 = vpop.f32.mrf.mxu2  ;;  %2308 = vmatpush.bf16.msrb.mxu3 %v6150_v34  ;;  %v875_v34 = vadd.f32 %v7231_v57, %v7229_v4 }
 0x172   :  { %v7320_v60 = vpop.f32.mrf.mxu3  ;;  %v7331_v1 = vpop.f32.mrf.mxu0  ;;  %v893_v51 = vpack.c.bf16 %v875_v34, %v875_v34  ;;  %v6173_v34 = vld [vmem:[%s7770_s1 + $0x1f8] sm:$0xff] }
 0x173   :  { %v7333_v3 = vpop.f32.mrf.mxu1  ;;  %2359 = vmatpush.bf16.msra.mxu1 %v6173_v34 }
 0x174   :  { %v1465_v4 = vunpack.c.l.b16 %v893_v51  ;;  %v894_v51 = vpack.c.bf16 %v878_v9, %v878_v9 }
 0x175   :  { %1312 = vmatmul.bf16.gmra.mxu0 %v5027_v20  ;;  %2174 = vmatmul.bf16.gmra.mxu2 %v1378_v5  ;;  %v6108_v20 = vld [vmem:[#allocation2 + $0x234] sm:$0xf] }
 0x176   :  { %1341 = vmatmul.bf16.gmra.mxu1 %v5031_v21  ;;  %v5036_v21 = vld [vmem:[#allocation2 + $0x238] sm:$0xf0] }
 0x177   :  { %2203 = vmatmul.bf16.gmra.mxu3 %v1402_v18  ;;  %v5039_v5 = vor.u32 %v6108_v20, %v5036_v21  ;;  %v988_v18 = vadd.f32 %v7218_v42, %v7216_v41  ;;  %v892_v41 = vpack.c.bf16 %v873_v31, %v873_v31  ;;  %v6163_v31 = vld [vmem:[%s7770_s1 + $0x1a8] sm:$0xff] }
 0x178   :  { %v7344_v39 = vpop.f32.mrf.mxu2 }
 0x179   :  { %v1007_v2 = vpack.c.bf16 %v988_v18, %v988_v18  ;;  %v1464_v27 = vunpack.c.l.b16 %v892_v41  ;;  %v6165_v18 = vld [vmem:[%s7770_s1 + $0x1b8] sm:$0xff] }
 0x17a   :  { %v7346_v15 = vpop.f32.mrf.mxu3  ;;  %v7348_v49 = vpop.f32.mrf.mxu0  ;;  %2330 = vmatpush.bf16.msra.mxu0 %v6165_v18  ;;  %v6181_v18 = vld [vmem:[%s7770_s1 + $0x238] sm:$0xff] }
 0x17b   :  { %v7350_v56 = vpop.f32.mrf.mxu1  ;;  %v1488_v42 = vunpack.c.l.b16 %v1007_v2  ;;  %v1472_v16 = vpack.c.b16 %v1465_v4, %v1464_v27  ;;  %v6171_v2 = vld [vmem:[%s7770_s1 + $0x1e8] sm:$0xff]  ;;  %v6162_v4 = vld [vmem:[%s7770_s1 + $0x1a0] sm:$0xff]  ;;  %v1466_v27 = vunpack.c.l.b16 %v894_v51  ;;  %2388 = vmatpush.bf16.msra.mxu2 %v6181_v18  ;;  %v998_v30 = vadd.f32 %v7346_v15, %v7344_v39  ;;  %v6177_v18 = vld [vmem:[%s7770_s1 + $0x218] sm:$0xff] }
 0x17c   :  { %v883_v39 = vadd.f32 %v7333_v3, %v7331_v1  ;;  %v6167_v1 = vld [vmem:[%s7770_s1 + $0x1c8] sm:$0xff] }
 0x17e   :  { %v896_v3 = vpack.c.bf16 %v883_v39, %v883_v39 }
 0x17f   :  { %2389 = vmatpush.bf16.msra.mxu2 %v6180_v29 }
 0x180   :  { %v7352_v0 = vpop.f32.mrf.mxu2 }
 0x182   :  { %v7354_v47 = vpop.f32.mrf.mxu3  ;;  %v7356_v63 = vpop.f32.mrf.mxu0 }
 0x183   :  { %v7358_v17 = vpop.f32.mrf.mxu1  ;;  %v1000_v6 = vadd.f32 %v7354_v47, %v7352_v0  ;;  %v1011_v0 = vpack.c.bf16 %v998_v30, %v998_v30 }
 0x184   :  { %v888_v19 = vadd.f32 %v7358_v17, %v7356_v63 }
 0x185   :  { %1317 = vmatmul.bf16.gmra.mxu0 %v5035_v48  ;;  %2179 = vmatmul.bf16.gmra.mxu2 %v1379_v14  ;;  %v1012_v9 = vpack.c.bf16 %v1000_v6, %v1000_v6 }
 0x186   :  { %1346 = vmatmul.bf16.gmra.mxu1 %v5039_v5 }
 0x187   :  { %2208 = vmatmul.bf16.gmra.mxu3 %v1403_v53  ;;  %v1008_v53 = vpack.c.bf16 %v990_v28, %v990_v28  ;;  %v6172_v28 = vld [vmem:[%s7770_s1 + $0x1f0] sm:$0xff] }
 0x188   :  { %v7372_v36 = vpop.f32.mrf.mxu2  ;;  %2360 = vmatpush.bf16.msra.mxu1 %v6172_v28  ;;  %v6168_v28 = vld [vmem:[%s7770_s1 + $0x1d0] sm:$0xff] }
 0x189   :  { %v1489_v57 = vunpack.c.l.b16 %v1008_v53 }
 0x18a   :  { %v7374_v20 = vpop.f32.mrf.mxu3  ;;  %v7378_v32 = vpop.f32.mrf.mxu0 }
 0x18b   :  { %v7380_v14 = vpop.f32.mrf.mxu1  ;;  %v1496_v23 = vpack.c.b16 %v1489_v57, %v1488_v42  ;;  %v6170_v57 = vld [vmem:[%s7770_s1 + $0x1e0] sm:$0xff] }
 0x18c   :  { %2361 = vmatpush.bf16.msra.mxu1 %v6171_v2  ;;  %v1493_v2 = vunpack.c.l.b16 %v1012_v9  ;;  %v890_v29 = vadd.f32 %v7380_v14, %v7378_v32 }
 0x18e   :  { %v899_v32 = vpack.c.bf16 %v890_v29, %v890_v29 }
 0x190   :  { %v7382_v21 = vpop.f32.mrf.mxu2  ;;  %2362 = vmatpush.bf16.msra.mxu1 %v6170_v57  ;;  %v1471_v63 = vunpack.c.l.b16 %v899_v32 }
 0x192   :  { %v7384_v10 = vpop.f32.mrf.mxu3  ;;  %v7386_v48 = vpop.f32.mrf.mxu0 }
 0x193   :  { %v7388_v5 = vpop.f32.mrf.mxu1  ;;  %v1005_v37 = vadd.f32 %v7384_v10, %v7382_v21  ;;  %v898_v21 = vpack.c.bf16 %v888_v19, %v888_v19  ;;  %v6174_v10 = vld [vmem:[%s7770_s1 + $0x200] sm:$0xff] }
 0x195   :  { %2222 = vmatmul.bf16.vlgmr.msrb.gmra.mxu0 %v1424_v33  ;;  %2280 = vmatmul.bf16.vlgmr.msrb.gmra.mxu2 %v1472_v16  ;;  %v995_v33 = vadd.f32 %v7320_v60, %v7318_v59  ;;  %v895_v59 = vpack.c.bf16 %v880_v11, %v880_v11  ;;  %v6161_v11 = vld [vmem:[%s7770_s1 + $0x198] sm:$0xff]  ;;  %v1014_v14 = vpack.c.bf16 %v1005_v37, %v1005_v37 }
 0x196   :  { %2251 = vmatmul.bf16.vlgmr.msrb.gmra.mxu1 %v1448_v55  ;;  %v6164_v55 = vld [vmem:[%s7770_s1 + $0x1b0] sm:$0xff] }
 0x197   :  { %2309 = vmatmul.bf16.vlgmr.msrb.gmra.mxu3 %v1496_v23  ;;  %2331 = vmatpush.bf16.msra.mxu0 %v6164_v55  ;;  %v1010_v60 = vpack.c.bf16 %v995_v33, %v995_v33  ;;  %v1467_v54 = vunpack.c.l.b16 %v895_v59  ;;  %v6169_v33 = vld [vmem:[%s7770_s1 + $0x1d8] sm:$0xff]  ;;  %v6160_v55 = vld [vmem:[%s7770_s1 + $0x190] sm:$0xff]  ;;  %v6178_v59 = vld [vmem:[%s7770_s1 + $0x220] sm:$0xff]  ;;  %v1495_v17 = vunpack.c.l.b16 %v1014_v14 }
 0x198   :  { %v7408_v46 = vpop.f32.mrf.mxu2  ;;  %2363 = vmatpush.bf16.msra.mxu1 %v6169_v33  ;;  %v1003_v33 = vadd.f32 %v7374_v20, %v7372_v36  ;;  %v6175_v36 = vld [vmem:[%s7770_s1 + $0x208] sm:$0xff] }
 0x199   :  { %v1491_v53 = vunpack.c.l.b16 %v1010_v60  ;;  %v1473_v34 = vpack.c.b16 %v1467_v54, %v1466_v27  ;;  %v1492_v60 = vunpack.c.l.b16 %v1011_v0  ;;  %v6158_v54 = vld [vmem:[%s7770_s1 + $0x180] sm:$0xff] }
 0x19a   :  { %v7410_v52 = vpop.f32.mrf.mxu3  ;;  %v7420_v26 = vpop.f32.mrf.mxu0  ;;  %v1013_v20 = vpack.c.bf16 %v1003_v33, %v1003_v33 }
 0x19b   :  { %v7422_v12 = vpop.f32.mrf.mxu1  ;;  %2332 = vmatpush.bf16.msra.mxu0 %v6163_v31  ;;  %v1497_v25 = vpack.c.b16 %v1491_v53, %v1490_v58  ;;  %v6166_v53 = vld [vmem:[%s7770_s1 + $0x1c0] sm:$0xff] }
 0x19c   :  { %2364 = vmatpush.bf16.msra.mxu1 %v6168_v28  ;;  %v1494_v30 = vunpack.c.l.b16 %v1013_v20  ;;  %v1105_v9 = vadd.f32 %v7422_v12, %v7420_v26 }
 0x19e   :  { %v1499_v0 = vpack.c.b16 %v1495_v17, %v1494_v30 }
 0x19f   :  { %2333 = vmatpush.bf16.msra.mxu0 %v6162_v4  ;;  %v1468_v4 = vunpack.c.l.b16 %v896_v3 }
 0x1a0   :  { %v7430_v41 = vpop.f32.mrf.mxu2  ;;  %2365 = vmatpush.bf16.msra.mxu1 %v6167_v1  ;;  %v1103_v1 = vadd.f32 %v7388_v5, %v7386_v48 }
 0x1a2   :  { %v7432_v42 = vpop.f32.mrf.mxu3  ;;  %v7440_v16 = vpop.f32.mrf.mxu0 }
 0x1a3   :  { %v7442_v23 = vpop.f32.mrf.mxu1  ;;  %2334 = vmatpush.bf16.msra.mxu0 %v6161_v11  ;;  %v6176_v11 = vld [vmem:[%s7770_s1 + $0x210] sm:$0xff] }
 0x1a4   :  { %2366 = vmatpush.bf16.msra.mxu1 %v6166_v53 }
 0x1a5   :  { %2227 = vmatmul.bf16.gmra.mxu0 %v1425_v44  ;;  %2285 = vmatmul.bf16.gmra.mxu2 %v1473_v34  ;;  %v885_v44 = vadd.f32 %v7350_v56, %v7348_v49  ;;  %v6179_v56 = vld [vmem:[%s7770_s1 + $0x228] sm:$0xff] }
 0x1a6   :  { %2256 = vmatmul.bf16.gmra.mxu1 %v1449_v61  ;;  %2390 = vmatpush.bf16.msra.mxu2 %v6179_v56 }
 0x1a7   :  { %2314 = vmatmul.bf16.gmra.mxu3 %v1497_v25  ;;  %2335 = vmatpush.bf16.msra.mxu0 %v6160_v55  ;;  %v897_v47 = vpack.c.bf16 %v885_v44, %v885_v44  ;;  %v1498_v25 = vpack.c.b16 %v1493_v2, %v1492_v60  ;;  %v1470_v55 = vunpack.c.l.b16 %v898_v21 }
 0x1a8   :  { %v7468_v7 = vpop.f32.mrf.mxu2 }
 0x1a9   :  { %v1469_v31 = vunpack.c.l.b16 %v897_v47  ;;  %v1475_v56 = vpack.c.b16 %v1471_v63, %v1470_v55  ;;  %v1218_v47 = vadd.f32 %v7410_v52, %v7408_v46  ;;  %v1122_v52 = vpack.c.bf16 %v1103_v1, %v1103_v1 }
 0x1aa   :  { %v7470_v61 = vpop.f32.mrf.mxu3  ;;  %v7480_v15 = vpop.f32.mrf.mxu0  ;;  %2391 = vmatpush.bf16.msra.mxu2 %v6178_v59 }
 0x1ab   :  { %v7482_v49 = vpop.f32.mrf.mxu1  ;;  %2336 = vmatpush.bf16.msra.mxu0 %v6159_v35  ;;  %v1474_v34 = vpack.c.b16 %v1469_v31, %v1468_v4  ;;  %v1220_v35 = vadd.f32 %v7432_v42, %v7430_v41  ;;  %v1237_v13 = vpack.c.bf16 %v1218_v47, %v1218_v47  ;;  %v1512_v59 = vunpack.c.l.b16 %v1122_v52 }
 0x1ac   :  { %v1223_v2 = vadd.f32 %v7470_v61, %v7468_v7  ;;  %v1110_v53 = vadd.f32 %v7482_v49, %v7480_v15 }
 0x1ad   :  { %v1238_v46 = vpack.c.bf16 %v1220_v35, %v1220_v35  ;;  %v1536_v3 = vunpack.c.l.b16 %v1237_v13 }
 0x1ae   :  { %2392 = vmatpush.bf16.msra.mxu2 %v6177_v18  ;;  %v1239_v33 = vpack.c.bf16 %v1223_v2, %v1223_v2  ;;  %v1125_v37 = vpack.c.bf16 %v1110_v53, %v1110_v53 }
 0x1af   :  { %2337 = vmatpush.bf16.msra.mxu0 %v6158_v54  ;;  %v1537_v12 = vunpack.c.l.b16 %v1238_v46  ;;  %v7583_v54 = vld [vmem:[%s7771_s16] ss:$0 sm:$0xff] }
 0x1b0   :  { %v7496_v51 = vpop.f32.mrf.mxu2 }
 0x1b1   :  { %v1544_v31 = vpack.c.b16 %v1537_v12, %v1536_v3 }
 0x1b2   :  { %v7498_v58 = vpop.f32.mrf.mxu3  ;;  %v7506_v57 = vpop.f32.mrf.mxu0  ;;  %2393 = vmatpush.bf16.msra.mxu2 %v6176_v11 }
 0x1b3   :  { %v7508_v27 = vpop.f32.mrf.mxu1  ;;  %v1225_v4 = vadd.f32 %v7498_v58, %v7496_v51  ;;  %v1538_v51 = vunpack.c.l.b16 %v1239_v33  ;;  %v1515_v58 = vunpack.c.l.b16 %v1125_v37 }
 0x1b4   :  { %v1113_v13 = vadd.f32 %v7508_v27, %v7506_v57 }
 0x1b5   :  { %2232 = vmatmul.bf16.gmra.mxu0 %v1426_v50  ;;  %2290 = vmatmul.bf16.gmra.mxu2 %v1474_v34  ;;  %v1108_v34 = vadd.f32 %v7442_v23, %v7440_v16  ;;  %v1240_v19 = vpack.c.bf16 %v1225_v4, %v1225_v4 }
 0x1b6   :  { %2261 = vmatmul.bf16.gmra.mxu1 %v1450_v8  ;;  %2394 = vmatpush.bf16.msra.mxu2 %v6175_v36 }
 0x1b7   :  { %2319 = vmatmul.bf16.gmra.mxu3 %v1498_v25  ;;  %v1124_v15 = vpack.c.bf16 %v1108_v34, %v1108_v34  ;;  %v1539_v14 = vunpack.c.l.b16 %v1240_v19 }
 0x1b8   :  { %v7528_v38 = vpop.f32.mrf.mxu2 }
 0x1b9   :  { %v1514_v23 = vunpack.c.l.b16 %v1124_v15 }
 0x1ba   :  { %v7530_v50 = vpop.f32.mrf.mxu3  ;;  %v7534_v22 = vpop.f32.mrf.mxu0  ;;  %2395 = vmatpush.bf16.msra.mxu2 %v6174_v10 }
 0x1bb   :  { %v7536_v8 = vpop.f32.mrf.mxu1  ;;  %v1228_v47 = vadd.f32 %v7530_v50, %v7528_v38 }
 0x1bd   :  { %v1241_v52 = vpack.c.bf16 %v1228_v47, %v1228_v47 }
 0x1c0   :  { %v7544_v44 = vpop.f32.mrf.mxu2 }
 0x1c2   :  { %v7546_v6 = vpop.f32.mrf.mxu3  ;;  %v7548_v28 = vpop.f32.mrf.mxu0 }
 0x1c3   :  { %v7550_v39 = vpop.f32.mrf.mxu1  ;;  %v1230_v35 = vadd.f32 %v7546_v6, %v7544_v44  ;;  %v1540_v44 = vunpack.c.l.b16 %v1241_v52 }
 0x1c4   :  { %v1118_v37 = vadd.f32 %v7550_v39, %v7548_v28 }
 0x1c5   :  { %2237 = vmatmul.bf16.gmra.mxu0 %v1427_v62  ;;  %2295 = vmatmul.bf16.gmra.mxu2 %v1475_v56  ;;  %v1521_v56 = vpack.c.b16 %v1515_v58, %v1514_v23 }
 0x1c6   :  { %2266 = vmatmul.bf16.gmra.mxu1 %v1451_v40  ;;  %v1123_v40 = vpack.c.bf16 %v1105_v9, %v1105_v9  ;;  %v1115_v9 = vadd.f32 %v7536_v8, %v7534_v22  ;;  %v1126_v22 = vpack.c.bf16 %v1113_v13, %v1113_v13 }
 0x1c7   :  { %2324 = vmatmul.bf16.gmra.mxu3 %v1499_v0  ;;  %v1545_v0 = vpack.c.b16 %v1539_v14, %v1538_v51 }
 0x1c8   :  { %v7566_v43 = vpop.f32.mrf.mxu2  ;;  %v1513_v26 = vunpack.c.l.b16 %v1123_v40  ;;  %v1516_v27 = vunpack.c.l.b16 %v1126_v22 }
 0x1ca   :  { %v7568_v45 = vpop.f32.mrf.mxu3  ;;  %v7570_v62 = vpop.f32.mrf.mxu0  ;;  %v1520_v60 = vpack.c.b16 %v1513_v26, %v1512_v59  ;;  %v1127_v59 = vpack.c.bf16 %v1115_v9, %v1115_v9 }
 0x1cb   :  { %v7572_v24 = vpop.f32.mrf.mxu1  ;;  %v1233_v33 = vadd.f32 %v7568_v45, %v7566_v43 }
 0x1cc   :  { %v1517_v6 = vunpack.c.l.b16 %v1127_v59 }
 0x1d0   :  { %v7574_v41 = vpop.f32.mrf.mxu2 }
 0x1d2   :  { %v7576_v42 = vpop.f32.mrf.mxu3  ;;  %v1303_v48 = vpop.f32.mrf.mxu0 }
 0x1d3   :  { %v1332_v5 = vpop.f32.mrf.mxu1 }
 0x1d4   :  { %v1333_v18 = vadd.f32 %v1332_v5, %v1303_v48  ;;  %v1242_v48 = vpack.c.bf16 %v1230_v35, %v1230_v35 }
 0x1d5   :  { %2338 = vmatmul.bf16.vlgmr.msra.gmra.mxu0 %v1520_v60 }
 0x1d6   :  { %2367 = vmatmul.bf16.vlgmr.msra.gmra.mxu1 %v1544_v31  ;;  %v1352_v36 = vpack.c.bf16 %v1333_v18, %v1333_v18  ;;  %v1541_v60 = vunpack.c.l.b16 %v1242_v48 }
 0x1d8   :  { %v2165_v25 = vpop.f32.mrf.mxu2  ;;  %v1560_v21 = vunpack.c.l.b16 %v1352_v36  ;;  %v1243_v36 = vpack.c.bf16 %v1233_v33, %v1233_v33 }
 0x1d9   :  { %v2166_v7 = vadd.f32 %v7583_v54, %v2165_v25  ;;  %v1522_v25 = vpack.c.b16 %v1517_v6, %v1516_v27 }
 0x1da   :  { %v2194_v11 = vpop.f32.mrf.mxu3  ;;  %v1305_v61 = vpop.f32.mrf.mxu0 }
 0x1db   :  { %v1334_v29 = vpop.f32.mrf.mxu1  ;;  %v7592_v32 = vadd.f32 %v2194_v11, %v2166_v7  ;;  %v1546_v11 = vpack.c.b16 %v1541_v60, %v1540_v44  ;;  %v1120_v7 = vadd.f32 %v7572_v24, %v7570_v62  ;;  %v1128_v62 = vpack.c.bf16 %v1118_v37, %v1118_v37 }
 0x1dc   :  { %v1335_v20 = vadd.f32 %v1334_v29, %v1305_v61  ;;  %v1235_v61 = vadd.f32 %v7576_v42, %v7574_v41 }
 0x1dd   :  { %v1129_v51 = vpack.c.bf16 %v1120_v7, %v1120_v7  ;;  %v1518_v28 = vunpack.c.l.b16 %v1128_v62 }
 0x1de   :  { %v1353_v49 = vpack.c.bf16 %v1335_v20, %v1335_v20  ;;  %v1244_v58 = vpack.c.bf16 %v1235_v61, %v1235_v61 }
 0x1df   :  { %v1519_v41 = vunpack.c.l.b16 %v1129_v51 }
 0x1e0   :  { %v1561_v16 = vunpack.c.l.b16 %v1353_v49  ;;  %v7594_v30 = vpop.f32.mrf.mxu2  ;;  %v1543_v42 = vunpack.c.l.b16 %v1244_v58 }
 0x1e2   :  { %v1568_v10 = vpack.c.b16 %v1561_v16, %v1560_v21  ;;  %v7596_v63 = vpop.f32.mrf.mxu3  ;;  %v1308_v17 = vpop.f32.mrf.mxu0  ;;  %v1542_v16 = vunpack.c.l.b16 %v1243_v36 }
 0x1e3   :  { %v1337_v55 = vpop.f32.mrf.mxu1 }
 0x1e4   :  { %2396 = vmatmul.bf16.vlgmr.msra.gmra.mxu2 %v1568_v10  ;;  %v1338_v1 = vadd.f32 %v1337_v55, %v1308_v17  ;;  %v1547_v47 = vpack.c.b16 %v1543_v42, %v1542_v16 }
 0x1e5   :  { %2343 = vmatmul.bf16.gmra.mxu0 %v1521_v56 }
 0x1e6   :  { %2372 = vmatmul.bf16.gmra.mxu1 %v1545_v0  ;;  %v1354_v38 = vpack.c.bf16 %v1338_v1, %v1338_v1  ;;  %v1523_v0 = vpack.c.b16 %v1519_v41, %v1518_v28 }
 0x1e8   :  { %v2170_v40 = vpop.f32.mrf.mxu2  ;;  %v1562_v31 = vunpack.c.l.b16 %v1354_v38 }
 0x1e9   :  { %v2171_v3 = vadd.f32 %v7583_v54, %v2170_v40 }
 0x1ea   :  { %v2199_v46 = vpop.f32.mrf.mxu3  ;;  %v1310_v26 = vpop.f32.mrf.mxu0 }
 0x1eb   :  { %v1339_v12 = vpop.f32.mrf.mxu1  ;;  %v7607_v5 = vadd.f32 %v2199_v46, %v2171_v3 }
 0x1ec   :  { %v1340_v50 = vadd.f32 %v1339_v12, %v1310_v26 }
 0x1ee   :  { %v1355_v8 = vpack.c.bf16 %v1340_v50, %v1340_v50 }
 0x1f0   :  { %v1563_v57 = vunpack.c.l.b16 %v1355_v8  ;;  %v7609_v2 = vpop.f32.mrf.mxu2 }
 0x1f2   :  { %v7611_v53 = vpop.f32.mrf.mxu3  ;;  %v1569_v4 = vpack.c.b16 %v1563_v57, %v1562_v31  ;;  %v1313_v18 = vpop.f32.mrf.mxu0 }
 0x1f3   :  { %v1342_v34 = vpop.f32.mrf.mxu1 }
 0x1f4   :  { %2401 = vmatmul.bf16.gmra.mxu2 %v1569_v4  ;;  %v1343_v29 = vadd.f32 %v1342_v34, %v1313_v18 }
 0x1f5   :  { %2348 = vmatmul.bf16.gmra.mxu0 %v1522_v25 }
 0x1f6   :  { %2377 = vmatmul.bf16.gmra.mxu1 %v1546_v11  ;;  %v1356_v14 = vpack.c.bf16 %v1343_v29, %v1343_v29 }
 0x1f8   :  { %v2175_v19 = vpop.f32.mrf.mxu2  ;;  %v1564_v23 = vunpack.c.l.b16 %v1356_v14 }
 0x1f9   :  { %v2176_v20 = vadd.f32 %v7583_v54, %v2175_v19 }
 0x1fa   :  { %v1315_v15 = vpop.f32.mrf.mxu0  ;;  %v2204_v43 = vpop.f32.mrf.mxu3 }
 0x1fb   :  { %v1344_v49 = vpop.f32.mrf.mxu1  ;;  %v2205_v21 = vadd.f32 %v2204_v43, %v2176_v20 }
 0x1fc   :  { %v1345_v45 = vadd.f32 %v1344_v49, %v1315_v15 }
 0x1fe   :  { %v1357_v24 = vpack.c.bf16 %v1345_v45, %v1345_v45 }
 0x200   :  { %v1565_v10 = vunpack.c.l.b16 %v1357_v24  ;;  %v7622_v39 = vpop.f32.mrf.mxu2 }
 0x202   :  { %v1570_v17 = vpack.c.b16 %v1565_v10, %v1564_v23  ;;  %v1318_v55 = vpop.f32.mrf.mxu0  ;;  %v7630_v7 = vpop.f32.mrf.mxu3  ;;  %v2168_v10 = vadd.f32 %v7583_v54, %v7594_v30 }
 0x203   :  { %v1347_v56 = vpop.f32.mrf.mxu1 }
 0x204   :  { %2406 = vmatmul.bf16.gmra.mxu2 %v1570_v17  ;;  %v1348_v9 = vadd.f32 %v1347_v56, %v1318_v55  ;;  %v2197_v17 = vadd.f32 %v7596_v63, %v2168_v10 }
 0x205   :  { %2353 = vmatmul.bf16.gmra.mxu0 %v1523_v0 }
 0x206   :  { %2382 = vmatmul.bf16.gmra.mxu1 %v1547_v47  ;;  %v1358_v40 = vpack.c.bf16 %v1348_v9, %v1348_v9 }
 0x208   :  { %v7624_v35 = vpop.f32.mrf.mxu2  ;;  %v1566_v3 = vunpack.c.l.b16 %v1358_v40 }
 0x20a   :  { %v1320_v1 = vpop.f32.mrf.mxu0  ;;  %v7634_v51 = vpop.f32.mrf.mxu3 }
 0x20b   :  { %v1349_v13 = vpop.f32.mrf.mxu1 }
 0x20c   :  { %v1350_v46 = vadd.f32 %v1349_v13, %v1320_v1 }
 0x20e   :  { %v1359_v52 = vpack.c.bf16 %v1350_v46, %v1350_v46  ;;  %v2173_v46 = vadd.f32 %v7583_v54, %v7609_v2 }
 0x210   :  { %v1567_v26 = vunpack.c.l.b16 %v1359_v52  ;;  %v7626_v12 = vpop.f32.mrf.mxu2 }
 0x212   :  { %v1571_v59 = vpack.c.b16 %v1567_v26, %v1566_v3  ;;  %v2223_v48 = vpop.f32.mrf.mxu0  ;;  %v7640_v14 = vpop.f32.mrf.mxu3 }
 0x213   :  { %v2252_v38 = vpop.f32.mrf.mxu1  ;;  %v2224_v50 = vadd.f32 %v2223_v48, %v7592_v32 }
 0x214   :  { %2411 = vmatmul.bf16.gmra.mxu2 %v1571_v59 }
 0x215   :  { %v2253_v22 = vadd.f32 %v2252_v38, %v2224_v50  ;;  %v2202_v38 = vadd.f32 %v7611_v53, %v2173_v46 }
 0x218   :  { %v2281_v8 = vpop.f32.mrf.mxu2 }
 0x219   :  { %v2282_v44 = vadd.f32 %v2281_v8, %v2253_v22 }
 0x21a   :  { %v2225_v6 = vpop.f32.mrf.mxu0 }
 0x21b   :  { %v2254_v60 = vpop.f32.mrf.mxu1  ;;  %v2226_v56 = vadd.f32 %v2225_v6, %v2197_v17 }
 0x21d   :  { %v2255_v9 = vadd.f32 %v2254_v60, %v2226_v56 }
 0x220   :  { %v2283_v31 = vpop.f32.mrf.mxu2 }
 0x221   :  { %v2284_v13 = vadd.f32 %v2283_v31, %v2255_v9 }
 0x222   :  { %v2228_v57 = vpop.f32.mrf.mxu0 }
 0x223   :  { %v2257_v27 = vpop.f32.mrf.mxu1  ;;  %v2229_v4 = vadd.f32 %v2228_v57, %v7607_v5 }
 0x225   :  { %v2258_v18 = vadd.f32 %v2257_v27, %v2229_v4 }
 0x228   :  { %v2286_v34 = vpop.f32.mrf.mxu2 }
 0x229   :  { %v2287_v25 = vadd.f32 %v2286_v34, %v2258_v18 }
 0x22a   :  { %v2230_v11 = vpop.f32.mrf.mxu0 }
 0x22b   :  { %v2259_v33 = vpop.f32.mrf.mxu1  ;;  %v2231_v22 = vadd.f32 %v2230_v11, %v2202_v38 }
 0x22d   :  { %v2260_v27 = vadd.f32 %v2259_v33, %v2231_v22 }
 0x230   :  { %v2288_v61 = vpop.f32.mrf.mxu2 }
 0x231   :  { %v2289_v18 = vadd.f32 %v2288_v61, %v2260_v27  ;;  %v2181_v61 = vadd.f32 %v7583_v54, %v7624_v35 }
 0x232   :  { %v2233_v32 = vpop.f32.mrf.mxu0 }
 0x233   :  { %v2262_v29 = vpop.f32.mrf.mxu1  ;;  %v2234_v37 = vadd.f32 %v2233_v32, %v2205_v21  ;;  %v2310_v21 = vpop.f32.mrf.mxu3 }
 0x234   :  { %v2311_v3 = vadd.f32 %v2310_v21, %v2282_v44 }
 0x235   :  { %v2263_v19 = vadd.f32 %v2262_v29, %v2234_v37  ;;  %v2178_v29 = vadd.f32 %v7583_v54, %v7622_v39 }
 0x237   :  { %v2207_v21 = vadd.f32 %v7630_v7, %v2178_v29  ;;  %v2183_v7 = vadd.f32 %v7583_v54, %v7626_v12 }
 0x238   :  { %v2291_v36 = vpop.f32.mrf.mxu2 }
 0x239   :  { %v2292_v20 = vadd.f32 %v2291_v36, %v2263_v19 }
 0x23a   :  { %v2235_v15 = vpop.f32.mrf.mxu0 }
 0x23b   :  { %v7632_v49 = vpop.f32.mrf.mxu1  ;;  %v2312_v42 = vpop.f32.mrf.mxu3 }
 0x23c   :  { %v2313_v52 = vadd.f32 %v2312_v42, %v2284_v13 }
 0x240   :  { %v7642_v43 = vpop.f32.mrf.mxu2 }
 0x242   :  { %v7636_v5 = vpop.f32.mrf.mxu0 }
 0x243   :  { %v7638_v58 = vpop.f32.mrf.mxu1  ;;  %v2315_v0 = vpop.f32.mrf.mxu3 }
 0x244   :  { %v2316_v63 = vadd.f32 %v2315_v0, %v2287_v25 }
 0x248   :  { %v7648_v16 = vpop.f32.mrf.mxu2 }
 0x24a   :  { %v7644_v45 = vpop.f32.mrf.mxu0 }
 0x24b   :  { %v7646_v62 = vpop.f32.mrf.mxu1  ;;  %v2317_v26 = vpop.f32.mrf.mxu3 }
 0x24c   :  { %v2318_v37 = vadd.f32 %v2317_v26, %v2289_v18 }
 0x250   :  { %v7652_v28 = vpop.f32.mrf.mxu2 }
 0x252   :  { %v2339_v24 = vpop.f32.mrf.mxu0 }
 0x253   :  { %v2368_v41 = vpop.f32.mrf.mxu1  ;;  %v2340_v50 = vadd.f32 %v2339_v24, %v2311_v3  ;;  %v2320_v34 = vpop.f32.mrf.mxu3 }
 0x254   :  { %v2321_v24 = vadd.f32 %v2320_v34, %v2292_v20 }
 0x255   :  { %v2369_v60 = vadd.f32 %v2368_v41, %v2340_v50  ;;  %v2236_v41 = vadd.f32 %v2235_v15, %v2207_v21 }
 0x257   :  { %v2265_v39 = vadd.f32 %v7632_v49, %v2236_v41 }
 0x259   :  { %v2294_v35 = vadd.f32 %v7642_v43, %v2265_v39 }
 0x25a   :  { %v2341_v23 = vpop.f32.mrf.mxu0 }
 0x25b   :  { %v2370_v55 = vpop.f32.mrf.mxu1  ;;  %v2342_v59 = vadd.f32 %v2341_v23, %v2313_v52  ;;  %v2322_v42 = vpop.f32.mrf.mxu3 }
 0x25c   :  { %v2323_v46 = vadd.f32 %v2322_v42, %v2294_v35 }
 0x25d   :  { %v2371_v8 = vadd.f32 %v2370_v55, %v2342_v59  ;;  %v2210_v55 = vadd.f32 %v7634_v51, %v2181_v61  ;;  %v2212_v51 = vadd.f32 %v7640_v14, %v2183_v7 }
 0x25f   :  { %v2239_v0 = vadd.f32 %v7636_v5, %v2210_v55  ;;  %v2241_v3 = vadd.f32 %v7644_v45, %v2212_v51 }
 0x261   :  { %v2268_v13 = vadd.f32 %v7638_v58, %v2239_v0  ;;  %v2270_v12 = vadd.f32 %v7646_v62, %v2241_v3 }
 0x262   :  { %v2344_v47 = vpop.f32.mrf.mxu0 }
 0x263   :  { %v2373_v40 = vpop.f32.mrf.mxu1  ;;  %v2345_v6 = vadd.f32 %v2344_v47, %v2316_v63  ;;  %v2297_v49 = vadd.f32 %v7648_v16, %v2268_v13  ;;  %v2325_v52 = vpop.f32.mrf.mxu3  ;;  %v2299_v58 = vadd.f32 %v7652_v28, %v2270_v12  ;;  %v6685_v63 = vmov 64.0  }
 0x264   :  { %6380 = vrcp.f32 %v6685_v63 }
 0x265   :  { %v2374_v4 = vadd.f32 %v2373_v40, %v2345_v6  ;;  %v2326_v54 = vadd.f32 %v2325_v52, %v2297_v49 }
 0x267   :  { %v2397_v1 = vpop.f32.mrf.mxu2 }
 0x268   :  { %v7660_v2 = vadd.f32 %v2397_v1, %v2369_v60 }
 0x26a   :  { %v2346_v30 = vpop.f32.mrf.mxu0  ;;  %v6381_v60 = vpop.eup %6380 }
 0x26b   :  { %v2375_v31 = vpop.f32.mrf.mxu1  ;;  %v2347_v19 = vadd.f32 %v2346_v30, %v2318_v37  ;;  %v2327_v14 = vpop.f32.mrf.mxu3  ;;  %v2431_v62 = vmul.f32 64.0, %v6381_v60  ;;  %vm2435_vm0 = vweird.f32 %v6381_v60 }
 0x26d   :  { %v2376_v23 = vadd.f32 %v2375_v31, %v2347_v19 }
 0x26f   :  { %v2399_v48 = vpop.f32.mrf.mxu2 }
 0x270   :  { %v7658_v57 = vadd.f32 %v2399_v48, %v2371_v8  ;;  %v2328_v8 = vadd.f32 %v2327_v14, %v2299_v58  ;;  %v6372_v14 = vld [vmem:[%s7743_s4] ss:$0 sm:$0xff] }
 0x272   :  { %v2417_v32 = vadd.f32 %v7658_v57, %v7660_v2  ;;  %v2349_v25 = vpop.f32.mrf.mxu0 }
 0x273   :  { %v2378_v33 = vpop.f32.mrf.mxu1  ;;  %v2350_v10 = vadd.f32 %v2349_v25, %v2321_v24 }
 0x275   :  { %v2379_v47 = vadd.f32 %v2378_v33, %v2350_v10 }
 0x277   :  { %v2402_v44 = vpop.f32.mrf.mxu2 }
 0x278   :  { %v7664_v53 = vadd.f32 %v2402_v44, %v2374_v4 }
 0x27a   :  { %v2418_v11 = vadd.f32 %v2417_v32, %v7664_v53  ;;  %v2351_v17 = vpop.f32.mrf.mxu0  ;;  %v2432_v32 = vsub.f32 1.0, %v2431_v62 }
 0x27b   :  { %v2380_v1 = vpop.f32.mrf.mxu1  ;;  %v2352_v26 = vadd.f32 %v2351_v17, %v2323_v46 }
 0x27d   :  { %v2381_v43 = vadd.f32 %v2380_v1, %v2352_v26 }
 0x27f   :  { %v2404_v36 = vpop.f32.mrf.mxu2 }
 0x280   :  { %v2405_v56 = vadd.f32 %v2404_v36, %v2376_v23 }
 0x282   :  { %v2419_v20 = vadd.f32 %v2418_v11, %v2405_v56  ;;  %v2354_v5 = vpop.f32.mrf.mxu0  ;;  %v2433_v11 = vmul.f32 %v6381_v60, %v2432_v32 }
 0x283   :  { %v2355_v30 = vadd.f32 %v2354_v5, %v2326_v54  ;;  %v2383_v48 = vpop.f32.mrf.mxu1 }
 0x284   :  { %v2434_v19 = vadd.f32 %v6381_v60, %v2433_v11 }
 0x285   :  { %v2384_v50 = vadd.f32 %v2383_v48, %v2355_v30 }
 0x286   :  { %v2436_v21 = vsel %vm2435_vm0, %v6381_v60, %v2434_v19 }
 0x287   :  { %v2407_v9 = vpop.f32.mrf.mxu2 }
 0x288   :  { %v2408_v15 = vadd.f32 %v2407_v9, %v2379_v47 }
 0x28a   :  { %v2420_v40 = vadd.f32 %v2419_v20, %v2408_v15  ;;  %v2356_v16 = vpop.f32.mrf.mxu0 }
 0x28b   :  { %v2357_v31 = vadd.f32 %v2356_v16, %v2328_v8  ;;  %v2385_v4 = vpop.f32.mrf.mxu1 }
 0x28d   :  { %v2386_v44 = vadd.f32 %v2385_v4, %v2357_v31 }
 0x28f   :  { %v2409_v59 = vpop.f32.mrf.mxu2 }
 0x290   :  { %v2410_v38 = vadd.f32 %v2409_v59, %v2381_v43 }
 0x292   :  { %v2421_v6 = vadd.f32 %v2420_v40, %v2410_v38 }
 0x297   :  { %v2412_v22 = vpop.f32.mrf.mxu2 }
 0x298   :  { %v2413_v45 = vadd.f32 %v2412_v22, %v2384_v50 }
 0x29a   :  { %v2422_v27 = vadd.f32 %v2421_v6, %v2413_v45 }
 0x29f   :  { %v2414_v18 = vpop.f32.mrf.mxu2 }
 0x2a0   :  { %v2415_v34 = vadd.f32 %v2414_v18, %v2386_v44 }
 0x2a2   :  { %v2423_v28 = vadd.f32 %v2422_v27, %v2415_v34 }
 0x2a4   :  { %v2424_v25 = vrot.slane %v2423_v28, 4 }
 0x2a6   :  { %v2425_v29 = vadd.f32 %v2424_v25, %v2423_v28 }
 0x2a8   :  { %v2426_v37 = vrot.slane %v2425_v29, 2 }
 0x2aa   :  { %v2427_v33 = vadd.f32 %v2426_v37, %v2425_v29 }
 0x2ac   :  { %v2428_v36 = vrot.slane %v2427_v33, 1 }
 0x2ae   :  { %v2429_v61 = vadd.f32 %v2428_v36, %v2427_v33 }
 0x2b0   :  { %v2437_v24 = vmul.f32 %v2436_v21, %v2429_v61 }
 0x2b2   :  { %v2438_v41 = vsub.f32 %v7660_v2, %v2437_v24  ;;  %v2439_v42 = vsub.f32 %v7658_v57, %v2437_v24  ;;  %v2440_v23 = vsub.f32 %v7664_v53, %v2437_v24  ;;  %v2442_v10 = vsub.f32 %v2408_v15, %v2437_v24 }
 0x2b3   :  { %v2444_v17 = vsub.f32 %v2413_v45, %v2437_v24  ;;  %v2441_v55 = vsub.f32 %v2405_v56, %v2437_v24  ;;  %v2443_v7 = vsub.f32 %v2410_v38, %v2437_v24  ;;  %v2445_v40 = vsub.f32 %v2415_v34, %v2437_v24  ;;  %v6373_v45 = vld [vmem:[%s7744_s5] ss:$0 sm:$0xff] }
 0x2b4   :  { %v2446_v39 = vmul.f32 %v2438_v41, %v2438_v41  ;;  %v2447_v0 = vmul.f32 %v2439_v42, %v2439_v42  ;;  %v2448_v47 = vmul.f32 %v2440_v23, %v2440_v23  ;;  %v2450_v1 = vmul.f32 %v2442_v10, %v2442_v10 }
 0x2b5   :  { %v2449_v35 = vmul.f32 %v2441_v55, %v2441_v55  ;;  %v2451_v51 = vmul.f32 %v2443_v7, %v2443_v7  ;;  %v2452_v2 = vmul.f32 %v2444_v17, %v2444_v17  ;;  %v2453_v57 = vmul.f32 %v2445_v40, %v2445_v40 }
 0x2b6   :  { %v2454_v9 = vadd.f32 %v2447_v0, %v2446_v39 }
 0x2b8   :  { %v2455_v20 = vadd.f32 %v2454_v9, %v2448_v47 }
 0x2ba   :  { %v2456_v13 = vadd.f32 %v2455_v20, %v2449_v35 }
 0x2bc   :  { %v2457_v46 = vadd.f32 %v2456_v13, %v2450_v1 }
 0x2be   :  { %v2458_v49 = vadd.f32 %v2457_v46, %v2451_v51 }
 0x2c0   :  { %v2459_v52 = vadd.f32 %v2458_v49, %v2452_v2 }
 0x2c2   :  { %v2460_v53 = vadd.f32 %v2459_v52, %v2453_v57  ;;  %v6182_v57 = vld [vmem:[#allocation5] sm:$0xff]  ;;  %v6183_v52 = vld [vmem:[#allocation5 + $0x8] sm:$0xff] }
 0x2c4   :  { %v2461_v15 = vrot.slane %v2460_v53, 4 }
 0x2c6   :  { %v2462_v5 = vadd.f32 %v2461_v15, %v2460_v53  ;;  %v6188_v53 = vld [vmem:[#allocation5 + $0x30] sm:$0xff]  ;;  %v6187_v15 = vld [vmem:[#allocation5 + $0x28] sm:$0xff] }
 0x2c8   :  { %v2463_v56 = vrot.slane %v2462_v5, 2 }
 0x2ca   :  { %v2464_v3 = vadd.f32 %v2463_v56, %v2462_v5  ;;  %v6184_v5 = vld [vmem:[#allocation5 + $0x10] sm:$0xff]  ;;  %v6185_v56 = vld [vmem:[#allocation5 + $0x18] sm:$0xff] }
 0x2cc   :  { %v2465_v26 = vrot.slane %v2464_v3, 1 }
 0x2ce   :  { %v2466_v59 = vadd.f32 %v2465_v26, %v2464_v3  ;;  %v6190_v3 = vld [vmem:[#allocation5 + $0x40] sm:$0xff] }
 0x2cf   :  { %v6186_v26 = vld [vmem:[#allocation5 + $0x20] sm:$0xff] }
 0x2d0   :  { %v2467_v54 = vmul.f32 %v2466_v59, %v2436_v21  ;;  %v6189_v59 = vld [vmem:[#allocation5 + $0x38] sm:$0xff] }
 0x2d2   :  { %v2468_v12 = vadd.f32 1e-05, %v2467_v54  ;;  %v6198_v54 = vld [vmem:[#allocation7 + $0x38] sm:$0xff] }
 0x2d4   :  { %6382 = vrsqrt.f32 %v2468_v12  ;;  %vm2475_vm2 = vweird.f32 %v2468_v12 }
 0x2da   :  { %v6383_v43 = vpop.eup %6382 }
 0x2db   :  { %v2470_v30 = vmul.f32 %v6383_v43, %v2468_v12  ;;  %vm2476_vm1 = vweird.f32 %v6383_v43  ;;  %v6197_v12 = vld [vmem:[#allocation7 + $0x30] sm:$0xff] }
 0x2dc   :  { %vm2477_vm3 = vmor %vm2475_vm2, %vm2476_vm1 }
 0x2dd   :  { %v2471_v48 = vmul.f32 %v6383_v43, %v2470_v30  ;;  %v6195_v30 = vld [vmem:[#allocation7 + $0x20] sm:$0xff] }
 0x2df   :  { %v2472_v58 = vmul.f32 0.5, %v2471_v48  ;;  %v6206_v48 = vld [vmem:[#allocation7 + $0x78] sm:$0xff] }
 0x2e1   :  { %v2473_v38 = vsub.f32 1.5, %v2472_v58  ;;  %v6194_v58 = vld [vmem:[#allocation7 + $0x18] sm:$0xff] }
 0x2e3   :  { %v2474_v63 = vmul.f32 %v6383_v43, %v2473_v38  ;;  %v6205_v38 = vld [vmem:[#allocation7 + $0x70] sm:$0xff] }
 0x2e5   :  { %v2478_v50 = vsel %vm2477_vm3, %v6383_v43, %v2474_v63  ;;  %v6196_v43 = vld [vmem:[#allocation7 + $0x28] sm:$0xff]  ;;  %v6193_v63 = vld [vmem:[#allocation7 + $0x10] sm:$0xff]  ;;  %vm3602_vm3 = vcmask 130048  }
 0x2e6   :  { %v2479_v16 = vmul.f32 %v2478_v50, %v2438_v41  ;;  %v2480_v22 = vmul.f32 %v2478_v50, %v2439_v42  ;;  %v2481_v8 = vmul.f32 %v2478_v50, %v2440_v23  ;;  %v2482_v6 = vmul.f32 %v2478_v50, %v2441_v55 }
 0x2e7   :  { %v2483_v60 = vmul.f32 %v2478_v50, %v2442_v10  ;;  %v2484_v31 = vmul.f32 %v2478_v50, %v2443_v7  ;;  %v2485_v27 = vmul.f32 %v2478_v50, %v2444_v17  ;;  %v2486_v4 = vmul.f32 %v2478_v50, %v2445_v40  ;;  %v6192_v50 = vld [vmem:[#allocation7 + $0x8] sm:$0xff] }
 0x2e8   :  { %v2491_v62 = vmul.f32 %v6372_v14, %v2479_v16  ;;  %v2492_v44 = vmul.f32 %v6372_v14, %v2480_v22  ;;  %v2493_v18 = vmul.f32 %v6372_v14, %v2481_v8  ;;  %v2494_v34 = vmul.f32 %v6372_v14, %v2482_v6  ;;  %v6214_v16 = vld [vmem:[#allocation7 + $0xb8] sm:$0xff]  ;;  %v6203_v22 = vld [vmem:[#allocation7 + $0x60] sm:$0xff]  ;;  %v6213_v6 = vld [vmem:[#allocation7 + $0xb0] sm:$0xff] }
 0x2e9   :  { %v2495_v32 = vmul.f32 %v6372_v14, %v2483_v60  ;;  %v2496_v28 = vmul.f32 %v6372_v14, %v2484_v31  ;;  %v2497_v25 = vmul.f32 %v6372_v14, %v2485_v27  ;;  %v2498_v11 = vmul.f32 %v6372_v14, %v2486_v4  ;;  %v6204_v14 = vld [vmem:[#allocation7 + $0x68] sm:$0xff]  ;;  %v6191_v8 = vld [vmem:[#allocation7] sm:$0xff]  ;;  %v6201_v31 = vld [vmem:[#allocation7 + $0x50] sm:$0xff] }
 0x2ea   :  { %v2503_v29 = vadd.f32 %v6373_v45, %v2491_v62  ;;  %v2504_v37 = vadd.f32 %v6373_v45, %v2492_v44  ;;  %v2505_v19 = vadd.f32 %v6373_v45, %v2493_v18  ;;  %v2506_v33 = vadd.f32 %v6373_v45, %v2494_v34  ;;  %v6212_v60 = vld [vmem:[#allocation7 + $0xa8] sm:$0xff]  ;;  %v6211_v27 = vld [vmem:[#allocation7 + $0xa0] sm:$0xff]  ;;  %v6210_v62 = vld [vmem:[#allocation7 + $0x98] sm:$0xff] }
 0x2eb   :  { %v2507_v36 = vadd.f32 %v6373_v45, %v2495_v32  ;;  %v2508_v21 = vadd.f32 %v6373_v45, %v2496_v28  ;;  %v2509_v61 = vadd.f32 %v6373_v45, %v2497_v25  ;;  %v2510_v24 = vadd.f32 %v6373_v45, %v2498_v11  ;;  %v6202_v45 = vld [vmem:[#allocation7 + $0x58] sm:$0xff]  ;;  %v6200_v4 = vld [vmem:[#allocation7 + $0x48] sm:$0xff]  ;;  %v6199_v44 = vld [vmem:[#allocation7 + $0x40] sm:$0xff] }
 0x2ec   :  { %vm2511_vm4 = vcmp.ge.f32.partialorder %v2503_v29, 0.0  ;;  %vm2512_vm5 = vcmp.ge.f32.partialorder %v2504_v37, 0.0  ;;  %vm2513_vm6 = vcmp.ge.f32.partialorder %v2505_v19, 0.0  ;;  %vm2514_vm7 = vcmp.ge.f32.partialorder %v2506_v33, 0.0  ;;  %v6209_v18 = vld [vmem:[#allocation7 + $0x90] sm:$0xff]  ;;  %v6222_v32 = vld [vmem:[#allocation7 + $0xf8] sm:$0xff] }
 0x2ed   :  { %vm2515_vm8 = vcmp.ge.f32.partialorder %v2507_v36, 0.0  ;;  %vm2516_vm9 = vcmp.ge.f32.partialorder %v2508_v21, 0.0  ;;  %vm2517_vm10 = vcmp.ge.f32.partialorder %v2509_v61, 0.0  ;;  %vm2518_vm11 = vcmp.ge.f32.partialorder %v2510_v24, 0.0  ;;  %v6230_v28 = vld [vmem:[#allocation7 + $0x138] sm:$0xff]  ;;  %v6208_v25 = vld [vmem:[#allocation7 + $0x88] sm:$0xff] }
 0x2ee   :  { %v2519_v41 = vmul.f32 0.01, %v2503_v29  ;;  %v2520_v42 = vmul.f32 0.01, %v2504_v37  ;;  %v2521_v23 = vmul.f32 0.01, %v2505_v19 }
 0x2ef   :  { %v2522_v10 = vmul.f32 0.01, %v2506_v33  ;;  %v2523_v17 = vmul.f32 0.01, %v2507_v36  ;;  %v2524_v55 = vmul.f32 0.01, %v2508_v21 }
 0x2f0   :  { %v2525_v39 = vmul.f32 0.01, %v2509_v61  ;;  %v2526_v0 = vmul.f32 0.01, %v2510_v24  ;;  %v2527_v47 = vsel %vm2511_vm4, %v2503_v29, %v2519_v41  ;;  %v2528_v9 = vsel %vm2512_vm5, %v2504_v37, %v2520_v42  ;;  %v6221_v11 = vld [vmem:[#allocation7 + $0xf0] sm:$0xff]  ;;  %v6238_v29 = vld [vmem:[#allocation7 + $0x178] sm:$0xff] }
 0x2f1   :  { %v2529_v7 = vsel %vm2513_vm6, %v2505_v19, %v2521_v23  ;;  %v2530_v35 = vsel %vm2514_vm7, %v2506_v33, %v2522_v10  ;;  %v2531_v20 = vsel %vm2515_vm8, %v2507_v36, %v2523_v17  ;;  %v2532_v1 = vsel %vm2516_vm9, %v2508_v21, %v2524_v55  ;;  %v6229_v19 = vld [vmem:[#allocation7 + $0x130] sm:$0xff]  ;;  %v6207_v33 = vld [vmem:[#allocation7 + $0x80] sm:$0xff]  ;;  %v6220_v21 = vld [vmem:[#allocation7 + $0xe8] sm:$0xff] }
 0x2f2   :  { %v2533_v13 = vsel %vm2517_vm10, %v2509_v61, %v2525_v39  ;;  %v2534_v40 = vsel %vm2518_vm11, %v2510_v24, %v2526_v0  ;;  %v2535_v51 = vpack.c.bf16 %v2528_v9, %v2527_v47  ;;  %v2536_v46 = vpack.c.bf16 %v2530_v35, %v2529_v7  ;;  %v6246_v61 = vld [vmem:[#allocation7 + $0x1b8] sm:$0xff]  ;;  %v6237_v41 = vld [vmem:[#allocation7 + $0x170] sm:$0xff]  ;;  %v6228_v10 = vld [vmem:[#allocation7 + $0x128] sm:$0xff] }
 0x2f3   :  { %v2537_v2 = vpack.c.bf16 %v2532_v1, %v2531_v20  ;;  %v2538_v49 = vpack.c.bf16 %v2534_v40, %v2533_v13  ;;  %v6219_v17 = vld [vmem:[#allocation7 + $0xe0] sm:$0xff]  ;;  %v6245_v55 = vld [vmem:[#allocation7 + $0x1b0] sm:$0xff]  ;;  %v6236_v0 = vld [vmem:[#allocation7 + $0x168] sm:$0xff]  ;;  %vm4469_vm4 = vcmask 1043456  }
 0x2f4   :  { %v6227_v47 = vld [vmem:[#allocation7 + $0x120] sm:$0xff]  ;;  %v6218_v9 = vld [vmem:[#allocation7 + $0xd8] sm:$0xff]  ;;  %v6244_v7 = vld [vmem:[#allocation7 + $0x1a8] sm:$0xff] }
 0x2f5   :  { %2554 = vmatpush.bf16.msra.mxu3 %v2538_v49  ;;  %2689 = vmatpush.bf16.msrb.mxu1 %v2538_v49  ;;  %v6235_v20 = vld [vmem:[#allocation7 + $0x160] sm:$0xff]  ;;  %v6226_v1 = vld [vmem:[#allocation7 + $0x118] sm:$0xff]  ;;  %v6217_v13 = vld [vmem:[#allocation7 + $0xd0] sm:$0xff] }
 0x2f6   :  { %2716 = vmatpush.bf16.msrb.mxu2 %v2538_v49  ;;  %2770 = vmatpush.bf16.msrb.mxu0 %v2538_v49  ;;  %v6243_v40 = vld [vmem:[#allocation7 + $0x1a0] sm:$0xff] }
 0x2f9   :  { %2555 = vmatpush.bf16.msra.mxu3 %v2537_v2  ;;  %2690 = vmatpush.bf16.msrb.mxu1 %v2537_v2 }
 0x2fa   :  { %2717 = vmatpush.bf16.msrb.mxu2 %v2537_v2  ;;  %2771 = vmatpush.bf16.msrb.mxu0 %v2537_v2 }
 0x2fd   :  { %2556 = vmatpush.bf16.msra.mxu3 %v2536_v46  ;;  %2691 = vmatpush.bf16.msrb.mxu1 %v2536_v46 }
 0x2fe   :  { %2718 = vmatpush.bf16.msrb.mxu2 %v2536_v46  ;;  %2772 = vmatpush.bf16.msrb.mxu0 %v2536_v46 }
 0x301   :  { %2557 = vmatpush.bf16.msra.mxu3 %v2535_v51  ;;  %2692 = vmatpush.bf16.msrb.mxu1 %v2535_v51 }
 0x302   :  { %2719 = vmatpush.bf16.msrb.mxu2 %v2535_v51  ;;  %2773 = vmatpush.bf16.msrb.mxu0 %v2535_v51 }
 0x304   :  { %5332 = vmatmul.msk.bf16.vlgmr.msra.gmra.mxu3 %vm2546_vm12, %v6182_v57  ;;  %5357 = vmatmul.msk.bf16.vlgmr.msrb.gmra.mxu1 %vm2546_vm12, %v6187_v15 }
 0x305   :  { %2581 = vmatpush.bf16.msrb.mxu3 %v2538_v49  ;;  %5362 = vmatmul.msk.bf16.vlgmr.msrb.gmra.mxu2 %vm2546_vm12, %v6188_v53 }
 0x306   :  { %5372 = vmatmul.msk.bf16.vlgmr.msrb.gmra.mxu0 %vm2546_vm12, %v6190_v3  ;;  %3416 = vmatpush.bf16.msra.mxu1 %v6198_v54  ;;  %v6241_v54 = vld [vmem:[#allocation7 + $0x190] sm:$0xff] }
 0x307   :  { %3430 = vmatpush.bf16.msra.mxu2 %v6206_v48  ;;  %3458 = vmatpush.bf16.msra.mxu0 %v6222_v32  ;;  %v6254_v48 = vld [vmem:[#allocation7 + $0x1f8] sm:$0xff] }
 0x309   :  { %2582 = vmatpush.bf16.msrb.mxu3 %v2537_v2 }
 0x30a   :  { %3417 = vmatpush.bf16.msra.mxu1 %v6197_v12 }
 0x30b   :  { %3431 = vmatpush.bf16.msra.mxu2 %v6205_v38  ;;  %3459 = vmatpush.bf16.msra.mxu0 %v6221_v11  ;;  %v6240_v38 = vld [vmem:[#allocation7 + $0x188] sm:$0xff]  ;;  %v6251_v11 = vld [vmem:[#allocation7 + $0x1e0] sm:$0xff] }
 0x30d   :  { %2583 = vmatpush.bf16.msrb.mxu3 %v2536_v46 }
 0x30e   :  { %3418 = vmatpush.bf16.msra.mxu1 %v6196_v43  ;;  %v6232_v43 = vld [vmem:[#allocation7 + $0x148] sm:$0xff] }
 0x30f   :  { %3432 = vmatpush.bf16.msra.mxu2 %v6204_v14  ;;  %3460 = vmatpush.bf16.msra.mxu0 %v6220_v21 }
 0x311   :  { %2584 = vmatpush.bf16.msrb.mxu3 %v2535_v51 }
 0x312   :  { %3419 = vmatpush.bf16.msra.mxu1 %v6195_v30  ;;  %v6223_v30 = vld [vmem:[#allocation7 + $0x100] sm:$0xff] }
 0x313   :  { %3433 = vmatpush.bf16.msra.mxu2 %v6203_v22  ;;  %3461 = vmatpush.bf16.msra.mxu0 %v6219_v17 }
 0x314   :  { %5337 = vmatmul.msk.bf16.vlgmr.msrb.gmra.mxu3 %vm2546_vm12, %v6183_v52  ;;  %v6242_v52 = vld [vmem:[#allocation7 + $0x198] sm:$0xff] }
 0x315   :  { %2608 = vmatpush.bf16.msra.mxu3 %v2538_v49 }
 0x316   :  { %3420 = vmatpush.bf16.msra.mxu1 %v6194_v58  ;;  %v6262_v58 = vld [vmem:[#allocation7 + $0x238] sm:$0xff] }
 0x317   :  { %3434 = vmatpush.bf16.msra.mxu2 %v6202_v45  ;;  %3462 = vmatpush.bf16.msra.mxu0 %v6218_v9  ;;  %v6239_v45 = vld [vmem:[#allocation7 + $0x180] sm:$0xff] }
 0x319   :  { %2609 = vmatpush.bf16.msra.mxu3 %v2537_v2 }
 0x31a   :  { %3421 = vmatpush.bf16.msra.mxu1 %v6193_v63 }
 0x31b   :  { %3435 = vmatpush.bf16.msra.mxu2 %v6201_v31  ;;  %3463 = vmatpush.bf16.msra.mxu0 %v6217_v13 }
 0x31d   :  { %2610 = vmatpush.bf16.msra.mxu3 %v2536_v46 }
 0x31e   :  { %3422 = vmatpush.bf16.msra.mxu1 %v6192_v50  ;;  %v6231_v50 = vld [vmem:[#allocation7 + $0x140] sm:$0xff] }
 0x31f   :  { %3436 = vmatpush.bf16.msra.mxu2 %v6200_v4 }
 0x321   :  { %2611 = vmatpush.bf16.msra.mxu3 %v2535_v51 }
 0x322   :  { %3423 = vmatpush.bf16.msra.mxu1 %v6191_v8  ;;  %v6253_v8 = vld [vmem:[#allocation7 + $0x1f0] sm:$0xff] }
 0x323   :  { %3437 = vmatpush.bf16.msra.mxu2 %v6199_v44  ;;  %v6260_v44 = vld [vmem:[#allocation7 + $0x228] sm:$0xff] }
 0x324   :  { %5342 = vmatmul.msk.bf16.vlgmr.msra.gmra.mxu3 %vm2546_vm12, %v6184_v5  ;;  %v6233_v5 = vld [vmem:[#allocation7 + $0x150] sm:$0xff] }
 0x325   :  { %2635 = vmatpush.bf16.msrb.mxu3 %v2538_v49 }
 0x326   :  { %3472 = vmatpush.bf16.msrb.mxu1 %v6230_v28 }
 0x327   :  { %3486 = vmatpush.bf16.msrb.mxu2 %v6238_v29  ;;  %v6259_v29 = vld [vmem:[#allocation7 + $0x220] sm:$0xff] }
 0x329   :  { %2636 = vmatpush.bf16.msrb.mxu3 %v2537_v2 }
 0x32a   :  { %3473 = vmatpush.bf16.msrb.mxu1 %v6229_v19  ;;  %v6250_v19 = vld [vmem:[#allocation7 + $0x1d8] sm:$0xff] }
 0x32b   :  { %3487 = vmatpush.bf16.msrb.mxu2 %v6237_v41  ;;  %v6249_v41 = vld [vmem:[#allocation7 + $0x1d0] sm:$0xff] }
 0x32d   :  { %2637 = vmatpush.bf16.msrb.mxu3 %v2536_v46 }
 0x32e   :  { %3474 = vmatpush.bf16.msrb.mxu1 %v6228_v10 }
 0x32f   :  { %3488 = vmatpush.bf16.msrb.mxu2 %v6236_v0 }
 0x331   :  { %2638 = vmatpush.bf16.msrb.mxu3 %v2535_v51 }
 0x332   :  { %3475 = vmatpush.bf16.msrb.mxu1 %v6227_v47 }
 0x333   :  { %3489 = vmatpush.bf16.msrb.mxu2 %v6235_v20  ;;  %v6247_v20 = vld [vmem:[#allocation7 + $0x1c0] sm:$0xff] }
 0x334   :  { %5347 = vmatmul.msk.bf16.vlgmr.msrb.gmra.mxu3 %vm2546_vm12, %v6185_v56  ;;  %v6224_v56 = vld [vmem:[#allocation7 + $0x108] sm:$0xff] }
 0x335   :  { %2662 = vmatpush.bf16.msra.mxu3 %v2538_v49 }
 0x336   :  { %3476 = vmatpush.bf16.msrb.mxu1 %v6226_v1  ;;  %v6255_v1 = vld [vmem:[#allocation7 + $0x200] sm:$0xff] }
 0x339   :  { %2663 = vmatpush.bf16.msra.mxu3 %v2537_v2 }
 0x33d   :  { %2664 = vmatpush.bf16.msra.mxu3 %v2536_v46 }
 0x341   :  { %2665 = vmatpush.bf16.msra.mxu3 %v2535_v51 }
 0x344   :  { %5352 = vmatmul.msk.bf16.vlgmr.msra.gmra.mxu3 %vm2546_vm12, %v6186_v26 }
 0x345   :  { %2743 = vmatpush.bf16.msrb.mxu3 %v2538_v49  ;;  %v6216_v49 = vld [vmem:[#allocation7 + $0xc8] sm:$0xff] }
 0x346   :  { %3464 = vmatpush.bf16.msra.mxu0 %v6216_v49 }
 0x349   :  { %2744 = vmatpush.bf16.msrb.mxu3 %v2537_v2 }
 0x34d   :  { %2745 = vmatpush.bf16.msrb.mxu3 %v2536_v46  ;;  %v6225_v46 = vld [vmem:[#allocation7 + $0x110] sm:$0xff] }
 0x34e   :  { %3477 = vmatpush.bf16.msrb.mxu1 %v6225_v46 }
 0x351   :  { %2746 = vmatpush.bf16.msrb.mxu3 %v2535_v51  ;;  %v6234_v51 = vld [vmem:[#allocation7 + $0x158] sm:$0xff] }
 0x352   :  { %3490 = vmatpush.bf16.msrb.mxu2 %v6234_v51  ;;  %3478 = vmatpush.bf16.msrb.mxu1 %v6224_v56 }
 0x354   :  { %5367 = vmatmul.msk.bf16.vlgmr.msrb.gmra.mxu3 %vm2546_vm12, %v6189_v59  ;;  %v6215_v59 = vld [vmem:[#allocation7 + $0xc0] sm:$0xff] }
 0x355   :  { %3444 = vmatpush.bf16.msra.mxu3 %v6214_v16  ;;  %3465 = vmatpush.bf16.msra.mxu0 %v6215_v59 }
 0x356   :  { %3491 = vmatpush.bf16.msrb.mxu2 %v6233_v5  ;;  %3479 = vmatpush.bf16.msrb.mxu1 %v6223_v30 }
 0x359   :  { %3445 = vmatpush.bf16.msra.mxu3 %v6213_v6  ;;  %3514 = vmatpush.bf16.msrb.mxu0 %v6254_v48  ;;  %v6261_v6 = vld [vmem:[#allocation7 + $0x230] sm:$0xff] }
 0x35a   :  { %3492 = vmatpush.bf16.msrb.mxu2 %v6232_v43 }
 0x35d   :  { %3446 = vmatpush.bf16.msra.mxu3 %v6212_v60  ;;  %3515 = vmatpush.bf16.msrb.mxu0 %v6253_v8 }
 0x35e   :  { %3493 = vmatpush.bf16.msrb.mxu2 %v6231_v50 }
 0x361   :  { %3447 = vmatpush.bf16.msra.mxu3 %v6211_v27 }
 0x365   :  { %3448 = vmatpush.bf16.msra.mxu3 %v6210_v62  ;;  %v6252_v62 = vld [vmem:[#allocation7 + $0x1e8] sm:$0xff] }
 0x366   :  { %3516 = vmatpush.bf16.msrb.mxu0 %v6252_v62 }
 0x369   :  { %3449 = vmatpush.bf16.msra.mxu3 %v6209_v18 }
 0x36a   :  { %3517 = vmatpush.bf16.msrb.mxu0 %v6251_v11 }
 0x36d   :  { %3450 = vmatpush.bf16.msra.mxu3 %v6208_v25 }
 0x36e   :  { %3518 = vmatpush.bf16.msrb.mxu0 %v6250_v19 }
 0x371   :  { %3451 = vmatpush.bf16.msra.mxu3 %v6207_v33  ;;  %v6258_v33 = vld [vmem:[#allocation7 + $0x218] sm:$0xff] }
 0x372   :  { %3519 = vmatpush.bf16.msrb.mxu0 %v6249_v41 }
 0x375   :  { %3500 = vmatpush.bf16.msrb.mxu3 %v6246_v61 }
 0x379   :  { %3501 = vmatpush.bf16.msrb.mxu3 %v6245_v55  ;;  %v6248_v55 = vld [vmem:[#allocation7 + $0x1c8] sm:$0xff] }
 0x37a   :  { %3520 = vmatpush.bf16.msrb.mxu0 %v6248_v55 }
 0x37d   :  { %3502 = vmatpush.bf16.msrb.mxu3 %v6244_v7 }
 0x37e   :  { %3521 = vmatpush.bf16.msrb.mxu0 %v6247_v20 }
 0x381   :  { %3503 = vmatpush.bf16.msrb.mxu3 %v6243_v40  ;;  %v2694_v57 = vpop.f32.mrf.mxu1 }
 0x382   :  { %v2699_v16 = vpack.c.bf16 %v2694_v57, %v2694_v57 }
 0x384   :  { %v2814_v27 = vunpack.c.l.b16 %v2699_v16 }
 0x385   :  { %3504 = vmatpush.bf16.msrb.mxu3 %v6242_v52 }
 0x387   :  { %v2559_v34 = vpop.f32.mrf.mxu3 }
 0x388   :  { %v2564_v37 = vpack.c.bf16 %v2559_v34, %v2559_v34  ;;  %v2721_v60 = vpop.f32.mrf.mxu2 }
 0x389   :  { %3505 = vmatpush.bf16.msrb.mxu3 %v6241_v54  ;;  %v2696_v14 = vpop.f32.mrf.mxu1  ;;  %v2726_v61 = vpack.c.bf16 %v2721_v60, %v2721_v60 }
 0x38a   :  { %v2784_v42 = vunpack.c.l.b16 %v2564_v37  ;;  %v2700_v22 = vpack.c.bf16 %v2696_v14, %v2696_v14 }
 0x38b   :  { %v2820_v10 = vunpack.c.l.b16 %v2726_v61 }
 0x38c   :  { %v2815_v4 = vunpack.c.l.b16 %v2700_v22 }
 0x38d   :  { %3506 = vmatpush.bf16.msrb.mxu3 %v6240_v38 }
 0x38e   :  { %v2816_v25 = vpack.c.b16 %v2815_v4, %v2814_v27 }
 0x38f   :  { %v2561_v36 = vpop.f32.mrf.mxu3 }
 0x390   :  { %v2565_v24 = vpack.c.bf16 %v2561_v36, %v2561_v36  ;;  %v2723_v21 = vpop.f32.mrf.mxu2 }
 0x391   :  { %3507 = vmatpush.bf16.msrb.mxu3 %v6239_v45  ;;  %v6374_v45 = vld [vmem:[#allocation8] ss:$0 sm:$0xff] }
 0x392   :  { %v2785_v23 = vunpack.c.l.b16 %v2565_v24  ;;  %v2727_v24 = vpack.c.bf16 %v2723_v21, %v2723_v21 }
 0x394   :  { %v2786_v39 = vpack.c.b16 %v2785_v23, %v2784_v42  ;;  %v6257_v42 = vld [vmem:[#allocation7 + $0x210] sm:$0xff]  ;;  %v2821_v17 = vunpack.c.l.b16 %v2727_v24 }
 0x396   :  { %3424 = vmatmul.bf16.vlgmr.msra.gmra.mxu1 %v2786_v39  ;;  %v6256_v39 = vld [vmem:[#allocation7 + $0x208] sm:$0xff] }
 0x397   :  { %v2586_v35 = vpop.f32.mrf.mxu3  ;;  %3528 = vmatpush.bf16.msra.mxu1 %v6262_v58 }
 0x398   :  { %v2591_v2 = vpack.c.bf16 %v2586_v35, %v2586_v35  ;;  %v2822_v35 = vpack.c.b16 %v2821_v17, %v2820_v10 }
 0x39a   :  { %v2790_v3 = vunpack.c.l.b16 %v2591_v2  ;;  %v2775_v2 = vpop.f32.mrf.mxu0 }
 0x39b   :  { %3529 = vmatpush.bf16.msra.mxu1 %v6261_v6  ;;  %v2780_v56 = vpack.c.bf16 %v2775_v2, %v2775_v2 }
 0x39d   :  { %v2832_v54 = vunpack.c.l.b16 %v2780_v56 }
 0x39f   :  { %v2588_v53 = vpop.f32.mrf.mxu3  ;;  %3530 = vmatpush.bf16.msra.mxu1 %v6260_v44 }
 0x3a0   :  { %v2592_v15 = vpack.c.bf16 %v2588_v53, %v2588_v53 }
 0x3a2   :  { %v2791_v26 = vunpack.c.l.b16 %v2592_v15  ;;  %v2777_v5 = vpop.f32.mrf.mxu0 }
 0x3a3   :  { %3531 = vmatpush.bf16.msra.mxu1 %v6259_v29 }
 0x3a4   :  { %v2792_v12 = vpack.c.b16 %v2791_v26, %v2790_v3  ;;  %v2781_v3 = vpack.c.bf16 %v2777_v5, %v2777_v5 }
 0x3a6   :  { %3438 = vmatmul.bf16.vlgmr.msra.gmra.mxu2 %v2792_v12  ;;  %v2833_v43 = vunpack.c.l.b16 %v2781_v3 }
 0x3a7   :  { %v2613_v63 = vpop.f32.mrf.mxu3  ;;  %3532 = vmatpush.bf16.msra.mxu1 %v6258_v33  ;;  %v6686_v33 = vmov 16.0  }
 0x3a8   :  { %v2618_v31 = vpack.c.bf16 %v2613_v63, %v2613_v63  ;;  %v2834_v38 = vpack.c.b16 %v2833_v43, %v2832_v54  ;;  %6384 = vrcp.f32 %v6686_v33  ;;  %v3640_v33 = vld [vmem:[#allocation11 + $0x4] sm:$0x3] }
 0x3aa   :  { %v2796_v32 = vunpack.c.l.b16 %v2618_v31 }
 0x3ab   :  { %3533 = vmatpush.bf16.msra.mxu1 %v6257_v42 }
 0x3ae   :  { %v6385_v42 = vpop.eup %6384 }
 0x3af   :  { %v2615_v18 = vpop.f32.mrf.mxu3  ;;  %3534 = vmatpush.bf16.msra.mxu1 %v6256_v39  ;;  %vm3554_vm13 = vweird.f32 %v6385_v42 }
 0x3b0   :  { %v2619_v34 = vpack.c.bf16 %v2615_v18, %v2615_v18 }
 0x3b2   :  { %v2797_v28 = vunpack.c.l.b16 %v2619_v34 }
 0x3b3   :  { %3535 = vmatpush.bf16.msra.mxu1 %v6255_v1 }
 0x3b4   :  { %v2798_v37 = vpack.c.b16 %v2797_v28, %v2796_v32 }
 0x3b6   :  { %3452 = vmatmul.bf16.vlgmr.msra.gmra.mxu3 %v2798_v37  ;;  %3494 = vmatmul.bf16.vlgmr.msrb.gmra.mxu2 %v2816_v25 }
 0x3b7   :  { %v2640_v36 = vpop.f32.mrf.mxu3 }
 0x3b8   :  { %v2645_v23 = vpack.c.bf16 %v2640_v36, %v2640_v36 }
 0x3ba   :  { %v2802_v9 = vunpack.c.l.b16 %v2645_v23 }
 0x3bf   :  { %v2642_v0 = vpop.f32.mrf.mxu3 }
 0x3c0   :  { %v2646_v47 = vpack.c.bf16 %v2642_v0, %v2642_v0  ;;  %v3550_v0 = vmul.f32 16.0, %v6385_v42 }
 0x3c2   :  { %v2803_v7 = vunpack.c.l.b16 %v2646_v47  ;;  %v3551_v20 = vsub.f32 1.0, %v3550_v0  ;;  %v6294_v0 = vld [vmem:[#allocation13 + $0xf8] sm:$0xff] }
 0x3c4   :  { %v2804_v13 = vpack.c.b16 %v2803_v7, %v2802_v9 }
 0x3c6   :  { %3466 = vmatmul.bf16.vlgmr.msra.gmra.mxu0 %v2804_v13  ;;  %3508 = vmatmul.bf16.vlgmr.msrb.gmra.mxu3 %v2822_v35 }
 0x3c7   :  { %v2667_v40 = vpop.f32.mrf.mxu3 }
 0x3c8   :  { %v2672_v51 = vpack.c.bf16 %v2667_v40, %v2667_v40  ;;  %v3552_v40 = vmul.f32 %v6385_v42, %v3551_v20  ;;  %v6293_v20 = vld [vmem:[#allocation13 + $0xf0] sm:$0xff] }
 0x3ca   :  { %v2808_v57 = vunpack.c.l.b16 %v2672_v51  ;;  %v3553_v2 = vadd.f32 %v6385_v42, %v3552_v40  ;;  %v6284_v40 = vld [vmem:[#allocation13 + $0xa8] sm:$0xff] }
 0x3cf   :  { %v2669_v46 = vpop.f32.mrf.mxu3 }
 0x3d0   :  { %v2673_v49 = vpack.c.bf16 %v2669_v46, %v2669_v46 }
 0x3d2   :  { %v2809_v52 = vunpack.c.l.b16 %v2673_v49 }
 0x3d4   :  { %v2810_v53 = vpack.c.b16 %v2809_v52, %v2808_v57  ;;  %v3555_v52 = vsel %vm3554_vm13, %v6385_v42, %v3553_v2  ;;  %v6268_v42 = vld [vmem:[#allocation13 + $0x28] sm:$0xff]  ;;  %v6273_v2 = vld [vmem:[#allocation13 + $0x50] sm:$0xff] }
 0x3d6   :  { %3480 = vmatmul.bf16.vlgmr.msrb.gmra.mxu1 %v2810_v53 }
 0x3d7   :  { %v2748_v15 = vpop.f32.mrf.mxu3 }
 0x3d8   :  { %v2753_v26 = vpack.c.bf16 %v2748_v15, %v2748_v15 }
 0x3da   :  { %v2826_v30 = vunpack.c.l.b16 %v2753_v26 }
 0x3df   :  { %v2750_v59 = vpop.f32.mrf.mxu3 }
 0x3e0   :  { %v2754_v12 = vpack.c.bf16 %v2750_v59, %v2750_v59 }
 0x3e2   :  { %v2827_v48 = vunpack.c.l.b16 %v2754_v12 }
 0x3e4   :  { %v2828_v58 = vpack.c.b16 %v2827_v48, %v2826_v30 }
 0x3e6   :  { %3522 = vmatmul.bf16.vlgmr.msrb.gmra.mxu0 %v2828_v58  ;;  %3536 = vmatmul.bf16.vlgmr.msra.gmra.mxu1 %v2834_v38 }
 0x413   :  { %v3425_v63 = vpop.f32.mrf.mxu1 }
 0x414   :  { %v3426_v31 = vadd.f32 %v6374_v45, %v3425_v63 }
 0x41b   :  { %v3427_v50 = vpop.f32.mrf.mxu1 }
 0x41c   :  { %v3428_v4 = vadd.f32 %v6374_v45, %v3427_v50  ;;  %v6375_v45 = vld [vmem:[%s7748_s9] ss:$0 sm:$0xff] }
 0x429   :  { %v3439_v14 = vpop.f32.mrf.mxu2 }
 0x42a   :  { %v3440_v27 = vadd.f32 %v3439_v14, %v3426_v31 }
 0x431   :  { %v3441_v8 = vpop.f32.mrf.mxu2 }
 0x432   :  { %v3442_v34 = vadd.f32 %v3441_v8, %v3428_v4  ;;  %v6376_v4 = vld [vmem:[#allocation10] ss:$0 sm:$0xff] }
 0x439   :  { %v3453_v16 = vpop.f32.mrf.mxu3  ;;  %v3495_v62 = vpop.f32.mrf.mxu2 }
 0x43a   :  { %v3454_v32 = vadd.f32 %v3453_v16, %v3440_v27 }
 0x441   :  { %v3455_v60 = vpop.f32.mrf.mxu3  ;;  %v3497_v24 = vpop.f32.mrf.mxu2 }
 0x442   :  { %v3456_v28 = vadd.f32 %v3455_v60, %v3442_v34 }
 0x443   :  { %v3467_v22 = vpop.f32.mrf.mxu0 }
 0x444   :  { %v3468_v25 = vadd.f32 %v3467_v22, %v3454_v32 }
 0x449   :  { %v3509_v11 = vpop.f32.mrf.mxu3 }
 0x44b   :  { %v3469_v44 = vpop.f32.mrf.mxu0 }
 0x44c   :  { %v3470_v29 = vadd.f32 %v3469_v44, %v3456_v28 }
 0x451   :  { %v3511_v10 = vpop.f32.mrf.mxu3 }
 0x453   :  { %v3481_v6 = vpop.f32.mrf.mxu1 }
 0x454   :  { %v3482_v37 = vadd.f32 %v3481_v6, %v3468_v25 }
 0x456   :  { %v3496_v61 = vadd.f32 %v3495_v62, %v3482_v37  ;;  %v3601_v37 = vld [vmem:[#allocation11] sm:$0x3] }
 0x458   :  { %v3510_v23 = vadd.f32 %v3509_v11, %v3496_v61  ;;  %v6269_v61 = vld [vmem:[#allocation13 + $0x30] sm:$0xff] }
 0x45b   :  { %v3483_v18 = vpop.f32.mrf.mxu1 }
 0x45c   :  { %v3484_v19 = vadd.f32 %v3483_v18, %v3470_v29 }
 0x45e   :  { %v3498_v41 = vadd.f32 %v3497_v24, %v3484_v19  ;;  %v3621_v19 = vld [vmem:[#allocation11 + $0x2] sm:$0x3]  ;;  %v6278_v24 = vld [vmem:[#allocation13 + $0x78] sm:$0xff] }
 0x460   :  { %v3512_v17 = vadd.f32 %v3511_v10, %v3498_v41  ;;  %v6277_v41 = vld [vmem:[#allocation13 + $0x70] sm:$0xff]  ;;  %v6267_v10 = vld [vmem:[#allocation13 + $0x20] sm:$0xff] }
 0x463   :  { %v3523_v36 = vpop.f32.mrf.mxu0  ;;  %v3537_v21 = vpop.f32.mrf.mxu1 }
 0x464   :  { %v3524_v55 = vadd.f32 %v3523_v36, %v3510_v23  ;;  %v3716_v36 = vld [vmem:[#allocation11 + $0xc] sm:$0x3]  ;;  %v6276_v23 = vld [vmem:[#allocation13 + $0x68] sm:$0xff] }
 0x466   :  { %v3538_v7 = vadd.f32 %v3537_v21, %v3524_v55  ;;  %v6270_v21 = vld [vmem:[#allocation13 + $0x38] sm:$0xff] }
 0x467   :  { %v6286_v55 = vld [vmem:[#allocation13 + $0xb8] sm:$0xff] }
 0x46b   :  { %v3525_v39 = vpop.f32.mrf.mxu0  ;;  %v3539_v9 = vpop.f32.mrf.mxu1 }
 0x46c   :  { %v3526_v47 = vadd.f32 %v3525_v39, %v3512_v17  ;;  %v3659_v17 = vld [vmem:[#allocation11 + $0x6] sm:$0x3]  ;;  %v3678_v39 = vld [vmem:[#allocation11 + $0x8] sm:$0x3] }
 0x46e   :  { %v3540_v35 = vadd.f32 %v3539_v9, %v3526_v47  ;;  %v3697_v47 = vld [vmem:[#allocation11 + $0xa] sm:$0x3] }
 0x46f   :  { %v6266_v9 = vld [vmem:[#allocation13 + $0x18] sm:$0xff] }
 0x470   :  { %v3542_v1 = vadd.f32 %v3540_v35, %v3538_v7 }
 0x472   :  { %v3543_v13 = vrot.slane %v3542_v1, 4 }
 0x474   :  { %v3544_v51 = vadd.f32 %v3543_v13, %v3542_v1  ;;  %v6265_v1 = vld [vmem:[#allocation13 + $0x10] sm:$0xff]  ;;  %v6274_v13 = vld [vmem:[#allocation13 + $0x58] sm:$0xff] }
 0x476   :  { %v3545_v46 = vrot.slane %v3544_v51, 2 }
 0x478   :  { %v3546_v49 = vadd.f32 %v3545_v46, %v3544_v51  ;;  %v6292_v51 = vld [vmem:[#allocation13 + $0xe8] sm:$0xff] }
 0x479   :  { %v6264_v46 = vld [vmem:[#allocation13 + $0x8] sm:$0xff] }
 0x47a   :  { %v3547_v57 = vrot.slane %v3546_v49, 1 }
 0x47c   :  { %v3548_v53 = vadd.f32 %v3547_v57, %v3546_v49  ;;  %v6283_v49 = vld [vmem:[#allocation13 + $0xa0] sm:$0xff] }
 0x47d   :  { %v6291_v57 = vld [vmem:[#allocation13 + $0xe0] sm:$0xff] }
 0x47e   :  { %v3556_v15 = vmul.f32 %v3555_v52, %v3548_v53  ;;  %v6302_v53 = vld [vmem:[#allocation13 + $0x138] sm:$0xff] }
 0x480   :  { %v3557_v5 = vsub.f32 %v3538_v7, %v3556_v15  ;;  %v3558_v56 = vsub.f32 %v3540_v35, %v3556_v15  ;;  %v6275_v7 = vld [vmem:[#allocation13 + $0x60] sm:$0xff]  ;;  %v6285_v35 = vld [vmem:[#allocation13 + $0xb0] sm:$0xff]  ;;  %v3735_v15 = vld [vmem:[#allocation11 + $0xe] sm:$0x3] }
 0x482   :  { %v3559_v3 = vmul.f32 %v3557_v5, %v3557_v5  ;;  %v3560_v26 = vmul.f32 %v3558_v56, %v3558_v56 }
 0x484   :  { %v3561_v59 = vadd.f32 %v3560_v26, %v3559_v3  ;;  %v6290_v3 = vld [vmem:[#allocation13 + $0xd8] sm:$0xff]  ;;  %v6301_v26 = vld [vmem:[#allocation13 + $0x130] sm:$0xff] }
 0x486   :  { %v3562_v54 = vrot.slane %v3561_v59, 4 }
 0x488   :  { %v3563_v12 = vadd.f32 %v3562_v54, %v3561_v59  ;;  %v6281_v59 = vld [vmem:[#allocation13 + $0x90] sm:$0xff] }
 0x489   :  { %v6289_v54 = vld [vmem:[#allocation13 + $0xd0] sm:$0xff] }
 0x48a   :  { %v3564_v43 = vrot.slane %v3563_v12, 2 }
 0x48c   :  { %v3565_v30 = vadd.f32 %v3564_v43, %v3563_v12  ;;  %v6300_v12 = vld [vmem:[#allocation13 + $0x128] sm:$0xff] }
 0x48d   :  { %v6280_v43 = vld [vmem:[#allocation13 + $0x88] sm:$0xff] }
 0x48e   :  { %v3566_v48 = vrot.slane %v3565_v30, 1 }
 0x490   :  { %v3567_v58 = vadd.f32 %v3566_v48, %v3565_v30  ;;  %v6288_v30 = vld [vmem:[#allocation13 + $0xc8] sm:$0xff]  ;;  %v6299_v48 = vld [vmem:[#allocation13 + $0x120] sm:$0xff] }
 0x492   :  { %v3568_v38 = vmul.f32 %v3567_v58, %v3555_v52  ;;  %v6263_v52 = vld [vmem:[#allocation13] sm:$0xff]  ;;  %v6298_v58 = vld [vmem:[#allocation13 + $0x118] sm:$0xff] }
 0x494   :  { %v3569_v63 = vadd.f32 1e-05, %v3568_v38  ;;  %v6272_v38 = vld [vmem:[#allocation13 + $0x48] sm:$0xff] }
 0x496   :  { %6386 = vrsqrt.f32 %v3569_v63  ;;  %vm3576_vm15 = vweird.f32 %v3569_v63 }
 0x49c   :  { %v6387_v14 = vpop.eup %6386 }
 0x49d   :  { %v3571_v50 = vmul.f32 %v6387_v14, %v3569_v63  ;;  %vm3577_vm14 = vweird.f32 %v6387_v14  ;;  %v6279_v63 = vld [vmem:[#allocation13 + $0x80] sm:$0xff] }
 0x49e   :  { %vm3578_vm0 = vmor %vm3576_vm15, %vm3577_vm14 }
 0x49f   :  { %v3572_v16 = vmul.f32 %v6387_v14, %v3571_v50  ;;  %v6297_v50 = vld [vmem:[#allocation13 + $0x110] sm:$0xff] }
 0x4a1   :  { %v3573_v22 = vmul.f32 0.5, %v3572_v16  ;;  %v6271_v16 = vld [vmem:[#allocation13 + $0x40] sm:$0xff] }
 0x4a3   :  { %v3574_v8 = vsub.f32 1.5, %v3573_v22  ;;  %v6310_v22 = vld [vmem:[#allocation13 + $0x178] sm:$0xff] }
 0x4a5   :  { %v3575_v6 = vmul.f32 %v6387_v14, %v3574_v8  ;;  %v6317_v8 = vld [vmem:[#allocation13 + $0x1b0] sm:$0xff] }
 0x4a7   :  { %v3579_v60 = vsel %vm3578_vm0, %v6387_v14, %v3575_v6  ;;  %v6318_v14 = vld [vmem:[#allocation13 + $0x1b8] sm:$0xff]  ;;  %v6296_v6 = vld [vmem:[#allocation13 + $0x108] sm:$0xff] }
 0x4a8   :  { %v3580_v31 = vmul.f32 %v3579_v60, %v3557_v5  ;;  %v3581_v27 = vmul.f32 %v3579_v60, %v3558_v56  ;;  %v6282_v5 = vld [vmem:[#allocation13 + $0x98] sm:$0xff] }
 0x4a9   :  { %v3754_v56 = vld [vmem:[#allocation11 + $0x10] sm:$0x3] }
 0x4aa   :  { %v3586_v62 = vmul.f32 %v6375_v45, %v3580_v31  ;;  %v3587_v44 = vmul.f32 %v6375_v45, %v3581_v27  ;;  %v6287_v45 = vld [vmem:[#allocation13 + $0xc0] sm:$0xff]  ;;  %v6326_v60 = vld [vmem:[#allocation13 + $0x1f8] sm:$0xff]  ;;  %v6309_v31 = vld [vmem:[#allocation13 + $0x170] sm:$0xff] }
 0x4ab   :  { %v6316_v27 = vld [vmem:[#allocation13 + $0x1a8] sm:$0xff] }
 0x4ac   :  { %v3592_v18 = vadd.f32 %v6376_v4, %v3586_v62  ;;  %v3593_v34 = vadd.f32 %v6376_v4, %v3587_v44  ;;  %v6295_v4 = vld [vmem:[#allocation13 + $0x100] sm:$0xff]  ;;  %v6308_v62 = vld [vmem:[#allocation13 + $0x168] sm:$0xff] }
 0x4ad   :  { %v6315_v44 = vld [vmem:[#allocation13 + $0x1a0] sm:$0xff] }
 0x4ae   :  { %vm3594_vm1 = vcmp.ge.f32.partialorder %v3592_v18, 0.0  ;;  %vm3595_vm2 = vcmp.ge.f32.partialorder %v3593_v34, 0.0  ;;  %v3596_v32 = vmul.f32 0.01, %v3592_v18  ;;  %v3597_v28 = vmul.f32 0.01, %v3593_v34 }
 0x4b0   :  { %v3598_v25 = vsel %vm3594_vm1, %v3592_v18, %v3596_v32  ;;  %v3599_v11 = vsel %vm3595_vm2, %v3593_v34, %v3597_v28  ;;  %v6325_v18 = vld [vmem:[#allocation13 + $0x1f0] sm:$0xff]  ;;  %v6324_v34 = vld [vmem:[#allocation13 + $0x1e8] sm:$0xff]  ;;  %v6307_v32 = vld [vmem:[#allocation13 + $0x160] sm:$0xff] }
 0x4b1   :  { %v3600_v29 = vpack.c.bf16 %v3599_v11, %v3598_v25  ;;  %v6314_v28 = vld [vmem:[#allocation13 + $0x198] sm:$0xff]  ;;  %v6313_v11 = vld [vmem:[#allocation13 + $0x190] sm:$0xff] }
 0x4b2   :  { %v6306_v25 = vld [vmem:[#allocation13 + $0x158] sm:$0xff] }
 0x4b3   :  { %3613 = vmatpush.bf16.msra.mxu2 %v3600_v29  ;;  %3632 = vmatpush.bf16.msra.mxu3 %v3600_v29 }
 0x4b4   :  { %3651 = vmatpush.bf16.msra.mxu0 %v3600_v29  ;;  %3727 = vmatpush.bf16.msrb.mxu1 %v3600_v29 }
 0x4b6   :  { %5661 = vmatmul.msk.bf16.vlgmr.msra.gmra.mxu2 %vm3602_vm3, %v3601_v37  ;;  %5662 = vmatmul.msk.bf16.vlgmr.msra.gmra.mxu3 %vm3602_vm3, %v3621_v19  ;;  %v6305_v37 = vld [vmem:[#allocation13 + $0x150] sm:$0xff]  ;;  %v6312_v19 = vld [vmem:[#allocation13 + $0x188] sm:$0xff] }
 0x4b7   :  { %3670 = vmatpush.bf16.msrb.mxu2 %v3600_v29  ;;  %3689 = vmatpush.bf16.msrb.mxu3 %v3600_v29 }
 0x4b8   :  { %3708 = vmatpush.bf16.msrb.mxu0 %v3600_v29  ;;  %5667 = vmatmul.msk.bf16.vlgmr.msrb.gmra.mxu1 %vm3602_vm3, %v3716_v36  ;;  %v6304_v36 = vld [vmem:[#allocation13 + $0x148] sm:$0xff] }
 0x4b9   :  { %5663 = vmatmul.msk.bf16.vlgmr.msra.gmra.mxu0 %vm3602_vm3, %v3640_v33  ;;  %4365 = vmatpush.bf16.msra.mxu1 %v6278_v24  ;;  %v6322_v33 = vld [vmem:[#allocation13 + $0x1d8] sm:$0xff]  ;;  %v6320_v24 = vld [vmem:[#allocation13 + $0x1c8] sm:$0xff] }
 0x4bb   :  { %3746 = vmatpush.bf16.msra.mxu2 %v3600_v29  ;;  %3765 = vmatpush.bf16.msra.mxu3 %v3600_v29  ;;  %v6323_v29 = vld [vmem:[#allocation13 + $0x1e0] sm:$0xff] }
 0x4bc   :  { %4352 = vmatpush.bf16.msra.mxu0 %v6270_v21  ;;  %v6311_v21 = vld [vmem:[#allocation13 + $0x180] sm:$0xff] }
 0x4bd   :  { %4366 = vmatpush.bf16.msra.mxu1 %v6277_v41  ;;  %v6303_v41 = vld [vmem:[#allocation13 + $0x140] sm:$0xff] }
 0x4c0   :  { %4353 = vmatpush.bf16.msra.mxu0 %v6269_v61  ;;  %v6321_v61 = vld [vmem:[#allocation13 + $0x1d0] sm:$0xff] }
 0x4c1   :  { %4367 = vmatpush.bf16.msra.mxu1 %v6276_v23 }
 0x4c4   :  { %4354 = vmatpush.bf16.msra.mxu0 %v6268_v42 }
 0x4c5   :  { %4368 = vmatpush.bf16.msra.mxu1 %v6275_v7  ;;  %v6333_v7 = vld [vmem:[#allocation13 + $0x230] sm:$0xff] }
 0x4c6   :  { %5664 = vmatmul.msk.bf16.vlgmr.msrb.gmra.mxu2 %vm3602_vm3, %v3659_v17  ;;  %5665 = vmatmul.msk.bf16.vlgmr.msrb.gmra.mxu3 %vm3602_vm3, %v3678_v39  ;;  %v6319_v39 = vld [vmem:[#allocation13 + $0x1c0] sm:$0xff] }
 0x4c7   :  { %4378 = vmatpush.bf16.msrb.mxu2 %v6286_v55  ;;  %4391 = vmatpush.bf16.msrb.mxu3 %v6294_v0  ;;  %v6334_v55 = vld [vmem:[#allocation13 + $0x238] sm:$0xff] }
 0x4c8   :  { %4355 = vmatpush.bf16.msra.mxu0 %v6267_v10 }
 0x4c9   :  { %5666 = vmatmul.msk.bf16.vlgmr.msrb.gmra.mxu0 %vm3602_vm3, %v3697_v47  ;;  %4369 = vmatpush.bf16.msra.mxu1 %v6274_v13  ;;  %v6332_v13 = vld [vmem:[#allocation13 + $0x228] sm:$0xff] }
 0x4cb   :  { %4379 = vmatpush.bf16.msrb.mxu2 %v6285_v35  ;;  %4392 = vmatpush.bf16.msrb.mxu3 %v6293_v20 }
 0x4cc   :  { %4356 = vmatpush.bf16.msra.mxu0 %v6266_v9 }
 0x4cd   :  { %4370 = vmatpush.bf16.msra.mxu1 %v6273_v2 }
 0x4cf   :  { %4380 = vmatpush.bf16.msrb.mxu2 %v6284_v40  ;;  %4393 = vmatpush.bf16.msrb.mxu3 %v6292_v51 }
 0x4d0   :  { %4357 = vmatpush.bf16.msra.mxu0 %v6265_v1 }
 0x4d1   :  { %4371 = vmatpush.bf16.msra.mxu1 %v6272_v38 }
 0x4d3   :  { %4381 = vmatpush.bf16.msrb.mxu2 %v6283_v49  ;;  %4394 = vmatpush.bf16.msrb.mxu3 %v6291_v57 }
 0x4d4   :  { %4358 = vmatpush.bf16.msra.mxu0 %v6264_v46  ;;  %v6331_v46 = vld [vmem:[#allocation13 + $0x220] sm:$0xff] }
 0x4d5   :  { %4372 = vmatpush.bf16.msra.mxu1 %v6271_v16 }
 0x4d6   :  { %5668 = vmatmul.msk.bf16.vlgmr.msra.gmra.mxu2 %vm3602_vm3, %v3735_v15  ;;  %5669 = vmatmul.msk.bf16.vlgmr.msra.gmra.mxu3 %vm3602_vm3, %v3754_v56  ;;  %v6330_v15 = vld [vmem:[#allocation13 + $0x218] sm:$0xff] }
 0x4d7   :  { %4382 = vmatpush.bf16.msrb.mxu2 %v6282_v5  ;;  %4395 = vmatpush.bf16.msrb.mxu3 %v6290_v3  ;;  %v6329_v3 = vld [vmem:[#allocation13 + $0x210] sm:$0xff] }
 0x4d8   :  { %4359 = vmatpush.bf16.msra.mxu0 %v6263_v52 }
 0x4d9   :  { %4417 = vmatpush.bf16.msrb.mxu1 %v6310_v22 }
 0x4db   :  { %4383 = vmatpush.bf16.msrb.mxu2 %v6281_v59  ;;  %4396 = vmatpush.bf16.msrb.mxu3 %v6289_v54  ;;  %v6328_v54 = vld [vmem:[#allocation13 + $0x208] sm:$0xff] }
 0x4dc   :  { %4404 = vmatpush.bf16.msrb.mxu0 %v6302_v53 }
 0x4dd   :  { %4418 = vmatpush.bf16.msrb.mxu1 %v6309_v31 }
 0x4df   :  { %4384 = vmatpush.bf16.msrb.mxu2 %v6280_v43  ;;  %4397 = vmatpush.bf16.msrb.mxu3 %v6288_v30 }
 0x4e0   :  { %4405 = vmatpush.bf16.msrb.mxu0 %v6301_v26 }
 0x4e1   :  { %4419 = vmatpush.bf16.msrb.mxu1 %v6308_v62 }
 0x4e3   :  { %4385 = vmatpush.bf16.msrb.mxu2 %v6279_v63  ;;  %4398 = vmatpush.bf16.msrb.mxu3 %v6287_v45  ;;  %v6377_v45 = vld [vmem:[%s7752_s13] ss:$0 sm:$0xff] }
 0x4e4   :  { %4406 = vmatpush.bf16.msrb.mxu0 %v6300_v12  ;;  %v6327_v12 = vld [vmem:[#allocation13 + $0x200] sm:$0xff] }
 0x4e5   :  { %4420 = vmatpush.bf16.msrb.mxu1 %v6307_v32 }
 0x4e7   :  { %4430 = vmatpush.bf16.msra.mxu2 %v6318_v14  ;;  %4443 = vmatpush.bf16.msra.mxu3 %v6326_v60 }
 0x4e8   :  { %4407 = vmatpush.bf16.msrb.mxu0 %v6299_v48 }
 0x4e9   :  { %4421 = vmatpush.bf16.msrb.mxu1 %v6306_v25 }
 0x4eb   :  { %4431 = vmatpush.bf16.msra.mxu2 %v6317_v8  ;;  %4444 = vmatpush.bf16.msra.mxu3 %v6325_v18 }
 0x4ec   :  { %4408 = vmatpush.bf16.msrb.mxu0 %v6298_v58 }
 0x4ed   :  { %4422 = vmatpush.bf16.msrb.mxu1 %v6305_v37 }
 0x4ef   :  { %4432 = vmatpush.bf16.msra.mxu2 %v6316_v27  ;;  %4445 = vmatpush.bf16.msra.mxu3 %v6324_v34 }
 0x4f0   :  { %4409 = vmatpush.bf16.msrb.mxu0 %v6297_v50 }
 0x4f1   :  { %4423 = vmatpush.bf16.msrb.mxu1 %v6304_v36 }
 0x4f3   :  { %4433 = vmatpush.bf16.msra.mxu2 %v6315_v44  ;;  %4446 = vmatpush.bf16.msra.mxu3 %v6323_v29 }
 0x4f4   :  { %4410 = vmatpush.bf16.msrb.mxu0 %v6296_v6 }
 0x4f5   :  { %4424 = vmatpush.bf16.msrb.mxu1 %v6303_v41 }
 0x4f7   :  { %4434 = vmatpush.bf16.msra.mxu2 %v6314_v28  ;;  %4447 = vmatpush.bf16.msra.mxu3 %v6322_v33 }
 0x4f8   :  { %4411 = vmatpush.bf16.msrb.mxu0 %v6295_v4 }
 0x4fb   :  { %4435 = vmatpush.bf16.msra.mxu2 %v6313_v11  ;;  %4448 = vmatpush.bf16.msra.mxu3 %v6321_v61  ;;  %v6687_v11 = vmov 4.0  }
 0x4fc   :  { %6388 = vrcp.f32 %v6687_v11  ;;  %v5978_v11 = vld [vmem:[#allocation16 + $0x28] sm:$0xf0] }
 0x4ff   :  { %4436 = vmatpush.bf16.msra.mxu2 %v6312_v19  ;;  %4449 = vmatpush.bf16.msra.mxu3 %v6320_v24 }
 0x502   :  { %v6389_v36 = vpop.eup %6388 }
 0x503   :  { %4437 = vmatpush.bf16.msra.mxu2 %v6311_v21  ;;  %4450 = vmatpush.bf16.msra.mxu3 %v6319_v39  ;;  %v4478_v61 = vmul.f32 4.0, %v6389_v36  ;;  %v6016_v39 = vld [vmem:[#allocation16 + $0x70] sm:$0xf]  ;;  %vm4482_vm5 = vweird.f32 %v6389_v36 }
 0x535   :  { %v3729_v10 = vpop.f32.mrf.mxu1 }
 0x536   :  { %v3653_v42 = vpop.f32.mrf.mxu0  ;;  %v3733_v51 = vpack.c.bf16 %v3729_v10, %v3729_v10 }
 0x537   :  { %v3657_v23 = vpack.c.bf16 %v3653_v42, %v3653_v42 }
 0x539   :  { %4386 = vmatmul.bf16.vlgmr.msrb.gmra.mxu2 %v3657_v23  ;;  %v3615_v17 = vpop.f32.mrf.mxu2  ;;  %v3634_v47 = vpop.f32.mrf.mxu3  ;;  %v4479_v23 = vsub.f32 1.0, %v4478_v61 }
 0x53a   :  { %v3619_v0 = vpack.c.bf16 %v3615_v17, %v3615_v17  ;;  %v3638_v9 = vpack.c.bf16 %v3634_v47, %v3634_v47 }
 0x53b   :  { %v4480_v47 = vmul.f32 %v6389_v36, %v4479_v23  ;;  %v5960_v23 = vld [vmem:[#allocation16] sm:$0xf] }
 0x53c   :  { %4360 = vmatmul.bf16.vlgmr.msra.gmra.mxu0 %v3619_v0  ;;  %4373 = vmatmul.bf16.vlgmr.msra.gmra.mxu1 %v3638_v9  ;;  %v6350_v0 = vld [vmem:[#allocation16 + $0x74] sm:$0xf0] }
 0x53d   :  { %4456 = vmatpush.bf16.msra.mxu0 %v6334_v55  ;;  %v3731_v20 = vpop.f32.mrf.mxu1  ;;  %v6017_v9 = vor.u32 %v6350_v0, %v6016_v39  ;;  %v5962_v39 = vld [vmem:[#allocation16 + $0x8] sm:$0xf0] }
 0x53e   :  { %v3655_v35 = vpop.f32.mrf.mxu0 }
 0x53f   :  { %v6018_v35 = vld [vmem:[#allocation16 + $0x78] sm:$0xf0]  ;;  %4623 = vmatpush.bf16.msra.mxu1 %v6017_v9 }
 0x541   :  { %v3617_v1 = vpop.f32.mrf.mxu2  ;;  %4457 = vmatpush.bf16.msra.mxu0 %v6333_v7  ;;  %v3636_v40 = vpop.f32.mrf.mxu3  ;;  %v6349_v7 = vld [vmem:[#allocation16 + $0x74] sm:$0xf] }
 0x542   :  { %v6021_v1 = vor.u32 %v6349_v7, %v6018_v35 }
 0x544   :  { %4636 = vmatpush.bf16.msrb.mxu2 %v6021_v1 }
 0x545   :  { %4458 = vmatpush.bf16.msra.mxu0 %v6332_v13 }
 0x546   :  { %v3710_v2 = vpop.f32.mrf.mxu0 }
 0x547   :  { %v3714_v57 = vpack.c.bf16 %v3710_v2, %v3710_v2  ;;  %v4481_v2 = vadd.f32 %v6389_v36, %v4480_v47 }
 0x549   :  { %4438 = vmatmul.bf16.vlgmr.msra.gmra.mxu2 %v3733_v51  ;;  %v3672_v49 = vpop.f32.mrf.mxu2  ;;  %4459 = vmatpush.bf16.msra.mxu0 %v6331_v46  ;;  %v3691_v53 = vpop.f32.mrf.mxu3  ;;  %v6008_v51 = vld [vmem:[#allocation16 + $0x60] sm:$0xf]  ;;  %v6348_v46 = vld [vmem:[#allocation16 + $0x64] sm:$0xf0] }
 0x54a   :  { %v3676_v52 = vpack.c.bf16 %v3672_v49, %v3672_v49  ;;  %v3695_v5 = vpack.c.bf16 %v3691_v53, %v3691_v53  ;;  %v6009_v49 = vor.u32 %v6348_v46, %v6008_v51  ;;  %v6378_v46 = vld [vmem:[%s7753_s14] ss:$0 sm:$0xff] }
 0x54c   :  { %4399 = vmatmul.bf16.vlgmr.msrb.gmra.mxu3 %v3676_v52  ;;  %4412 = vmatmul.bf16.vlgmr.msrb.gmra.mxu0 %v3695_v5  ;;  %v6010_v52 = vld [vmem:[#allocation16 + $0x68] sm:$0xf0] }
 0x54d   :  { %4425 = vmatmul.bf16.vlgmr.msrb.gmra.mxu1 %v3714_v57  ;;  %4460 = vmatpush.bf16.msra.mxu0 %v6330_v15  ;;  %v6347_v57 = vld [vmem:[#allocation16 + $0x64] sm:$0xf] }
 0x54e   :  { %v3712_v56 = vpop.f32.mrf.mxu0  ;;  %v6013_v15 = vor.u32 %v6347_v57, %v6010_v52  ;;  %4624 = vmatpush.bf16.msra.mxu1 %v6009_v49  ;;  %v6379_v57 = vld [vmem:[#allocation14] ss:$0 sm:$0xff] }
 0x54f   :  { %v6000_v56 = vld [vmem:[#allocation16 + $0x50] sm:$0xf] }
 0x550   :  { %4637 = vmatpush.bf16.msrb.mxu2 %v6013_v15 }
 0x551   :  { %v3674_v26 = vpop.f32.mrf.mxu2  ;;  %v3693_v59 = vpop.f32.mrf.mxu3  ;;  %4461 = vmatpush.bf16.msra.mxu0 %v6329_v3  ;;  %v6346_v3 = vld [vmem:[#allocation16 + $0x54] sm:$0xf0] }
 0x552   :  { %v4483_v26 = vsel %vm4482_vm5, %v6389_v36, %v4481_v2  ;;  %v6001_v59 = vor.u32 %v6346_v3, %v6000_v56  ;;  %v6337_v36 = vld [vmem:[#allocation16 + $0x14] sm:$0xf]  ;;  %v4537_v3 = vld [vmem:[%s7756_s17] sm:$0x3] }
 0x554   :  { %4625 = vmatpush.bf16.msra.mxu1 %v6001_v59 }
 0x555   :  { %4462 = vmatpush.bf16.msra.mxu0 %v6328_v54  ;;  %v6345_v54 = vld [vmem:[#allocation16 + $0x54] sm:$0xf] }
 0x559   :  { %v3748_v43 = vpop.f32.mrf.mxu2  ;;  %v3767_v48 = vpop.f32.mrf.mxu3  ;;  %4463 = vmatpush.bf16.msra.mxu0 %v6327_v12  ;;  %v6002_v12 = vld [vmem:[#allocation16 + $0x58] sm:$0xf0] }
 0x55a   :  { %v3752_v30 = vpack.c.bf16 %v3748_v43, %v3748_v43  ;;  %v3771_v58 = vpack.c.bf16 %v3767_v48, %v3767_v48 }
 0x55c   :  { %4451 = vmatmul.bf16.vlgmr.msra.gmra.mxu3 %v3752_v30  ;;  %4464 = vmatmul.bf16.vlgmr.msra.gmra.mxu0 %v3771_v58  ;;  %v6005_v30 = vor.u32 %v6345_v54, %v6002_v12  ;;  %v5992_v58 = vld [vmem:[#allocation16 + $0x40] sm:$0xf]  ;;  %v4540_v12 = vperm.slane %v4537_v3, 1 }
 0x55e   :  { %4638 = vmatpush.bf16.msrb.mxu2 %v6005_v30 }
 0x561   :  { %v3750_v38 = vpop.f32.mrf.mxu2  ;;  %v3769_v63 = vpop.f32.mrf.mxu3 }
 0x562   :  { %v6344_v38 = vld [vmem:[#allocation16 + $0x44] sm:$0xf0]  ;;  %v6343_v63 = vld [vmem:[#allocation16 + $0x44] sm:$0xf] }
 0x5b9   :  { %v4361_v14 = vpop.f32.mrf.mxu0  ;;  %v4374_v50 = vpop.f32.mrf.mxu1 }
 0x5ba   :  { %v4362_v60 = vadd.f32 %v6377_v45, %v4361_v14  ;;  %v5993_v14 = vor.u32 %v6344_v38, %v5992_v58  ;;  %v6342_v45 = vld [vmem:[#allocation16 + $0x34] sm:$0xf0] }
 0x5bc   :  { %v4387_v16 = vpop.f32.mrf.mxu2  ;;  %v4375_v62 = vadd.f32 %v4374_v50, %v4362_v60  ;;  %v5994_v50 = vld [vmem:[#allocation16 + $0x48] sm:$0xf0]  ;;  %4626 = vmatpush.bf16.msra.mxu1 %v5993_v14  ;;  %v6341_v60 = vld [vmem:[#allocation16 + $0x34] sm:$0xf] }
 0x5be   :  { %v4388_v18 = vadd.f32 %v4387_v16, %v4375_v62 }
 0x5c1   :  { %v4363_v22 = vpop.f32.mrf.mxu0  ;;  %v4376_v8 = vpop.f32.mrf.mxu1 }
 0x5c2   :  { %v5997_v22 = vor.u32 %v6343_v63, %v5994_v50 }
 0x5c4   :  { %v4389_v6 = vpop.f32.mrf.mxu2  ;;  %4639 = vmatpush.bf16.msrb.mxu2 %v5997_v22 }
 0x5c5   :  { %v5984_v6 = vld [vmem:[#allocation16 + $0x30] sm:$0xf] }
 0x5c9   :  { %v4413_v31 = vpop.f32.mrf.mxu0 }
 0x5ca   :  { %v4426_v27 = vpop.f32.mrf.mxu1 }
 0x5cc   :  { %v4439_v4 = vpop.f32.mrf.mxu2 }
 0x5cf   :  { %v4400_v44 = vpop.f32.mrf.mxu3 }
 0x5d0   :  { %v4401_v34 = vadd.f32 %v4400_v44, %v4388_v18  ;;  %v5976_v18 = vld [vmem:[#allocation16 + $0x20] sm:$0xf] }
 0x5d1   :  { %v4415_v32 = vpop.f32.mrf.mxu0 }
 0x5d2   :  { %v4428_v28 = vpop.f32.mrf.mxu1  ;;  %v4414_v29 = vadd.f32 %v4413_v31, %v4401_v34  ;;  %v5985_v31 = vor.u32 %v6342_v45, %v5984_v6  ;;  %v6340_v34 = vld [vmem:[#allocation16 + $0x24] sm:$0xf0]  ;;  %v6339_v32 = vld [vmem:[#allocation16 + $0x24] sm:$0xf] }
 0x5d4   :  { %v4441_v25 = vpop.f32.mrf.mxu2  ;;  %v4427_v19 = vadd.f32 %v4426_v27, %v4414_v29  ;;  %v5986_v27 = vld [vmem:[#allocation16 + $0x38] sm:$0xf0]  ;;  %4627 = vmatpush.bf16.msra.mxu1 %v5985_v31  ;;  %v5981_v29 = vor.u32 %v6339_v32, %v5978_v11 }
 0x5d5   :  { %v5989_v62 = vor.u32 %v6341_v60, %v5986_v27  ;;  %v5977_v25 = vor.u32 %v6340_v34, %v5976_v18 }
 0x5d6   :  { %v4440_v21 = vadd.f32 %v4439_v4, %v4427_v19  ;;  %v5968_v19 = vld [vmem:[#allocation16 + $0x10] sm:$0xf] }
 0x5d7   :  { %v4402_v37 = vpop.f32.mrf.mxu3  ;;  %4640 = vmatpush.bf16.msrb.mxu2 %v5989_v62 }
 0x5d8   :  { %4628 = vmatpush.bf16.msra.mxu1 %v5977_v25 }
 0x5d9   :  { %v4465_v33 = vpop.f32.mrf.mxu0 }
 0x5db   :  { %4641 = vmatpush.bf16.msrb.mxu2 %v5981_v29 }
 0x5df   :  { %v4452_v24 = vpop.f32.mrf.mxu3 }
 0x5e0   :  { %v4453_v41 = vadd.f32 %v4452_v24, %v4440_v21  ;;  %v5970_v24 = vld [vmem:[#allocation16 + $0x18] sm:$0xf0] }
 0x5e1   :  { %v4467_v10 = vpop.f32.mrf.mxu0 }
 0x5e2   :  { %v4466_v42 = vadd.f32 %v4465_v33, %v4453_v41  ;;  %v6338_v33 = vld [vmem:[#allocation16 + $0x14] sm:$0xf0]  ;;  %v5973_v41 = vor.u32 %v6337_v36, %v5970_v24  ;;  %v6336_v10 = vld [vmem:[#allocation16 + $0x4] sm:$0xf0] }
 0x5e3   :  { %v5969_v61 = vor.u32 %v6338_v33, %v5968_v19 }
 0x5e4   :  { %v4470_v17 = vsel %vm4469_vm4, %v4466_v42, 0.0  ;;  %4642 = vmatpush.bf16.msrb.mxu2 %v5973_v41 }
 0x5e5   :  { %v4471_v55 = vrot.slane %v4470_v17, 4  ;;  %4629 = vmatpush.bf16.msra.mxu1 %v5969_v61 }
 0x5e7   :  { %v4472_v20 = vadd.f32 %v4471_v55, %v4470_v17  ;;  %v4454_v13 = vpop.f32.mrf.mxu3  ;;  %v5961_v17 = vor.u32 %v6336_v10, %v5960_v23  ;;  %v6335_v55 = vld [vmem:[#allocation16 + $0x4] sm:$0xf] }
 0x5e8   :  { %v5965_v47 = vor.u32 %v6335_v55, %v5962_v39 }
 0x5e9   :  { %v4473_v40 = vrot.slane %v4472_v20, 2  ;;  %4630 = vmatpush.bf16.msra.mxu1 %v5961_v17 }
 0x5ea   :  { %4643 = vmatpush.bf16.msrb.mxu2 %v5965_v47 }
 0x5eb   :  { %v4474_v53 = vadd.f32 %v4473_v40, %v4472_v20 }
 0x5ed   :  { %v4475_v5 = vrot.slane %v4474_v53, 1 }
 0x5ef   :  { %v4476_v43 = vadd.f32 %v4475_v5, %v4474_v53 }
 0x5f1   :  { %v4484_v48 = vmul.f32 %v4483_v26, %v4476_v43 }
 0x5f3   :  { %v4485_v16 = vsub.f32 %v4466_v42, %v4484_v48 }
 0x5f5   :  { %v4486_v8 = vmul.f32 %v4485_v16, %v4485_v16 }
 0x5f7   :  { %v4487_v4 = vsel %vm4469_vm4, %v4486_v8, 0.0 }
 0x5f8   :  { %v4488_v44 = vrot.slane %v4487_v4, 4 }
 0x5fa   :  { %v4489_v28 = vadd.f32 %v4488_v44, %v4487_v4 }
 0x5fc   :  { %v4490_v37 = vrot.slane %v4489_v28, 2 }
 0x5fe   :  { %v4491_v21 = vadd.f32 %v4490_v37, %v4489_v28 }
 0x600   :  { %v4492_v42 = vrot.slane %v4491_v21, 1 }
 0x602   :  { %v4493_v0 = vadd.f32 %v4492_v42, %v4491_v21 }
 0x604   :  { %v4494_v9 = vmul.f32 %v4493_v0, %v4483_v26  ;;  %v4539_v26 = vperm.slane %v4537_v3, 0 }
 0x606   :  { %v4495_v7 = vadd.f32 1e-05, %v4494_v9 }
 0x608   :  { %6390 = vrsqrt.f32 %v4495_v7  ;;  %vm4502_vm7 = vweird.f32 %v4495_v7 }
 0x60e   :  { %v6391_v35 = vpop.eup %6390 }
 0x60f   :  { %v4497_v20 = vmul.f32 %v6391_v35, %v4495_v7  ;;  %vm4503_vm6 = vweird.f32 %v6391_v35 }
 0x610   :  { %vm4504_vm8 = vmor %vm4502_vm7, %vm4503_vm6 }
 0x611   :  { %v4498_v1 = vmul.f32 %v6391_v35, %v4497_v20 }
 0x613   :  { %v4499_v13 = vmul.f32 0.5, %v4498_v1 }
 0x615   :  { %v4500_v40 = vsub.f32 1.5, %v4499_v13 }
 0x617   :  { %v4501_v51 = vmul.f32 %v6391_v35, %v4500_v40 }
 0x619   :  { %v4505_v2 = vsel %vm4504_vm8, %v6391_v35, %v4501_v51 }
 0x61a   :  { %v4506_v49 = vmul.f32 %v4505_v2, %v4485_v16 }
 0x61c   :  { %v4511_v52 = vmul.f32 %v6378_v46, %v4506_v49 }
 0x61e   :  { %v4516_v53 = vadd.f32 %v6379_v57, %v4511_v52 }
 0x620   :  { %vm4517_vm9 = vcmp.ge.f32.partialorder %v4516_v53, 0.0  ;;  %v4518_v15 = vmul.f32 0.01, %v4516_v53 }
 0x622   :  { %v4519_v5 = vsel %vm4517_vm9, %v4516_v53, %v4518_v15 }
 0x623   :  { %v4520_v56 = vpack.c.bf16 %v4519_v5, %v4519_v5 }
 0x625   :  { %4631 = vmatmul.bf16.vlgmr.msra.gmra.mxu1 %v4520_v56  ;;  %4644 = vmatmul.bf16.vlgmr.msrb.gmra.mxu2 %v4520_v56 }
 0x6a2   :  { %v4632_v59 = vpop.f32.mrf.mxu1 }
 0x6a3   :  { %v4633_v54 = vadd.f32 %v4632_v59, %v4539_v26 }
 0x6a5   :  { %4649 = vst [vmem:[#allocation17] sm:$0xf] %v4633_v54 }
 0x6a6   :  { %4661 = dma.vmem_to_hbm [thread:$0]  %s4657_s20, 64, %s4659_s3, [#allocation4]  }
 0x6a8   :  { %v4645_v43 = vpop.f32.mrf.mxu2 }
 0x6a9   :  { %v4646_v30 = vadd.f32 %v4645_v43, %v4540_v12 }
 0x6aa   :  { %v4634_v48 = vpop.f32.mrf.mxu1 }
 0x6ab   :  { %4650 = vst [vmem:[#allocation18] sm:$0xf] %v4646_v30 }
 0x6ac   :  { %4672 = dma.vmem_to_hbm [thread:$0]  %s4668_s11, 64, %s4670_s6, [#allocation19]  }
 0x6b0   :  { %v4647_v58 = vpop.f32.mrf.mxu2 }
 0x6b1   :  { %6666 = dma.done.wait [#allocation4], 64  }
 0x6b2   :  { %6667 = vsyncadd [#allocation4], 4294967232 }
 0x6b3   :  { %6668 = dma.done.wait [#allocation19], 64  }
 0x6b4   :  { %6669 = vsyncadd [#allocation19], 4294967232 }
 0x6b5   :  { %4681 = vsyncpa [#allocation3], 1 }
 0x6b6   :  { %4682 = vsyncpa [#allocation6], 1 }
 0x6b7   :  { %4683 = vsyncpa [#allocation9], 1 }
 0x6b8   :  { %4684 = vsyncpa [#allocation12], 1 }
 0x6b9   :  { %4685 = vsyncpa [#allocation15], 1 }
 0x6ba   :  { %4686 = vsyncpa [#allocation4], 1 }
 0x6bb   :  { %4687 = vsyncpa [#allocation19], 1 }

</bundles_post_ra>
